<compile_context>
chip_gen: v7x
topology: tpu7x:2x2x1
jax: 0.10.0
libtpu: 0.0.40
codegen_flags: <defaults>
</compile_context>

<pallas_src>
import functools

import jax
import jax.numpy as jnp
from jax.experimental import pallas as pl
from jax.experimental.pallas import tpu as pltpu


def _place_lanes(pieces):
    """pieces[i]: (..., 1) -> (..., len(pieces)) with pieces[i] at lane i."""
    n = len(pieces)
    nd = pieces[0].ndim
    pos = jax.lax.broadcasted_iota(jnp.int32, (1,) * (nd - 1) + (n,), nd - 1)
    out = jnp.zeros(pieces[0].shape[:-1] + (n,), pieces[0].dtype)
    for i, p in enumerate(pieces):
        out = jnp.where(pos == i, p, out)
    return out


def _shared_mlp(p, w1, b1, w2, b2):
    """Position-wise 2-layer MLP as VPU broadcast-MACs.

    p: (N, Gc, L) float32 -> (N, Gc, L).  mid and Gc are tiny, so this avoids
    padding-dominated MXU pushes entirely.
    """
    h = jnp.sum(w1[None, :, :, None] * p[:, None, :, :], axis=2)        # (N, mid, L)
    h = jnp.maximum(h + b1[None, :, :], 0.0)
    y = jnp.sum(w2[None, :, :, None] * h[:, None, :, :], axis=2)        # (N, Gc, L)
    return y + b2[None, :, :]


def _ggca3d_kernel(x_ref, w1_ref, b1_ref, w2_ref, b2_ref, pool_ref, expand_ref,
                   o_ref, *, H, W):
    x = x_ref[...].astype(jnp.float32)            # (nBG, Gc, D, H*W), lane-dense
    nbg, gc, d, hw = x.shape

    w1 = w1_ref[...]                              # (mid, Gc)  BN folded into conv1
    b1 = b1_ref[...]                              # (mid, 1)
    w2 = w2_ref[...]                              # (Gc, mid)
    b2 = b2_ref[...]                              # (Gc, 1)
    pool_mat = pool_ref[...]                      # (HW, H+W) block-one-hot, avg scales baked in
    expand_mat = expand_ref[...]                  # (H+W, HW) one-hot lane expansion

    # ---------------- directional pooling ----------------
    # D direction: reduce the (H*W) lane axis.
    avg_d = jnp.sum(x, axis=3) * (1.0 / hw)       # (nBG, Gc, D)
    max_d = jnp.max(x, axis=3)                    # (nBG, Gc, D)

    # Reduce over D first; remaining reductions act on volume/D data only.
    s_hw = jnp.sum(x, axis=2)                     # (nBG, Gc, H*W)
    m_hw = jnp.max(x, axis=2)                     # (nBG, Gc, H*W)

    # Avg pools for H and W in ONE MXU matmul against the block-one-hot
    # pooling matrix (the 1/(D*W) and 1/(D*H) scales are folded into pool_mat).
    avg_hw = jnp.dot(s_hw.reshape(nbg * gc, hw), pool_mat,
                     preferred_element_type=jnp.float32
                     ).reshape(nbg, gc, H + W)    # (nBG, Gc, H+W) = [avg_h | avg_w]

    # Max pools stay on the slice/select path (cannot go through the MXU).
    seg_m = [m_hw[..., h * W:(h + 1) * W] for h in range(H)]           # H x (nBG, Gc, W)
    max_h = _place_lanes([s.max(axis=-1, keepdims=True) for s in seg_m])  # (nBG, Gc, H)
    max_w = functools.reduce(jnp.maximum, seg_m)                       # (nBG, Gc, W)

    # ------------- shared conv MLP: ONE pass, avg & max and all 3 dirs fused
    p_avg = jnp.concatenate([avg_d, avg_hw], axis=-1)                  # (nBG, Gc, D+H+W)
    p_max = jnp.concatenate([max_d, max_h, max_w], axis=-1)            # (nBG, Gc, D+H+W)
    y = _shared_mlp(jnp.concatenate([p_avg, p_max], axis=0), w1, b1, w2, b2)
    att = jax.nn.sigmoid(y[:nbg] + y[nbg:])                            # (nBG, Gc, D+H+W)
    att_d = att[..., :d]                                               # (nBG, Gc, D)
    att_h = att[..., d:d + H].reshape(nbg * gc, H)
    att_w = att[..., d + H:].reshape(nbg * gc, W)

    # ------------- expand H/W attention to the H*W lane axis on the idle MXU
    att_hw = (jnp.dot(att_h, expand_mat[:H], preferred_element_type=jnp.float32)
              * jnp.dot(att_w, expand_mat[H:], preferred_element_type=jnp.float32)
              ).reshape(nbg, gc, hw)                                   # (nBG, Gc, H*W)

    # ------------- apply attention; no full-volume `att` temporary -----------
    o_ref[...] = (x * att_hw[:, :, None, :] * att_d[:, :, :, None]).astype(o_ref.dtype)


def _device_defaults():
    """(target_block_bytes, vmem_limit_cap, min_grid_steps) per TPU generation."""
    try:
        kind = jax.devices()[0].device_kind.lower()
    except Exception:
        kind = ""
    if "v7" in kind:
        return 6 << 20, 44 << 20, 4      # 64 MiB VMEM/TC, 2 TCs -> keep >=4 (even) steps
    if ("v5" in kind) or ("v6" in kind):
        return 8 << 20, 96 << 20, 2      # 128 MiB VMEM, single TC
    return 4 << 20, 40 << 20, 2          # unknown / older: conservative


def _pick_block_bg(bg, vmem_need, io_bytes_per_bg, target_bytes, vmem_budget, min_steps):
    """Largest divisor of BG whose block fits the byte target and VMEM budget,
    preferring grids long enough (and even, on v7x) to keep both cores fed."""
    divs = [d for d in range(1, bg + 1) if bg % d == 0]
    fit = [d for d in divs if vmem_need(d) <= vmem_budget]
    if not fit:
        # TODO(synk): two-pass D-tiled fallback when one (Gc,D,H,W) group does
        # not fit the VMEM budget; currently Mosaic will report the overflow.
        return 1
    cand = [d for d in fit if d * io_bytes_per_bg <= target_bytes] or [min(fit)]
    if min_steps >= 4:
        t = [d for d in cand if bg // d >= min_steps and (bg // d) % 2 == 0]
        if t:
            return max(t)
    t = [d for d in cand if bg // d >= min_steps]
    return max(t) if t else max(cand)
    # TODO(synk): pad BG in the wrapper (or add a D-chunk grid axis) when BG is
    # prime and the only divisors give sub-roofline block sizes.


def ggca3d_forward(x, params, *, num_groups, target_block_bytes=None):
    """x: (B, C, D, H, W). Returns the same shape/dtype (bf16 input supported)."""
    B, C, D, H, W = x.shape
    assert C % num_groups == 0
    Gc = C // num_groups
    BG = B * num_groups
    HW = H * W

    w1, b1, w2, b2, bn_gamma, bn_beta, bn_mean, bn_var, bn_eps = params
    mid = w1.shape[0]

    # Fold eval-mode BatchNorm3d into the first 1x1x1 conv.
    scale = bn_gamma / jnp.sqrt(bn_var + bn_eps)           # (mid,)
    w1_eff = (w1 * scale[:, None]).astype(jnp.float32)     # (mid, Gc)
    b1_eff = ((b1 - bn_mean) * scale + bn_beta).astype(jnp.float32)

    # One-hot pooling / expansion matrices, built once in the wrapper and kept
    # VMEM-resident across grid steps (constant index_map -> no re-DMA).
    lane = jnp.arange(HW, dtype=jnp.int32)
    e_h = (lane[None, :] // W == jnp.arange(H, dtype=jnp.int32)[:, None]).astype(jnp.float32)
    e_w = (lane[None, :] % W == jnp.arange(W, dtype=jnp.int32)[:, None]).astype(jnp.float32)
    expand_mat = jnp.concatenate([e_h, e_w], axis=0)                        # (H+W, HW)
    pool_mat = jnp.concatenate([e_h.T / (D * W), e_w.T / (D * H)], axis=1)  # (HW, H+W)

    # Lane-dense layout: fuse (H, W) into the last (lane) axis.  Pure view.
    x_r = x.reshape(BG, Gc, D, HW)

    tgt_default, vmem_cap, min_steps = _device_defaults()
    if target_block_bytes is None:
        target_block_bytes = tgt_default

    # VMEM accounting uses the sublane-padded D (D%8!=0 pads every VMEM tile).
    pad_d = -(-D // 8) * 8
    io_bytes_per_bg = Gc * pad_d * HW * x.dtype.itemsize
    f32_bytes_per_bg = Gc * pad_d * HW * 4
    const_bytes = 2 * HW * max(H + W, 128) * 4 + (4 << 20)

    def vmem_need(n):
        # double-buffered in/out blocks at the I/O dtype + ~4 full-block f32
        # temporaries (f32 cast, broadcasts, product) + constants/headroom.
        return 4 * n * io_bytes_per_bg + 4 * n * f32_bytes_per_bg + const_bytes

    nbg = _pick_block_bg(BG, vmem_need, max(io_bytes_per_bg, 1),
                         target_block_bytes, vmem_cap, min_steps)
    grid = (BG // nbg,)
    vmem_limit = int(min(vmem_cap, max(32 << 20, vmem_need(nbg) + (8 << 20))))

    kernel = functools.partial(_ggca3d_kernel, H=H, W=W)

    out = pl.pallas_call(
        kernel,
        out_shape=jax.ShapeDtypeStruct(x_r.shape, x.dtype),
        grid_spec=pltpu.PrefetchScalarGridSpec(
            num_scalar_prefetch=0,
            grid=grid,
            in_specs=[
                pl.BlockSpec((nbg, Gc, D, HW), lambda i: (i, 0, 0, 0)),
                pl.BlockSpec((mid, Gc), lambda i: (0, 0)),
                pl.BlockSpec((mid, 1), lambda i: (0, 0)),
                pl.BlockSpec((Gc, mid), lambda i: (0, 0)),
                pl.BlockSpec((Gc, 1), lambda i: (0, 0)),
                pl.BlockSpec((HW, H + W), lambda i: (0, 0)),
                pl.BlockSpec((H + W, HW), lambda i: (0, 0)),
            ],
            out_specs=pl.BlockSpec((nbg, Gc, D, HW), lambda i: (i, 0, 0, 0)),
        ),
        compiler_params=pltpu.CompilerParams(
            dimension_semantics=("parallel",),
            vmem_limit_bytes=vmem_limit),
    )(x_r, w1_eff, b1_eff.reshape(mid, 1), w2.astype(jnp.float32),
      b2.reshape(Gc, 1).astype(jnp.float32), pool_mat, expand_mat)

    return out.reshape(B, C, D, H, W)


def ggca3d_reference(x, params, *, num_groups):
    """Pure-JAX reference mirroring the PyTorch forward (eval-mode BN)."""
    B, C, D, H, W = x.shape
    Gc = C // num_groups
    w1, b1, w2, b2, bn_gamma, bn_beta, bn_mean, bn_var, bn_eps = params
    scale = bn_gamma / jnp.sqrt(bn_var + bn_eps)
    w1_eff = w1 * scale[:, None]
    b1_eff = (b1 - bn_mean) * scale + bn_beta

    xg = x.reshape(B, num_groups, Gc, D, H, W)
    avg_d = xg.mean(axis=(4, 5)); max_d = xg.max(axis=(4, 5))   # (B,G,Gc,D)
    avg_h = xg.mean(axis=(3, 5)); max_h = xg.max(axis=(3, 5))   # (B,G,Gc,H)
    avg_w = xg.mean(axis=(3, 4)); max_w = xg.max(axis=(3, 4))   # (B,G,Gc,W)

    def shared(p):                                              # (..., Gc, L)
        h = jnp.einsum('mc,bgcl->bgml', w1_eff, p) + b1_eff[None, None, :, None]
        h = jnp.maximum(h, 0.0)
        return jnp.einsum('cm,bgml->bgcl', w2, h) + b2[None, None, :, None]

    att_d = jax.nn.sigmoid(shared(avg_d) + shared(max_d))       # (B,G,Gc,D)
    att_h = jax.nn.sigmoid(shared(avg_h) + shared(max_h))       # (B,G,Gc,H)
    att_w = jax.nn.sigmoid(shared(avg_w) + shared(max_w))       # (B,G,Gc,W)

    out = xg * att_d[:, :, :, :, None, None]
    out = out * att_h[:, :, :, None, :, None]
    out = out * att_w[:, :, :, None, None, :]
    return out.reshape(B, C, D, H, W)


def init_params(key, group_channels, reduction):
    mid = group_channels // reduction
    assert mid >= 1
    k1, k2, k3, k4 = jax.random.split(key, 4)
    w1 = 0.1 * jax.random.normal(k1, (mid, group_channels), jnp.float32)
    b1 = 0.05 * jax.random.normal(k2, (mid,), jnp.float32)
    w2 = 0.1 * jax.random.normal(k3, (group_channels, mid), jnp.float32)
    b2 = 0.05 * jax.random.normal(k4, (group_channels,), jnp.float32)
    # BatchNorm3d (eval mode) deterministic parameters.
    bn_gamma = jnp.ones((mid,), jnp.float32)
    bn_beta = jnp.zeros((mid,), jnp.float32)
    bn_mean = jnp.zeros((mid,), jnp.float32)
    bn_var = jnp.ones((mid,), jnp.float32)
    bn_eps = jnp.float32(1e-5)
    return (w1, b1, w2, b2, bn_gamma, bn_beta, bn_mean, bn_var, bn_eps)


if __name__ == "__main__":
    # Small shapes consistent with the module: channel divisible by num_groups,
    # group_channels // reduction >= 1, pool targets equal to (D, H, W).
    # D is a multiple of 8 (sublane-friendly) and H*W = 128 (lane-dense).
    B, C, D, H, W = 2, 32, 8, 8, 16
    num_groups, reduction = 4, 4
    Gc = C // num_groups

    key = jax.random.PRNGKey(0)
    kx, kp = jax.random.split(key)
    x = jax.random.normal(kx, (B, C, D, H, W), jnp.float32)
    params = init_params(kp, Gc, reduction)

    out = ggca3d_forward(x, params, num_groups=num_groups)
    out = jax.block_until_ready(out)

    ref = ggca3d_reference(x, params, num_groups=num_groups)
    assert out.shape == (B, C, D, H, W)
    # MXU f32 contraction precision is generation/compiler dependent; the
    # tolerance covers both full-f32 (err ~1e-6) and bf16-pass behaviour.
    assert jnp.allclose(out, ref, atol=1e-3, rtol=2e-2), (
        float(jnp.max(jnp.abs(out - ref))))

    # bf16 HBM I/O path: halves memory traffic for this bandwidth-bound kernel
    # (math stays f32 inside the kernel); looser tolerance for bf16 rounding.
    x_bf = x.astype(jnp.bfloat16)
    out_bf = jax.block_until_ready(ggca3d_forward(x_bf, params, num_groups=num_groups))
    ref_bf = ggca3d_reference(x_bf.astype(jnp.float32), params, num_groups=num_groups)
    assert out_bf.dtype == jnp.bfloat16
    assert jnp.allclose(out_bf.astype(jnp.float32), ref_bf, atol=5e-2, rtol=5e-2)

    print("KERNEL_OK")
</pallas_src>

<mosaic_0001>
module attributes {stable_mosaic.version = 11 : i64} {
  func.func @_ggca3d_kernel(%arg0: i32, %arg1: memref<4x8x8x128xf32, #tpu.memory_space<vmem>>, %arg2: memref<2x8xf32, #tpu.memory_space<vmem>>, %arg3: memref<2x1xf32, #tpu.memory_space<vmem>>, %arg4: memref<8x2xf32, #tpu.memory_space<vmem>>, %arg5: memref<8x1xf32, #tpu.memory_space<vmem>>, %arg6: memref<128x24xf32, #tpu.memory_space<vmem>>, %arg7: memref<24x128xf32, #tpu.memory_space<vmem>>, %arg8: memref<4x8x8x128xf32, #tpu.memory_space<vmem>>) attributes {dimension_semantics = [#tpu.dimension_semantics<parallel>], iteration_bounds = array<i64: 2>, scalar_prefetch = 0 : i64, scratch_operands = 0 : i64, tpu.core_type = #tpu.core_type<tc>, window_params = [{transform_indices = @transform_0, window_bounds = array<i64: 4, 8, 8, 128>}, {pipeline_mode = #tpu.pipeline_mode<synchronous>, transform_indices = @transform_1, window_bounds = array<i64: 2, 8>}, {pipeline_mode = #tpu.pipeline_mode<synchronous>, transform_indices = @transform_2, window_bounds = array<i64: 2, 1>}, {pipeline_mode = #tpu.pipeline_mode<synchronous>, transform_indices = @transform_3, window_bounds = array<i64: 8, 2>}, {pipeline_mode = #tpu.pipeline_mode<synchronous>, transform_indices = @transform_4, window_bounds = array<i64: 8, 1>}, {pipeline_mode = #tpu.pipeline_mode<synchronous>, transform_indices = @transform_5, window_bounds = array<i64: 128, 24>}, {pipeline_mode = #tpu.pipeline_mode<synchronous>, transform_indices = @transform_6, window_bounds = array<i64: 24, 128>}, {transform_indices = @transform_7, window_bounds = array<i64: 4, 8, 8, 128>}]} {
    %c0 = arith.constant 0 : index
    %c0_0 = arith.constant 0 : index
    %c0_1 = arith.constant 0 : index
    %c0_2 = arith.constant 0 : index
    %0 = vector.load %arg1[%c0, %c0_0, %c0_1, %c0_2] : memref<4x8x8x128xf32, #tpu.memory_space<vmem>>, vector<4x8x8x128xf32>
    %c0_3 = arith.constant 0 : index
    %c0_4 = arith.constant 0 : index
    %1 = vector.load %arg2[%c0_3, %c0_4] : memref<2x8xf32, #tpu.memory_space<vmem>>, vector<2x8xf32>
    %c0_5 = arith.constant 0 : index
    %c0_6 = arith.constant 0 : index
    %2 = vector.load %arg3[%c0_5, %c0_6] : memref<2x1xf32, #tpu.memory_space<vmem>>, vector<2x1xf32>
    %c0_7 = arith.constant 0 : index
    %c0_8 = arith.constant 0 : index
    %3 = vector.load %arg4[%c0_7, %c0_8] : memref<8x2xf32, #tpu.memory_space<vmem>>, vector<8x2xf32>
    %c0_9 = arith.constant 0 : index
    %c0_10 = arith.constant 0 : index
    %4 = vector.load %arg5[%c0_9, %c0_10] : memref<8x1xf32, #tpu.memory_space<vmem>>, vector<8x1xf32>
    %c0_11 = arith.constant 0 : index
    %c0_12 = arith.constant 0 : index
    %5 = vector.load %arg6[%c0_11, %c0_12] : memref<128x24xf32, #tpu.memory_space<vmem>>, vector<128x24xf32>
    %c0_13 = arith.constant 0 : index
    %c0_14 = arith.constant 0 : index
    %6 = vector.load %arg7[%c0_13, %c0_14] : memref<24x128xf32, #tpu.memory_space<vmem>>, vector<24x128xf32>
    %cst = arith.constant dense<0.000000e+00> : vector<4x8x8xf32>
    %7 = vector.multi_reduction <add>, %0, %cst [3] : vector<4x8x8x128xf32> to vector<4x8x8xf32>
    %cst_15 = arith.constant 7.812500e-03 : f32
    %8 = vector.broadcast %cst_15 : f32 to vector<4x8x8xf32>
    %9 = arith.mulf %7, %8 : vector<4x8x8xf32>
    %cst_16 = arith.constant dense<0xFF800000> : vector<4x8x8xf32>
    %10 = vector.multi_reduction <maximumf>, %0, %cst_16 [3] : vector<4x8x8x128xf32> to vector<4x8x8xf32>
    %cst_17 = arith.constant dense<0.000000e+00> : vector<4x8x128xf32>
    %11 = vector.multi_reduction <add>, %0, %cst_17 [2] : vector<4x8x8x128xf32> to vector<4x8x128xf32>
    %cst_18 = arith.constant dense<0xFF800000> : vector<4x8x128xf32>
    %12 = vector.multi_reduction <maximumf>, %0, %cst_18 [2] : vector<4x8x8x128xf32> to vector<4x8x128xf32>
    %13 = vector.shape_cast %11 : vector<4x8x128xf32> to vector<32x128xf32>
    %cst_19 = arith.constant dense<0.000000e+00> : vector<32x24xf32>
    %14 = tpu.matmul %13, %5, %cst_19 {dimension_numbers = #tpu.dot_dimension_numbers<[1], [0], [0], [1], [0, 0, 1, 1], [], []>} : vector<32x128xf32>, vector<128x24xf32>, vector<32x24xf32> -> vector<32x24xf32>
    %15 = vector.shape_cast %14 : vector<32x24xf32> to vector<4x8x24xf32>
    %16 = vector.extract_strided_slice %12 {offsets = [0, 0, 0], sizes = [4, 8, 16], strides = [1, 1, 1]} : vector<4x8x128xf32> to vector<4x8x16xf32>
    %17 = vector.extract_strided_slice %12 {offsets = [0, 0, 16], sizes = [4, 8, 16], strides = [1, 1, 1]} : vector<4x8x128xf32> to vector<4x8x16xf32>
    %18 = vector.extract_strided_slice %12 {offsets = [0, 0, 32], sizes = [4, 8, 16], strides = [1, 1, 1]} : vector<4x8x128xf32> to vector<4x8x16xf32>
    %19 = vector.extract_strided_slice %12 {offsets = [0, 0, 48], sizes = [4, 8, 16], strides = [1, 1, 1]} : vector<4x8x128xf32> to vector<4x8x16xf32>
    %20 = vector.extract_strided_slice %12 {offsets = [0, 0, 64], sizes = [4, 8, 16], strides = [1, 1, 1]} : vector<4x8x128xf32> to vector<4x8x16xf32>
    %21 = vector.extract_strided_slice %12 {offsets = [0, 0, 80], sizes = [4, 8, 16], strides = [1, 1, 1]} : vector<4x8x128xf32> to vector<4x8x16xf32>
    %22 = vector.extract_strided_slice %12 {offsets = [0, 0, 96], sizes = [4, 8, 16], strides = [1, 1, 1]} : vector<4x8x128xf32> to vector<4x8x16xf32>
    %23 = vector.extract_strided_slice %12 {offsets = [0, 0, 112], sizes = [4, 8, 16], strides = [1, 1, 1]} : vector<4x8x128xf32> to vector<4x8x16xf32>
    %cst_20 = arith.constant dense<0xFF800000> : vector<4x8xf32>
    %24 = vector.multi_reduction <maximumf>, %16, %cst_20 [2] : vector<4x8x16xf32> to vector<4x8xf32>
    %25 = vector.shape_cast %24 : vector<4x8xf32> to vector<4x8x1xf32>
    %cst_21 = arith.constant dense<0xFF800000> : vector<4x8xf32>
    %26 = vector.multi_reduction <maximumf>, %17, %cst_21 [2] : vector<4x8x16xf32> to vector<4x8xf32>
    %27 = vector.shape_cast %26 : vector<4x8xf32> to vector<4x8x1xf32>
    %cst_22 = arith.constant dense<0xFF800000> : vector<4x8xf32>
    %28 = vector.multi_reduction <maximumf>, %18, %cst_22 [2] : vector<4x8x16xf32> to vector<4x8xf32>
    %29 = vector.shape_cast %28 : vector<4x8xf32> to vector<4x8x1xf32>
    %cst_23 = arith.constant dense<0xFF800000> : vector<4x8xf32>
    %30 = vector.multi_reduction <maximumf>, %19, %cst_23 [2] : vector<4x8x16xf32> to vector<4x8xf32>
    %31 = vector.shape_cast %30 : vector<4x8xf32> to vector<4x8x1xf32>
    %cst_24 = arith.constant dense<0xFF800000> : vector<4x8xf32>
    %32 = vector.multi_reduction <maximumf>, %20, %cst_24 [2] : vector<4x8x16xf32> to vector<4x8xf32>
    %33 = vector.shape_cast %32 : vector<4x8xf32> to vector<4x8x1xf32>
    %cst_25 = arith.constant dense<0xFF800000> : vector<4x8xf32>
    %34 = vector.multi_reduction <maximumf>, %21, %cst_25 [2] : vector<4x8x16xf32> to vector<4x8xf32>
    %35 = vector.shape_cast %34 : vector<4x8xf32> to vector<4x8x1xf32>
    %cst_26 = arith.constant dense<0xFF800000> : vector<4x8xf32>
    %36 = vector.multi_reduction <maximumf>, %22, %cst_26 [2] : vector<4x8x16xf32> to vector<4x8xf32>
    %37 = vector.shape_cast %36 : vector<4x8xf32> to vector<4x8x1xf32>
    %cst_27 = arith.constant dense<0xFF800000> : vector<4x8xf32>
    %38 = vector.multi_reduction <maximumf>, %23, %cst_27 [2] : vector<4x8x16xf32> to vector<4x8xf32>
    %39 = vector.shape_cast %38 : vector<4x8xf32> to vector<4x8x1xf32>
    %40 = tpu.iota {dimensions = array<i32: 2>} : vector<1x1x8xi32>
    %cst_28 = arith.constant 0.000000e+00 : f32
    %41 = vector.broadcast %cst_28 : f32 to vector<4x8x8xf32>
    %c0_i32 = arith.constant 0 : i32
    %42 = vector.broadcast %c0_i32 : i32 to vector<1x1x8xi32>
    %43 = arith.cmpi eq, %40, %42 : vector<1x1x8xi32>
    %44 = vector.shape_cast %43 : vector<1x1x8xi1> to vector<1x1x8xi1>
    %45 = vector.broadcast %44 : vector<1x1x8xi1> to vector<4x8x8xi1>
    %46 = vector.shape_cast %25 : vector<4x8x1xf32> to vector<4x8x1xf32>
    %47 = vector.broadcast %46 : vector<4x8x1xf32> to vector<4x8x8xf32>
    %48 = arith.select %45, %47, %41 : vector<4x8x8xi1>, vector<4x8x8xf32>
    %c1_i32 = arith.constant 1 : i32
    %49 = vector.broadcast %c1_i32 : i32 to vector<1x1x8xi32>
    %50 = arith.cmpi eq, %40, %49 : vector<1x1x8xi32>
    %51 = vector.shape_cast %50 : vector<1x1x8xi1> to vector<1x1x8xi1>
    %52 = vector.broadcast %51 : vector<1x1x8xi1> to vector<4x8x8xi1>
    %53 = vector.shape_cast %27 : vector<4x8x1xf32> to vector<4x8x1xf32>
    %54 = vector.broadcast %53 : vector<4x8x1xf32> to vector<4x8x8xf32>
    %55 = arith.select %52, %54, %48 : vector<4x8x8xi1>, vector<4x8x8xf32>
    %c2_i32 = arith.constant 2 : i32
    %56 = vector.broadcast %c2_i32 : i32 to vector<1x1x8xi32>
    %57 = arith.cmpi eq, %40, %56 : vector<1x1x8xi32>
    %58 = vector.shape_cast %57 : vector<1x1x8xi1> to vector<1x1x8xi1>
    %59 = vector.broadcast %58 : vector<1x1x8xi1> to vector<4x8x8xi1>
    %60 = vector.shape_cast %29 : vector<4x8x1xf32> to vector<4x8x1xf32>
    %61 = vector.broadcast %60 : vector<4x8x1xf32> to vector<4x8x8xf32>
    %62 = arith.select %59, %61, %55 : vector<4x8x8xi1>, vector<4x8x8xf32>
    %c3_i32 = arith.constant 3 : i32
    %63 = vector.broadcast %c3_i32 : i32 to vector<1x1x8xi32>
    %64 = arith.cmpi eq, %40, %63 : vector<1x1x8xi32>
    %65 = vector.shape_cast %64 : vector<1x1x8xi1> to vector<1x1x8xi1>
    %66 = vector.broadcast %65 : vector<1x1x8xi1> to vector<4x8x8xi1>
    %67 = vector.shape_cast %31 : vector<4x8x1xf32> to vector<4x8x1xf32>
    %68 = vector.broadcast %67 : vector<4x8x1xf32> to vector<4x8x8xf32>
    %69 = arith.select %66, %68, %62 : vector<4x8x8xi1>, vector<4x8x8xf32>
    %c4_i32 = arith.constant 4 : i32
    %70 = vector.broadcast %c4_i32 : i32 to vector<1x1x8xi32>
    %71 = arith.cmpi eq, %40, %70 : vector<1x1x8xi32>
    %72 = vector.shape_cast %71 : vector<1x1x8xi1> to vector<1x1x8xi1>
    %73 = vector.broadcast %72 : vector<1x1x8xi1> to vector<4x8x8xi1>
    %74 = vector.shape_cast %33 : vector<4x8x1xf32> to vector<4x8x1xf32>
    %75 = vector.broadcast %74 : vector<4x8x1xf32> to vector<4x8x8xf32>
    %76 = arith.select %73, %75, %69 : vector<4x8x8xi1>, vector<4x8x8xf32>
    %c5_i32 = arith.constant 5 : i32
    %77 = vector.broadcast %c5_i32 : i32 to vector<1x1x8xi32>
    %78 = arith.cmpi eq, %40, %77 : vector<1x1x8xi32>
    %79 = vector.shape_cast %78 : vector<1x1x8xi1> to vector<1x1x8xi1>
    %80 = vector.broadcast %79 : vector<1x1x8xi1> to vector<4x8x8xi1>
    %81 = vector.shape_cast %35 : vector<4x8x1xf32> to vector<4x8x1xf32>
    %82 = vector.broadcast %81 : vector<4x8x1xf32> to vector<4x8x8xf32>
    %83 = arith.select %80, %82, %76 : vector<4x8x8xi1>, vector<4x8x8xf32>
    %c6_i32 = arith.constant 6 : i32
    %84 = vector.broadcast %c6_i32 : i32 to vector<1x1x8xi32>
    %85 = arith.cmpi eq, %40, %84 : vector<1x1x8xi32>
    %86 = vector.shape_cast %85 : vector<1x1x8xi1> to vector<1x1x8xi1>
    %87 = vector.broadcast %86 : vector<1x1x8xi1> to vector<4x8x8xi1>
    %88 = vector.shape_cast %37 : vector<4x8x1xf32> to vector<4x8x1xf32>
    %89 = vector.broadcast %88 : vector<4x8x1xf32> to vector<4x8x8xf32>
    %90 = arith.select %87, %89, %83 : vector<4x8x8xi1>, vector<4x8x8xf32>
    %c7_i32 = arith.constant 7 : i32
    %91 = vector.broadcast %c7_i32 : i32 to vector<1x1x8xi32>
    %92 = arith.cmpi eq, %40, %91 : vector<1x1x8xi32>
    %93 = vector.shape_cast %92 : vector<1x1x8xi1> to vector<1x1x8xi1>
    %94 = vector.broadcast %93 : vector<1x1x8xi1> to vector<4x8x8xi1>
    %95 = vector.shape_cast %39 : vector<4x8x1xf32> to vector<4x8x1xf32>
    %96 = vector.broadcast %95 : vector<4x8x1xf32> to vector<4x8x8xf32>
    %97 = arith.select %94, %96, %90 : vector<4x8x8xi1>, vector<4x8x8xf32>
    %98 = arith.maximumf %16, %17 : vector<4x8x16xf32>
    %99 = arith.maximumf %98, %18 : vector<4x8x16xf32>
    %100 = arith.maximumf %99, %19 : vector<4x8x16xf32>
    %101 = arith.maximumf %100, %20 : vector<4x8x16xf32>
    %102 = arith.maximumf %101, %21 : vector<4x8x16xf32>
    %103 = arith.maximumf %102, %22 : vector<4x8x16xf32>
    %104 = arith.maximumf %103, %23 : vector<4x8x16xf32>
    %105 = tpu.concatenate %9, %15 in 2 : vector<4x8x8xf32>, vector<4x8x24xf32> -> vector<4x8x32xf32>
    %106 = tpu.concatenate %10, %97, %104 in 2 : vector<4x8x8xf32>, vector<4x8x8xf32>, vector<4x8x16xf32> -> vector<4x8x32xf32>
    %107 = tpu.concatenate %105, %106 in 0 : vector<4x8x32xf32>, vector<4x8x32xf32> -> vector<8x8x32xf32>
    %108 = vector.shape_cast %1 : vector<2x8xf32> to vector<1x2x8x1xf32>
    %109 = vector.shape_cast %107 : vector<8x8x32xf32> to vector<8x1x8x32xf32>
    %110 = vector.broadcast %108 : vector<1x2x8x1xf32> to vector<8x2x8x32xf32>
    %111 = vector.broadcast %109 : vector<8x1x8x32xf32> to vector<8x2x8x32xf32>
    %112 = arith.mulf %110, %111 : vector<8x2x8x32xf32>
    %cst_29 = arith.constant dense<0.000000e+00> : vector<8x2x32xf32>
    %113 = vector.multi_reduction <add>, %112, %cst_29 [2] : vector<8x2x8x32xf32> to vector<8x2x32xf32>
    %114 = vector.shape_cast %2 : vector<2x1xf32> to vector<1x2x1xf32>
    %115 = vector.broadcast %114 : vector<1x2x1xf32> to vector<8x2x32xf32>
    %116 = arith.addf %113, %115 : vector<8x2x32xf32>
    %cst_30 = arith.constant 0.000000e+00 : f32
    %117 = vector.broadcast %cst_30 : f32 to vector<8x2x32xf32>
    %118 = arith.maximumf %116, %117 : vector<8x2x32xf32>
    %119 = vector.shape_cast %3 : vector<8x2xf32> to vector<1x8x2x1xf32>
    %120 = vector.shape_cast %118 : vector<8x2x32xf32> to vector<8x1x2x32xf32>
    %121 = vector.broadcast %119 : vector<1x8x2x1xf32> to vector<8x8x2x32xf32>
    %122 = vector.broadcast %120 : vector<8x1x2x32xf32> to vector<8x8x2x32xf32>
    %123 = arith.mulf %121, %122 : vector<8x8x2x32xf32>
    %cst_31 = arith.constant dense<0.000000e+00> : vector<8x8x32xf32>
    %124 = vector.multi_reduction <add>, %123, %cst_31 [2] : vector<8x8x2x32xf32> to vector<8x8x32xf32>
    %125 = vector.shape_cast %4 : vector<8x1xf32> to vector<1x8x1xf32>
    %126 = vector.broadcast %125 : vector<1x8x1xf32> to vector<8x8x32xf32>
    %127 = arith.addf %124, %126 : vector<8x8x32xf32>
    %128 = vector.extract_strided_slice %127 {offsets = [0, 0, 0], sizes = [4, 8, 32], strides = [1, 1, 1]} : vector<8x8x32xf32> to vector<4x8x32xf32>
    %129 = vector.extract_strided_slice %127 {offsets = [4, 0, 0], sizes = [4, 8, 32], strides = [1, 1, 1]} : vector<8x8x32xf32> to vector<4x8x32xf32>
    %130 = arith.addf %128, %129 : vector<4x8x32xf32>
    %131 = arith.negf %130 : vector<4x8x32xf32>
    %132 = math.exp %131 : vector<4x8x32xf32>
    %cst_32 = arith.constant 1.000000e+00 : f32
    %133 = vector.broadcast %cst_32 : f32 to vector<4x8x32xf32>
    %134 = arith.addf %133, %132 : vector<4x8x32xf32>
    %135 = arith.divf %133, %134 : vector<4x8x32xf32>
    %136 = vector.extract_strided_slice %135 {offsets = [0, 0, 0], sizes = [4, 8, 8], strides = [1, 1, 1]} : vector<4x8x32xf32> to vector<4x8x8xf32>
    %137 = vector.extract_strided_slice %135 {offsets = [0, 0, 8], sizes = [4, 8, 8], strides = [1, 1, 1]} : vector<4x8x32xf32> to vector<4x8x8xf32>
    %138 = vector.shape_cast %137 : vector<4x8x8xf32> to vector<32x8xf32>
    %139 = vector.extract_strided_slice %135 {offsets = [0, 0, 16], sizes = [4, 8, 16], strides = [1, 1, 1]} : vector<4x8x32xf32> to vector<4x8x16xf32>
    %140 = vector.shape_cast %139 : vector<4x8x16xf32> to vector<32x16xf32>
    %141 = vector.extract_strided_slice %6 {offsets = [0, 0], sizes = [8, 128], strides = [1, 1]} : vector<24x128xf32> to vector<8x128xf32>
    %cst_33 = arith.constant dense<0.000000e+00> : vector<32x128xf32>
    %142 = tpu.matmul %138, %141, %cst_33 {dimension_numbers = #tpu.dot_dimension_numbers<[1], [0], [0], [1], [0, 0, 1, 1], [], []>} : vector<32x8xf32>, vector<8x128xf32>, vector<32x128xf32> -> vector<32x128xf32>
    %143 = vector.extract_strided_slice %6 {offsets = [8, 0], sizes = [16, 128], strides = [1, 1]} : vector<24x128xf32> to vector<16x128xf32>
    %cst_34 = arith.constant dense<0.000000e+00> : vector<32x128xf32>
    %144 = tpu.matmul %140, %143, %cst_34 {dimension_numbers = #tpu.dot_dimension_numbers<[1], [0], [0], [1], [0, 0, 1, 1], [], []>} : vector<32x16xf32>, vector<16x128xf32>, vector<32x128xf32> -> vector<32x128xf32>
    %145 = arith.mulf %142, %144 : vector<32x128xf32>
    %146 = vector.shape_cast %145 : vector<32x128xf32> to vector<4x8x128xf32>
    %147 = vector.shape_cast %146 : vector<4x8x128xf32> to vector<4x8x1x128xf32>
    %148 = vector.broadcast %147 : vector<4x8x1x128xf32> to vector<4x8x8x128xf32>
    %149 = arith.mulf %0, %148 : vector<4x8x8x128xf32>
    %150 = vector.shape_cast %136 : vector<4x8x8xf32> to vector<4x8x8x1xf32>
    %151 = vector.broadcast %150 : vector<4x8x8x1xf32> to vector<4x8x8x128xf32>
    %152 = arith.mulf %149, %151 : vector<4x8x8x128xf32>
    %c0_35 = arith.constant 0 : index
    %c0_36 = arith.constant 0 : index
    %c0_37 = arith.constant 0 : index
    %c0_38 = arith.constant 0 : index
    %153 = vector.load %arg8[%c0_35, %c0_36, %c0_37, %c0_38] : memref<4x8x8x128xf32, #tpu.memory_space<vmem>>, vector<4x8x8x128xf32>
    tpu.vector_store %arg8[%c0_35, %c0_36, %c0_37, %c0_38], %152 {strides = array<i32>} : memref<4x8x8x128xf32, #tpu.memory_space<vmem>>, vector<4x8x8x128xf32>,
    return
  }
  func.func @transform_0(%arg0: i32) -> (i32, i32, i32, i32) {
    %c0_i32 = arith.constant 0 : i32
    %c0_i32_0 = arith.constant 0 : i32
    %c0_i32_1 = arith.constant 0 : i32
    %c0_i32_2 = arith.constant 0 : i32
    return %arg0, %c0_i32, %c0_i32_0, %c0_i32_1 : i32, i32, i32, i32
  }
  func.func @transform_1(%arg0: i32) -> (i32, i32) {
    %c0_i32 = arith.constant 0 : i32
    %c0_i32_0 = arith.constant 0 : i32
    %c0_i32_1 = arith.constant 0 : i32
    return %c0_i32, %c0_i32_0 : i32, i32
  }
  func.func @transform_2(%arg0: i32) -> (i32, i32) {
    %c0_i32 = arith.constant 0 : i32
    %c0_i32_0 = arith.constant 0 : i32
    %c0_i32_1 = arith.constant 0 : i32
    return %c0_i32, %c0_i32_0 : i32, i32
  }
  func.func @transform_3(%arg0: i32) -> (i32, i32) {
    %c0_i32 = arith.constant 0 : i32
    %c0_i32_0 = arith.constant 0 : i32
    %c0_i32_1 = arith.constant 0 : i32
    return %c0_i32, %c0_i32_0 : i32, i32
  }
  func.func @transform_4(%arg0: i32) -> (i32, i32) {
    %c0_i32 = arith.constant 0 : i32
    %c0_i32_0 = arith.constant 0 : i32
    %c0_i32_1 = arith.constant 0 : i32
    return %c0_i32, %c0_i32_0 : i32, i32
  }
  func.func @transform_5(%arg0: i32) -> (i32, i32) {
    %c0_i32 = arith.constant 0 : i32
    %c0_i32_0 = arith.constant 0 : i32
    %c0_i32_1 = arith.constant 0 : i32
    return %c0_i32, %c0_i32_0 : i32, i32
  }
  func.func @transform_6(%arg0: i32) -> (i32, i32) {
    %c0_i32 = arith.constant 0 : i32
    %c0_i32_0 = arith.constant 0 : i32
    %c0_i32_1 = arith.constant 0 : i32
    return %c0_i32, %c0_i32_0 : i32, i32
  }
  func.func @transform_7(%arg0: i32) -> (i32, i32, i32, i32) {
    %c0_i32 = arith.constant 0 : i32
    %c0_i32_0 = arith.constant 0 : i32
    %c0_i32_1 = arith.constant 0 : i32
    %c0_i32_2 = arith.constant 0 : i32
    return %arg0, %c0_i32, %c0_i32_0, %c0_i32_1 : i32, i32, i32, i32
  }
}

</mosaic_0001>

<bundles_post_ra>
// kernel: tpu_custom_call.1
= control target key start
LH: loop header
LB: loop body
LE: loop exit
PB: predicated region body
PF: predicated region fallthrough
CT: control target
= control target key end

     0   :  { %12 = vsyncpa [#allocation3], 0  ;;  %s9093_s0 = inlined_call_operand.hbm [shape: f32[8,8,8,128], index: 0, kind: input, shape index: {}]   ;;  %s9094_s1 = inlined_call_operand.vmem [shape: f32[2,8], index: 1, kind: input, shape index: {}]   ;;  %s9095_s2 = inlined_call_operand.vmem [shape: f32[2,1], index: 2, kind: input, shape index: {}]   ;;  %s9096_s3 = inlined_call_operand.vmem [shape: f32[8,2], index: 3, kind: input, shape index: {}]   ;;  %s9097_s4 = inlined_call_operand.vmem [shape: f32[8,1], index: 4, kind: input, shape index: {}]   ;;  %s9098_s5 = inlined_call_operand.vmem [shape: f32[128,24], index: 5, kind: input, shape index: {}]   ;;  %s9099_s6 = inlined_call_operand.vmem [shape: f32[24,128], index: 6, kind: input, shape index: {}]   ;;  %s9100_s7 = inlined_call_operand.hbm [shape: f32[8,8,8,128], index: 7, kind: output, shape index: {}]  }
   0x1   :  { %14 = vsyncpa [#allocation3 + $0x1], 0 }
   0x2   :  { %15 = vsyncpa [#allocation4], 0 }
   0x3   :  { %17 = vsyncpa [#allocation4 + $0x1], 0  ;;  %s5454_s24 = smov 0   ;;  %s5456_s25 = smov 0  }
   0x4   :  { %s5458_s26 = smov 0   ;;  %s5460_s27 = smov 0  }
   0x5 LB: > { %s5475_s28 = sadd.s32 4294967295, %s5396_s27   ;;  %s4866_s29 = sadd.s32 4294967294, %s5396_s27   ;;  %s5396_s27 = sphi %s5460_s27, %s9905_s27   ;;  %s5392_s26 = sphi %s5458_s26, %s9904_s26   ;;  %s5388_s25 = sphi %s5456_s25, %s9903_s25   ;;  %s5384_s24 = sphi %s5454_s24, %s9902_s24  }
   0x6   : > { %s5479_s30 = sadd.s32 1, %s5396_s27   ;;  %s30_s8 = sadd.s32 1, %s5392_s26 }
   0x7   : > { %s27_s9 = ssub.s32 %s5396_s27, %s5479_s30  ;;  %p37_p0 = scmp.ne.s32.totalorder %s5392_s26, %s5388_s25 }
   0x8   : > { %p28_p1 = scmp.eq.s32.totalorder %s27_s9, 0  ;;  %p38_p2 = scmp.eq.s32.totalorder %s5396_s27, 0 }
   0x9   : > { %p43_p3 = scmp.ne.s32.totalorder %s5388_s25, %s5384_s24  ;;  %p44_p4 = scmp.eq.s32.totalorder %s5475_s28, 0 }
   0xa   : > { %s5491_s10 = scalar_select %p28_p1, %s5392_s26, %s30_s8  }
   0xb   : > { %p5493_p5 = por %p38_p2, %p37_p0  ;;  %p5497_p6 = por %p44_p4, %p43_p3 }
   0xc   : > { %p193_p7 = scmp.eq.s32.totalorder %s5475_s28, 1  ;;  %p199_p8 = scmp.eq.s32.totalorder %s4866_s29, 1 }
   0xd   : > { %p5061_p10 = scmp.lt.s32.totalorder %s5396_s27, 2  ;;  %s237_s15 = sand.u32 1, %s5392_s26  }
   0xe   : > { %p5504_p11 = por %p193_p7, %p37_p0  ;;  %p5508_p12 = por %p199_p8, %p43_p3 }
   0xf   : > { %s4923_s16 = sshll.u32 %s5396_s27, 12  ;;  %s4869_s17 = sshll.u32 %s237_s15, 8 }
  0x10   : > { %s9209_s13 = scalar_select %p5504_p11, 1, 0 }
  0x11   : > { %s9210_s14 = scalar_select %p5508_p12, 1, 0 }
  0x12   : > { %s5517_s20 = scalar_lea.hbm %s9093_s0, %s4923_s16  ;;  %s241_s21 = scalar_lea.vmem [#allocation2], %s4869_s17 }
  0x13   : > { %s249_s22 = sshll.u32 %s241_s21, 4  ;;  %p5521_p13 = pnand %p5061_p10, %p5493_p5  ;;  %s5525_s22 = int_to_ptr.vmem [resolvable:$true] %s249_s22 }
  0x14   : > { %s5527_s29 = scalar_lea.sflag [#allocation3], %s237_s15  ;;  %s5300_s8 = scalar_lea.hbm %s5517_s20, 4096 }
  0x15   : > { %p5301_p0 = scmp.ne.s32.totalorder %s5517_s20, %s5300_s8  ;;  %p5302_p1 = pneg %p5521_p13 }
  0x16   : > { %s5305_s16 = scalar_lea.hbm %s9093_s0, 8192  ;;  %p5306_p4 = scmp.lt.u32.totalorder %s5517_s20, %s9093_s0 }
  0x17   : > { %p5303_p2 = pnand %p5302_p1, %p5301_p0  ;;  %p5307_p5 = scmp.lt.u32.totalorder %s5305_s16, %s5300_s8 }
  0x18   : > { %p5309_p8 = scmp.lt.u32.totalorder %s5300_s8, %s5517_s20 }
  0x19   : > { %p5304_p3 = pneg %p5303_p2  ;;  %p5308_p7 = por %p5307_p5, %p5306_p4 }
  0x1b   : > { %p5310_p10 = por %p5309_p8, %p5308_p7 }
  0x1d   : > { %p5311_p9 = pnand %p5310_p10, %p5304_p3 }
  0x1f   : > { %5314 = shalt.err (!%p5311_p9)
}
  0x20   : > { %s5315_s15 = scalar_lea.vmem %s5525_s22, 4096  ;;  %s5398_s19 = smov [#allocation2]  }
  0x21   : > { %p5316_p0 = scmp.ne.s32.totalorder %s5525_s22, %s5315_s15  ;;  %s5320_s21 = sshll.u32 %s5398_s19, 4  ;;  %s5321_s21 = int_to_ptr.vmem [resolvable:$false] %s5320_s21 }
  0x22   : > { %s5322_s9 = scalar_lea.vmem %s5321_s21, 8192  ;;  %p5323_p11 = scmp.lt.s32.totalorder %s5525_s22, %s5321_s21 }
  0x23   : > { %p5318_p2 = pnand %p5316_p0, %p5302_p1  ;;  %p5324_p4 = scmp.lt.s32.totalorder %s5322_s9, %s5315_s15 }
  0x25   : > { %p5319_p12 = pneg %p5318_p2  ;;  %p5325_p5 = por %p5324_p4, %p5323_p11 }
  0x27   : > { %p5326_p7 = pnand %p5325_p5, %p5319_p12 }
  0x29   : > { %5329 = shalt.err (!%p5326_p7)
}
  0x2a   : > { %s5399_s8 = smov 128   ;;  %s5400_s11 = smov 8  }
  0x2b   : > { %5056 = dma.hbm_to_vmem [thread:$0]  (!%p5521_p13), %s5517_s20, 4096, %s5525_s22, %s5527_s29, %s5399_s8, %s5399_s8, %s5400_s11  }
  0x2c   : > { %p4873_p9 = scmp.ge.s32.totalorder %s5396_s27, 1  ;;  %p257_p1 = scmp.lt.s32.totalorder %s5396_s27, 3 }
  0x2e   : > { %p258_p3 = pnand %p4873_p9, %p257_p1 }
  0x30   : > { %261 = sbr.rel (%p258_p3) target bundleno = 1551 (0x60f), region = 48 }
  0x37   : > { %s5558_s16 = sand.u32 1, %s5388_s25  }
  0x38   : > { %s4874_s17 = sshll.u32 %s5558_s16, 8  ;;  %s264_s18 = scalar_lea.sflag [#allocation3], %s5558_s16 }
  0x39   : > { %s5564_s15 = scalar_lea.vmem [#allocation2], %s4874_s17 }
  0x3a   : > { %5375 = dma.done.wait (%p5497_p6), %s264_s18, 4096  }
  0x3b   : > { %5377 = vsyncadd (%p5497_p6), %s264_s18, 4294963200  ;;  %v5571_v0 = vld [vmem:[%s5564_s15 + $0x10] sm:$0xff]  ;;  %v5574_v1 = vld [vmem:[%s5564_s15] sm:$0xff]  ;;  %vm931_vm0 = vcmask 1041409   ;;  %vm933_vm1 = vcmask 1042434   ;;  %vm935_vm2 = vcmask 1043459  }
  0x3c   : > { %9212 = vst [vmem:[#allocation8_spill] sm:$0xff] %v5571_v0  ;;  %9213 = vst [vmem:[#allocation9_spill] sm:$0xff] %v5574_v1  ;;  %359 = vadd.xlane.f32.xlu1 %v5571_v0  ;;  %355 = vadd.xlane.f32.xlu0 %v5574_v1  ;;  %v5579_v2 = vld [vmem:[%s5564_s15 + $0x18] sm:$0xff]  ;;  %v5582_v3 = vld [vmem:[%s5564_s15 + $0x8] sm:$0xff]  ;;  %v9108_v32 = vrot.slane %v5571_v0, 4  ;;  %v9111_v33 = vrot.slane %v5574_v1, 4 }
  0x3d   : > { %9214 = vst [vmem:[#allocation10_spill] sm:$0xff] %v5579_v2  ;;  %9215 = vst [vmem:[#allocation11_spill] sm:$0xff] %v5582_v3  ;;  %v5587_v4 = vld [vmem:[%s5564_s15 + $0x28] sm:$0xff]  ;;  %v5590_v5 = vld [vmem:[%s5564_s15 + $0x20] sm:$0xff]  ;;  %v9105_v34 = vrot.slane %v5579_v2, 4  ;;  %v9110_v35 = vrot.slane %v5582_v3, 4 }
  0x3e   : > { %9216 = vst [vmem:[#allocation12_spill] sm:$0xff] %v5587_v4  ;;  %9217 = vst [vmem:[#allocation13_spill] sm:$0xff] %v5590_v5  ;;  %v5595_v6 = vld [vmem:[%s5564_s15 + $0x38] sm:$0xff]  ;;  %v5598_v7 = vld [vmem:[%s5564_s15 + $0x30] sm:$0xff]  ;;  %v720_v36 = vmax.f32 %v5571_v0, %v9108_v32  ;;  %v9103_v37 = vrot.slane %v5587_v4, 4  ;;  %v708_v38 = vmax.f32 %v5574_v1, %v9111_v33  ;;  %v9104_v40 = vrot.slane %v5590_v5, 4 }
  0x3f   : > { %9218 = vst [vmem:[#allocation14_spill] sm:$0xff] %v5595_v6  ;;  %9219 = vst [vmem:[#allocation15_spill] sm:$0xff] %v5598_v7  ;;  %v5603_v8 = vld [vmem:[%s5564_s15 + $0x48] sm:$0xff]  ;;  %v5606_v9 = vld [vmem:[%s5564_s15 + $0x40] sm:$0xff]  ;;  %v726_v39 = vmax.f32 %v5579_v2, %v9105_v34  ;;  %v714_v41 = vmax.f32 %v5582_v3, %v9110_v35  ;;  %v9102_v48 = vrot.slane %v5595_v6, 4  ;;  %v9106_v54 = vrot.slane %v5598_v7, 4 }
  0x40   : > { %361 = vadd.xlane.f32.xlu1 %v5579_v2  ;;  %357 = vadd.xlane.f32.xlu0 %v5582_v3  ;;  %v5611_v10 = vld [vmem:[%s5564_s15 + $0x58] sm:$0xff]  ;;  %v5614_v11 = vld [vmem:[%s5564_s15 + $0x50] sm:$0xff]  ;;  %v5619_v12 = vld [vmem:[%s5564_s15 + $0x68] sm:$0xff]  ;;  %v721_v42 = vrot.slane %v720_v36, 2  ;;  %v738_v43 = vmax.f32 %v5587_v4, %v9103_v37  ;;  %v709_v44 = vrot.slane %v708_v38, 2  ;;  %v732_v46 = vmax.f32 %v5590_v5, %v9104_v40  ;;  %s5401_s12 = smov 112  }
  0x41   : > { %9220 = vst [vmem:[#allocation16_spill] sm:$0xff] %v5611_v10  ;;  %9221 = vst [vmem:[#allocation17_spill] sm:$0xff] %v5614_v11  ;;  %v5622_v13 = vld [vmem:[%s5564_s15 + $0x60] sm:$0xff]  ;;  %v5627_v14 = vld [vmem:[%s5564_s15 + $0x78] sm:$0xff]  ;;  %v727_v45 = vrot.slane %v726_v39, 2  ;;  %v715_v47 = vrot.slane %v714_v41, 2  ;;  %v750_v60 = vmax.f32 %v5595_v6, %v9102_v48 }
  0x42   : > { %9222 = vst [vmem:[#allocation18_spill] sm:$0xff] %v5619_v12  ;;  %9223 = vst [vmem:[#allocation19_spill] sm:$0xff] %v5622_v13  ;;  %v5630_v15 = vld [vmem:[%s5564_s15 + $0x70] sm:$0xff]  ;;  %v5635_v16 = vld [vmem:[%s5564_s15 + $0x88] sm:$0xff]  ;;  %v9113_v49 = vrot.slane %v5603_v8, 4  ;;  %v9112_v50 = vrot.slane %v5606_v9, 4  ;;  %v722_v52 = vmax.f32 %v720_v36, %v721_v42  ;;  %v710_v55 = vmax.f32 %v708_v38, %v709_v44 }
  0x43   : > { %9224 = vst [vmem:[#allocation20_spill] sm:$0xff] %v5627_v14  ;;  %9225 = vst [vmem:[#allocation21_spill] sm:$0xff] %v5630_v15  ;;  %v5638_v17 = vld [vmem:[%s5564_s15 + $0x80] sm:$0xff]  ;;  %v5643_v18 = vld [vmem:[%s5564_s15 + $0x98] sm:$0xff]  ;;  %v9107_v51 = vrot.slane %v5611_v10, 4  ;;  %v739_v53 = vrot.slane %v738_v43, 2  ;;  %v728_v56 = vmax.f32 %v726_v39, %v727_v45  ;;  %v716_v58 = vmax.f32 %v714_v41, %v715_v47 }
  0x44   : > { %365 = vadd.xlane.f32.xlu1 %v5587_v4  ;;  %363 = vadd.xlane.f32.xlu0 %v5590_v5  ;;  %9226 = vst [vmem:[#allocation22_spill] sm:$0xff] %v5638_v17  ;;  %9227 = vst [vmem:[#allocation23_spill] sm:$0xff] %v5643_v18  ;;  %v5646_v19 = vld [vmem:[%s5564_s15 + $0x90] sm:$0xff]  ;;  %v5651_v20 = vld [vmem:[%s5564_s15 + $0xa8] sm:$0xff]  ;;  %v733_v57 = vrot.slane %v732_v46, 2  ;;  %v9109_v59 = vrot.slane %v5614_v11, 4  ;;  %v762_v61 = vmax.f32 %v5603_v8, %v9113_v49 }
  0x45   : > { %9228 = vst [vmem:[#allocation24_spill] sm:$0xff] %v5646_v19  ;;  %9229 = vst [vmem:[#allocation25_spill] sm:$0xff] %v5651_v20  ;;  %v5654_v21 = vld [vmem:[%s5564_s15 + $0xa0] sm:$0xff]  ;;  %v5659_v22 = vld [vmem:[%s5564_s15 + $0xb8] sm:$0xff]  ;;  %v756_v62 = vmax.f32 %v5606_v9, %v9112_v50  ;;  %v774_v63 = vmax.f32 %v5611_v10, %v9107_v51  ;;  %v723_v36 = vrot.slane %v722_v52, 1  ;;  %v740_v38 = vmax.f32 %v738_v43, %v739_v53  ;;  %s5402_s20 = smov 96  }
  0x46   : > { %9230 = vst [vmem:[#allocation26_spill] sm:$0xff] %v5654_v21  ;;  %9231 = vst [vmem:[#allocation27_spill] sm:$0xff] %v5659_v22  ;;  %v5662_v23 = vld [vmem:[%s5564_s15 + $0xb0] sm:$0xff]  ;;  %v5667_v24 = vld [vmem:[%s5564_s15 + $0xc8] sm:$0xff]  ;;  %v744_v39 = vmax.f32 %v5598_v7, %v9106_v54  ;;  %v711_v41 = vrot.slane %v710_v55, 1  ;;  %v729_v42 = vrot.slane %v728_v56, 1  ;;  %v734_v44 = vmax.f32 %v732_v46, %v733_v57 }
  0x47   : > { %v5670_v25 = vld [vmem:[%s5564_s15 + $0xc0] sm:$0xff]  ;;  %v5675_v26 = vld [vmem:[%s5564_s15 + $0xd8] sm:$0xff]  ;;  %v5678_v27 = vld [vmem:[%s5564_s15 + $0xd0] sm:$0xff]  ;;  %v717_v45 = vrot.slane %v716_v58, 1  ;;  %v768_v47 = vmax.f32 %v5614_v11, %v9109_v59  ;;  %v9114_v48 = vrot.slane %v5619_v12, 4  ;;  %v751_v37 = vrot.slane %v750_v60, 2 }
  0x48   : > { %369 = vadd.xlane.f32.xlu1 %v5595_v6  ;;  %367 = vadd.xlane.f32.xlu0 %v5598_v7  ;;  %v5683_v28 = vld [vmem:[%s5564_s15 + $0xe8] sm:$0xff]  ;;  %v5686_v29 = vld [vmem:[%s5564_s15 + $0xe0] sm:$0xff]  ;;  %v5691_v30 = vld [vmem:[%s5564_s15 + $0xf8] sm:$0xff]  ;;  %v763_v43 = vrot.slane %v762_v61, 2  ;;  %v757_v53 = vrot.slane %v756_v62, 2  ;;  %v775_v40 = vrot.slane %v774_v63, 2  ;;  %v5755_v34 = vmax.f32 %v722_v52, %v723_v36 }
  0x49   : > { %v5694_v31 = vld [vmem:[%s5564_s15 + $0xf0] sm:$0xff]  ;;  %v741_v54 = vrot.slane %v740_v38, 1  ;;  %v745_v51 = vrot.slane %v744_v39, 2  ;;  %v9116_v46 = vrot.slane %v5622_v13, 4  ;;  %v5758_v57 = vmax.f32 %v710_v55, %v711_v41  ;;  %s5403_s22 = smov 80   ;;  %s5404_s9 = smov 64  }
  0x4a   : > { %v5760_v32 = vmax.f32 %v728_v56, %v729_v42  ;;  %v735_v59 = vrot.slane %v734_v44, 1  ;;  %v9115_v35 = vrot.slane %v5630_v15, 4  ;;  %v5763_v33 = vmax.f32 %v716_v58, %v717_v45  ;;  %s5405_s19 = smov 48   ;;  %s5406_s21 = smov 32  }
  0x4b   : > { %v769_v50 = vrot.slane %v768_v47, 2  ;;  %v786_v49 = vmax.f32 %v5619_v12, %v9114_v48  ;;  %v5771_v55 = vmax.f32 %v750_v60, %v751_v37  ;;  %v764_v56 = vmax.f32 %v762_v61, %v763_v43  ;;  %s5407_s8 = smov 16   ;;  %p9899_p11 = scmp.ne.s32.totalorder %s9209_s13, 0 }
  0x4c   : > { %373 = vadd.xlane.f32.xlu1 %v5603_v8  ;;  %371 = vadd.xlane.f32.xlu0 %v5606_v9  ;;  %9232 = vst [vmem:[#allocation28_spill] sm:$0xff] %v5763_v33  ;;  %v758_v36 = vmax.f32 %v756_v62, %v757_v53  ;;  %v776_v41 = vmax.f32 %v774_v63, %v775_v40  ;;  %v9119_v48 = vrot.slane %v5627_v14, 4  ;;  %v9120_v60 = vrot.slane %v5638_v17, 4 }
  0x4d   : > { %v5773_v42 = vmax.f32 %v740_v38, %v741_v54  ;;  %v5775_v58 = vmax.f32 %v744_v39, %v745_v51  ;;  %v780_v45 = vmax.f32 %v5622_v13, %v9116_v46  ;;  %v5781_v52 = vmax.f32 %v734_v44, %v735_v59 }
  0x4e   : > { %v792_v37 = vmax.f32 %v5630_v15, %v9115_v35  ;;  %v9122_v40 = vrot.slane %v5667_v24, 4  ;;  %v770_v54 = vmax.f32 %v768_v47, %v769_v50  ;;  %v787_v61 = vrot.slane %v786_v49, 2 }
  0x4f   : > { %v9233_v51 = vrot.slane %v5635_v16, 4  ;;  %v765_v38 = vrot.slane %v764_v56, 1  ;;  %v759_v39 = vrot.slane %v758_v36, 1  ;;  %v777_v44 = vrot.slane %v776_v41, 1 }
  0x50   : > { %377 = vadd.xlane.f32.xlu1 %v5611_v10  ;;  %375 = vadd.xlane.f32.xlu0 %v5614_v11  ;;  %v781_v53 = vrot.slane %v780_v45, 2  ;;  %v798_v50 = vmax.f32 %v5627_v14, %v9119_v48  ;;  %v804_v35 = vmax.f32 %v5638_v17, %v9120_v60  ;;  %v858_v46 = vmax.f32 %v5667_v24, %v9122_v40 }
  0x51   : > { %v810_v62 = vmax.f32 %v5635_v16, %v9233_v51  ;;  %v793_v51 = vrot.slane %v792_v37, 2  ;;  %v771_v63 = vrot.slane %v770_v54, 1  ;;  %v5807_v43 = vmax.f32 %v786_v49, %v787_v61 }
  0x52   : > { %v5814_v47 = vmax.f32 %v764_v56, %v765_v38  ;;  %v5816_v60 = vmax.f32 %v758_v36, %v759_v39  ;;  %v9127_v40 = vrot.slane %v5643_v18, 4  ;;  %v782_v59 = vmax.f32 %v780_v45, %v781_v53 }
  0x53   : > { %v799_v49 = vrot.slane %v798_v50, 2  ;;  %v9235_v61 = vrot.slane %v5646_v19, 4  ;;  %v9236_v56 = vrot.slane %v5678_v27, 4  ;;  %vm937_vm3 = vcmask 1044484  }
  0x54   : > { %381 = vadd.xlane.f32.xlu1 %v5619_v12  ;;  %379 = vadd.xlane.f32.xlu0 %v5622_v13  ;;  %vm939_vm4 = vcmask 1045509   ;;  %vm941_vm5 = vcmask 1046534   ;;  %vm943_vm6 = vcmask 1047559   ;;  %vm1119_vm7 = vcmask 130048  }
  0x55   : > { %v864_v36 = vmax.f32 %v5678_v27, %v9236_v56  ;;  %vm1132_vm8 = vcmask 261248   ;;  %vm1145_vm9 = vcmask 392448   ;;  %vm1158_vm10 = vcmask 523648  }
  0x56   : > { %vm1171_vm11 = vcmask 654848   ;;  %vm1184_vm12 = vcmask 786048   ;;  %vm1197_vm13 = vcmask 917248   ;;  %vm1210_vm14 = vcmask 1048448  }
  0x58   : > { %385 = vadd.xlane.f32.xlu1 %v5627_v14  ;;  %383 = vadd.xlane.f32.xlu0 %v5630_v15 }
  0x5c   : > { %389 = vadd.xlane.f32.xlu1 %v5635_v16  ;;  %387 = vadd.xlane.f32.xlu0 %v5638_v17 }
  0x60   : > { %393 = vadd.xlane.f32.xlu1 %v5643_v18  ;;  %391 = vadd.xlane.f32.xlu0 %v5646_v19 }
  0x64   : > { %397 = vadd.xlane.f32.xlu1 %v5651_v20  ;;  %395 = vadd.xlane.f32.xlu0 %v5654_v21 }
  0x68   : > { %401 = vadd.xlane.f32.xlu1 %v5659_v22  ;;  %399 = vadd.xlane.f32.xlu0 %v5662_v23 }
  0x6c   : > { %405 = vadd.xlane.f32.xlu1 %v5667_v24  ;;  %403 = vadd.xlane.f32.xlu0 %v5670_v25 }
  0x70   : > { %409 = vadd.xlane.f32.xlu1 %v5675_v26  ;;  %407 = vadd.xlane.f32.xlu0 %v5678_v27 }
  0x74   : > { %413 = vadd.xlane.f32.xlu1 %v5683_v28  ;;  %411 = vadd.xlane.f32.xlu0 %v5686_v29 }
  0x78   : > { %417 = vadd.xlane.f32.xlu1 %v5691_v30  ;;  %415 = vadd.xlane.f32.xlu0 %v5694_v31 }
  0x7c   : > { %453 = vmax.xlane.f32.xlu1 %v5582_v3  ;;  %451 = vmax.xlane.f32.xlu0 %v5574_v1 }
  0x80   : > { %457 = vmax.xlane.f32.xlu1 %v5579_v2  ;;  %455 = vmax.xlane.f32.xlu0 %v5571_v0  ;;  %v5825_v2 = vmax.f32 %v792_v37, %v793_v51  ;;  %v822_v37 = vmax.f32 %v5643_v18, %v9127_v40  ;;  %v865_v40 = vrot.slane %v864_v36, 2  ;;  %v9143_v0 = vrot.slane %v5691_v30, 4 }
  0x84   : > { %461 = vmax.xlane.f32.xlu1 %v5587_v4  ;;  %459 = vmax.xlane.f32.xlu0 %v5590_v5  ;;  %v5818_v4 = vmax.f32 %v776_v41, %v777_v44  ;;  %v816_v5 = vmax.f32 %v5646_v19, %v9235_v61  ;;  %v5830_v41 = vmax.f32 %v770_v54, %v771_v63  ;;  %v783_v54 = vrot.slane %v782_v59, 1 }
  0x85   : > { %v5841_v63 = vmax.f32 %v798_v50, %v799_v49  ;;  %v823_v50 = vrot.slane %v822_v37, 2  ;;  %v9238_v49 = vrot.slane %v5651_v20, 4  ;;  %v9139_v61 = vrot.slane %v5662_v23, 4 }
  0x86   : > { %9237 = vst [vmem:[#allocation29_spill] sm:$0xff] %v5830_v41 }
  0x88   : > { %465 = vmax.xlane.f32.xlu1 %v5595_v6  ;;  %463 = vmax.xlane.f32.xlu0 %v5598_v7  ;;  %v811_v6 = vrot.slane %v810_v62, 2  ;;  %v9234_v7 = vrot.slane %v5670_v25, 4 }
  0x8a   : > { %v852_v48 = vmax.f32 %v5670_v25, %v9234_v7  ;;  %v9129_v7 = vrot.slane %v5675_v26, 4  ;;  %v812_v45 = vmax.f32 %v810_v62, %v811_v6  ;;  %v817_v6 = vrot.slane %v816_v5, 2 }
  0x8c   : > { %469 = vmax.xlane.f32.xlu1 %v5603_v8  ;;  %467 = vmax.xlane.f32.xlu0 %v5606_v9  ;;  %v853_v39 = vrot.slane %v852_v48, 2  ;;  %v870_v62 = vmax.f32 %v5675_v26, %v9129_v7  ;;  %v834_v7 = vmax.f32 %v5651_v20, %v9238_v49 }
  0x8e   : > { %v854_v53 = vmax.f32 %v852_v48, %v853_v39  ;;  %v818_v39 = vmax.f32 %v816_v5, %v817_v6  ;;  %v871_v51 = vrot.slane %v870_v62, 2 }
  0x90   : > { %473 = vmax.xlane.f32.xlu1 %v5611_v10  ;;  %471 = vmax.xlane.f32.xlu0 %v5614_v11  ;;  %v866_v10 = vmax.f32 %v864_v36, %v865_v40  ;;  %v824_v40 = vmax.f32 %v822_v37, %v823_v50  ;;  %v835_v36 = vrot.slane %v834_v7, 2 }
  0x94   : > { %477 = vmax.xlane.f32.xlu1 %v5619_v12  ;;  %475 = vmax.xlane.f32.xlu0 %v5622_v13  ;;  %v805_v12 = vrot.slane %v804_v35, 2  ;;  %v859_v13 = vrot.slane %v858_v46, 2 }
  0x96   : > { %v806_v56 = vmax.f32 %v804_v35, %v805_v12  ;;  %v860_v38 = vmax.f32 %v858_v46, %v859_v13  ;;  %v9239_v12 = vrot.slane %v5654_v21, 4  ;;  %v9240_v35 = vrot.slane %v5686_v29, 4 }
  0x97   : > { %v5860_v46 = vmax.f32 %v782_v59, %v783_v54  ;;  %v9243_v59 = vrot.slane %v5683_v28, 4 }
  0x98   : > { %481 = vmax.xlane.f32.xlu1 %v5627_v14  ;;  %479 = vmax.xlane.f32.xlu0 %v5630_v15  ;;  %v813_v14 = vrot.slane %v812_v45, 1  ;;  %v828_v13 = vmax.f32 %v5654_v21, %v9239_v12  ;;  %v876_v48 = vmax.f32 %v5686_v29, %v9240_v35  ;;  %v807_v44 = vrot.slane %v806_v56, 1 }
  0x99   : > { %v861_v15 = vrot.slane %v860_v38, 1  ;;  %v9242_v12 = vrot.slane %v5659_v22, 4  ;;  %v855_v35 = vrot.slane %v854_v53, 1  ;;  %v882_v5 = vmax.f32 %v5683_v28, %v9243_v59 }
  0x9a   : > { %v5864_v49 = vmax.f32 %v812_v45, %v813_v14  ;;  %v829_v54 = vrot.slane %v828_v13, 2  ;;  %v877_v6 = vrot.slane %v876_v48, 2  ;;  %v819_v14 = vrot.slane %v818_v39, 1 }
  0x9b   : > { %v5869_v11 = vmax.f32 %v5659_v22, %v9242_v12  ;;  %v840_v45 = vmax.f32 %v5662_v23, %v9139_v61  ;;  %v872_v12 = vmax.f32 %v870_v62, %v871_v51  ;;  %v5880_v3 = vmax.f32 %v806_v56, %v807_v44 }
  0x9c   : > { %485 = vmax.xlane.f32.xlu1 %v5635_v16  ;;  %483 = vmax.xlane.f32.xlu0 %v5638_v17  ;;  %9241 = vst [vmem:[#allocation30_spill] sm:$0xff] %v5864_v49  ;;  %v5882_v59 = vmax.f32 %v860_v38, %v861_v15  ;;  %v5887_v50 = vmax.f32 %v854_v53, %v855_v35  ;;  %v883_v17 = vrot.slane %v882_v5, 2  ;;  %v825_v38 = vrot.slane %v824_v40, 1 }
  0x9d   : > { %v1094_v51 = vsel %vm931_vm0, %v5814_v47, %v5816_v60  ;;  %v1087_v15 = vsel %vm931_vm0, %v5763_v33, %v5758_v57  ;;  %v836_v44 = vmax.f32 %v834_v7, %v835_v36  ;;  %v830_v62 = vmax.f32 %v828_v13, %v829_v54 }
  0x9e   : > { %9244 = vst [vmem:[#allocation31_spill] sm:$0xff] %v5882_v59  ;;  %9246 = vst [vmem:[#allocation32_spill] sm:$0xff] %v5887_v50  ;;  %v878_v56 = vmax.f32 %v876_v48, %v877_v6  ;;  %v841_v53 = vrot.slane %v840_v45, 2  ;;  %v873_v35 = vrot.slane %v872_v12, 1  ;;  %v894_v61 = vmax.f32 %v5691_v30, %v9143_v0 }
  0x9f   : > { %v1095_v1 = vsel %vm933_vm1, %v5830_v41, %v1094_v51  ;;  %v1088_v7 = vsel %vm933_vm1, %v5755_v34, %v1087_v15  ;;  %v847_v13 = vrot.slane %v5869_v11, 2  ;;  %v884_v48 = vmax.f32 %v882_v5, %v883_v17 }
  0xa0   : > { %489 = vmax.xlane.f32.xlu1 %v5643_v18  ;;  %487 = vmax.xlane.f32.xlu0 %v5646_v19  ;;  %v867_v18 = vrot.slane %v866_v10, 1  ;;  %v9245_v19 = vrot.slane %v5694_v31, 4  ;;  %v837_v36 = vrot.slane %v836_v44, 1  ;;  %v831_v54 = vrot.slane %v830_v62, 1 }
  0xa1   : > { %v879_v6 = vrot.slane %v878_v56, 1  ;;  %v895_v17 = vrot.slane %v894_v61, 2  ;;  %v1096_v5 = vsel %vm935_vm2, %v5818_v4, %v1095_v1  ;;  %v1089_v51 = vsel %vm935_vm2, %v5760_v32, %v1088_v7 }
  0xa2   : > { %v888_v37 = vmax.f32 %v5694_v31, %v9245_v19  ;;  %v5897_v19 = vmax.f32 %v818_v39, %v819_v14  ;;  %v1108_v39 = vsel %vm931_vm0, %v5882_v59, %v5887_v50  ;;  %v5919_v14 = vmax.f32 %v872_v12, %v873_v35 }
  0xa3   : > { %v842_v15 = vmax.f32 %v840_v45, %v841_v53  ;;  %v9253_v35 = vrot.slane %v5807_v43, 1  ;;  %v801_v7 = vrot.slane %v5841_v63, 1  ;;  %v885_v45 = vrot.slane %v884_v48, 1 }
  0xa4   : > { %493 = vmax.xlane.f32.xlu1 %v5651_v20  ;;  %491 = vmax.xlane.f32.xlu0 %v5654_v21  ;;  %9247 = vst [vmem:[#allocation33_spill] sm:$0xff] %v5897_v19  ;;  %v5902_v20 = vmax.f32 %v866_v10, %v867_v18  ;;  %v889_v21 = vrot.slane %v888_v37, 2  ;;  %v1101_v10 = vsel %vm931_vm0, %v5864_v49, %v5880_v3  ;;  %9250 = vst [vmem:[#allocation36_spill] sm:$0xff] %v5919_v14 }
  0xa5   : > { %v5917_v18 = vmax.f32 %v824_v40, %v825_v38  ;;  %v1102_v40 = vsel %vm933_vm1, %v5897_v19, %v1101_v10  ;;  %v9251_v38 = vrot.slane %v5775_v58, 1  ;;  %v5937_v1 = vmax.f32 %v5807_v43, %v9253_v35 }
  0xa6   : > { %9248 = vst [vmem:[#allocation34_spill] sm:$0xff] %v5902_v20  ;;  %v890_v0 = vmax.f32 %v888_v37, %v889_v21  ;;  %v5942_v21 = vmax.f32 %v830_v62, %v831_v54  ;;  %v5944_v37 = vmax.f32 %v878_v56, %v879_v6  ;;  %v1090_v53 = vsel %vm937_vm3, %v5781_v52, %v1089_v51 }
  0xa7   : > { %9249 = vst [vmem:[#allocation35_spill] sm:$0xff] %v5917_v18  ;;  %v5932_v12 = vmax.f32 %v5775_v58, %v9251_v38  ;;  %9254 = vst [vmem:[#allocation38_spill] sm:$0xff] %v5937_v1  ;;  %v1097_v58 = vsel %vm937_vm3, %v5860_v46, %v1096_v5  ;;  %v848_v43 = vmax.f32 %v5869_v11, %v847_v13  ;;  %v9257_v62 = vrot.slane %v5825_v2, 1 }
  0xa8   : > { %497 = vmax.xlane.f32.xlu1 %v5659_v22  ;;  %495 = vmax.xlane.f32.xlu0 %v5662_v23  ;;  %v1109_v22 = vsel %vm933_vm1, %v5902_v20, %v1108_v39  ;;  %9255 = vst [vmem:[#allocation39_spill] sm:$0xff] %v5942_v21  ;;  %9256 = vst [vmem:[#allocation40_spill] sm:$0xff] %v5944_v37  ;;  %v896_v39 = vmax.f32 %v894_v61, %v895_v17  ;;  %v843_v6 = vrot.slane %v842_v15, 1 }
  0xa9   : > { %9252 = vst [vmem:[#allocation37_spill] sm:$0xff] %v5932_v12  ;;  %v1110_v10 = vsel %vm935_vm2, %v5919_v14, %v1109_v22  ;;  %v1103_v38 = vsel %vm935_vm2, %v5917_v18, %v1102_v40  ;;  %v5958_v56 = vmax.f32 %v5825_v2, %v9257_v62  ;;  %v5960_v54 = vmax.f32 %v836_v44, %v837_v36 }
  0xaa   : > { %v891_v5 = vrot.slane %v890_v0, 1  ;;  %v5962_v35 = vmax.f32 %v884_v48, %v885_v45  ;;  %v1098_v11 = vsel %vm939_vm4, %v5937_v1, %v1097_v58  ;;  %v1091_v22 = vsel %vm939_vm4, %v5773_v42, %v1090_v53 }
  0xab   : > { %9258 = vst [vmem:[#allocation41_spill] sm:$0xff] %v5960_v54  ;;  %v1111_v2 = vsel %vm937_vm3, %v5944_v37, %v1110_v10  ;;  %v1104_v61 = vsel %vm937_vm3, %v5942_v21, %v1103_v38  ;;  %v9260_v44 = vrot.slane %v5771_v55, 1  ;;  %v5980_v48 = vmax.f32 %v5841_v63, %v801_v7 }
  0xac   : > { %501 = vmax.xlane.f32.xlu1 %v5667_v24  ;;  %499 = vmax.xlane.f32.xlu0 %v5670_v25  ;;  %9259 = vst [vmem:[#allocation42_spill] sm:$0xff] %v5962_v35  ;;  %v849_v36 = vrot.slane %v848_v43, 1  ;;  %v897_v17 = vrot.slane %v896_v39, 1  ;;  %v5982_v51 = vmax.f32 %v842_v15, %v843_v6  ;;  %v5984_v40 = vmax.f32 %v890_v0, %v891_v5 }
  0xad   : > { %v5977_v13 = vmax.f32 %v5771_v55, %v9260_v44  ;;  %9261 = vst [vmem:[#allocation43_spill] sm:$0xff] %v5980_v48  ;;  %v1099_v45 = vsel %vm941_vm5, %v5958_v56, %v1098_v11  ;;  %v1092_v58 = vsel %vm941_vm5, %v5932_v12, %v1091_v22  ;;  %v1112_v55 = vsel %vm939_vm4, %v5962_v35, %v1111_v2 }
  0xae   : > { %9262 = vst [vmem:[#allocation44_spill] sm:$0xff] %v5982_v51  ;;  %9263 = vst [vmem:[#allocation45_spill] sm:$0xff] %v5984_v40  ;;  %v1105_v63 = vsel %vm939_vm4, %v5960_v54, %v1104_v61  ;;  %v5996_v15 = vmax.f32 %v848_v43, %v849_v36  ;;  %v5998_v0 = vmax.f32 %v896_v39, %v897_v17 }
  0xaf   : > { %v6002_v7 = vsel %vm943_vm6, %v5980_v48, %v1099_v45  ;;  %v6006_v53 = vsel %vm943_vm6, %v5977_v13, %v1092_v58  ;;  %v1113_v10 = vsel %vm941_vm5, %v5984_v40, %v1112_v55  ;;  %v1106_v38 = vsel %vm941_vm5, %v5982_v51, %v1105_v63 }
  0xb0   : > { %505 = vmax.xlane.f32.xlu1 %v5675_v26  ;;  %503 = vmax.xlane.f32.xlu0 %v5678_v27  ;;  %9264 = vst [vmem:[#allocation46_spill] sm:$0xff] %v5996_v15  ;;  %9265 = vst [vmem:[#allocation47_spill] sm:$0xff] %v5998_v0  ;;  %v1123_v43 = vsel %vm1119_vm7, %v6002_v7, -inf  ;;  %v1120_v39 = vsel %vm1119_vm7, %v6006_v53, -inf  ;;  %v6020_v62 = vsel %vm943_vm6, %v5998_v0, %v1113_v10  ;;  %v1136_v22 = vsel %vm1132_vm8, %v6002_v7, -inf }
  0xb1   : > { %v6024_v6 = vsel %vm943_vm6, %v5996_v15, %v1106_v38  ;;  %v1129_v5 = vsel %vm1119_vm7, %v6020_v62, -inf  ;;  %v1133_v2 = vsel %vm1132_vm8, %v6006_v53, -inf  ;;  %v1142_v61 = vsel %vm1132_vm8, %v6020_v62, -inf }
  0xb2   : > { %v1126_v11 = vsel %vm1119_vm7, %v6024_v6, -inf  ;;  %v1139_v44 = vsel %vm1132_vm8, %v6024_v6, -inf  ;;  %v1149_v45 = vsel %vm1145_vm9, %v6002_v7, -inf  ;;  %v1146_v58 = vsel %vm1145_vm9, %v6006_v53, -inf }
  0xb3   : > { %v1155_v10 = vsel %vm1145_vm9, %v6020_v62, -inf  ;;  %v1152_v38 = vsel %vm1145_vm9, %v6024_v6, -inf }
  0xb4   : > { %509 = vmax.xlane.f32.xlu1 %v5683_v28  ;;  %507 = vmax.xlane.f32.xlu0 %v5686_v29 }
  0xb8   : > { %513 = vmax.xlane.f32.xlu1 %v5691_v30  ;;  %511 = vmax.xlane.f32.xlu0 %v5694_v31 }
  0xbc   : > { %1124 = vmax.xlane.f32.xlu1 %v1123_v43  ;;  %1121 = vmax.xlane.f32.xlu0 %v1120_v39 }
  0xc0   : > { %1130 = vmax.xlane.f32.xlu1 %v1129_v5  ;;  %1127 = vmax.xlane.f32.xlu0 %v1126_v11  ;;  %v1162_v5 = vsel %vm1158_vm10, %v6002_v7, -inf  ;;  %v1159_v11 = vsel %vm1158_vm10, %v6006_v53, -inf }
  0xc4   : > { %1137 = vmax.xlane.f32.xlu1 %v1136_v22  ;;  %1134 = vmax.xlane.f32.xlu0 %v1133_v2 }
  0xc8   : > { %1143 = vmax.xlane.f32.xlu1 %v1142_v61  ;;  %1140 = vmax.xlane.f32.xlu0 %v1139_v44  ;;  %v1168_v61 = vsel %vm1158_vm10, %v6020_v62, -inf  ;;  %v1165_v44 = vsel %vm1158_vm10, %v6024_v6, -inf }
  0xc9   : > { %v6034_v36 = vpop.xlane.xlu1 %359  ;;  %v6036_v17 = vpop.xlane.xlu0 %355 }
  0xca   : > { %9266 = vst [vmem:[#allocation48_spill] sm:$0xff] %v6034_v36  ;;  %9267 = vst [vmem:[#allocation49_spill] sm:$0xff] %v6036_v17  ;;  %v5238_v36 = vld [vmem:[%s5564_s15 + $0x48] sm:$0xff]  ;;  %v9340_v17 = vrot.slane %v5606_v9, 4 }
  0xcc   : > { %1150 = vmax.xlane.f32.xlu1 %v1149_v45  ;;  %1147 = vmax.xlane.f32.xlu0 %v1146_v58 }
  0xcd   : > { %v6040_v55 = vpop.xlane.xlu1 %361  ;;  %v6042_v63 = vpop.xlane.xlu0 %357 }
  0xce   : > { %9268 = vst [vmem:[#allocation50_spill] sm:$0xff] %v6040_v55  ;;  %9269 = vst [vmem:[#allocation51_spill] sm:$0xff] %v6042_v63  ;;  %v1191_v55 = vsel %vm1184_vm12, %v6024_v6, -inf  ;;  %v9339_v63 = vrot.slane %v5603_v8, 4  ;;  %v5240_v8 = vld [vmem:[%s5564_s15] sm:$0xff] }
  0xd0   : > { %1156 = vmax.xlane.f32.xlu1 %v1155_v10  ;;  %1153 = vmax.xlane.f32.xlu0 %v1152_v38  ;;  %v1175_v10 = vsel %vm1171_vm11, %v6002_v7, -inf  ;;  %v1172_v38 = vsel %vm1171_vm11, %v6006_v53, -inf }
  0xd1   : > { %v6046_v43 = vpop.xlane.xlu1 %365  ;;  %v6048_v39 = vpop.xlane.xlu0 %363 }
  0xd2   : > { %9270 = vst [vmem:[#allocation52_spill] sm:$0xff] %v6046_v43  ;;  %9271 = vst [vmem:[#allocation53_spill] sm:$0xff] %v6048_v39  ;;  %v1188_v43 = vsel %vm1184_vm12, %v6002_v7, -inf  ;;  %v1194_v39 = vsel %vm1184_vm12, %v6020_v62, -inf }
  0xd4   : > { %1163 = vmax.xlane.f32.xlu1 %v1162_v5  ;;  %1160 = vmax.xlane.f32.xlu0 %v1159_v11 }
  0xd5   : > { %v6052_v22 = vpop.xlane.xlu1 %369  ;;  %v6054_v2 = vpop.xlane.xlu0 %367 }
  0xd6   : > { %9272 = vst [vmem:[#allocation54_spill] sm:$0xff] %v6052_v22  ;;  %9273 = vst [vmem:[#allocation55_spill] sm:$0xff] %v6054_v2  ;;  %v1181_v22 = vsel %vm1171_vm11, %v6020_v62, -inf  ;;  %v1178_v2 = vsel %vm1171_vm11, %v6024_v6, -inf }
  0xd8   : > { %1169 = vmax.xlane.f32.xlu1 %v1168_v61  ;;  %1166 = vmax.xlane.f32.xlu0 %v1165_v44 }
  0xd9   : > { %v6058_v45 = vpop.xlane.xlu1 %373  ;;  %v6060_v58 = vpop.xlane.xlu0 %371 }
  0xda   : > { %9274 = vst [vmem:[#allocation56_spill] sm:$0xff] %v6058_v45  ;;  %9275 = vst [vmem:[#allocation57_spill] sm:$0xff] %v6060_v58 }
  0xdc   : > { %1176 = vmax.xlane.f32.xlu1 %v1175_v10  ;;  %1173 = vmax.xlane.f32.xlu0 %v1172_v38  ;;  %v1185_v10 = vsel %vm1184_vm12, %v6006_v53, -inf }
  0xdd   : > { %v6064_v5 = vpop.xlane.xlu1 %377  ;;  %v6066_v11 = vpop.xlane.xlu0 %375 }
  0xde   : > { %9276 = vst [vmem:[#allocation58_spill] sm:$0xff] %v6064_v5  ;;  %9277 = vst [vmem:[#allocation59_spill] sm:$0xff] %v6066_v11 }
  0xe0   : > { %1182 = vmax.xlane.f32.xlu1 %v1181_v22  ;;  %1179 = vmax.xlane.f32.xlu0 %v1178_v2 }
  0xe1   : > { %v6070_v61 = vpop.xlane.xlu1 %381  ;;  %v6072_v44 = vpop.xlane.xlu0 %379 }
  0xe2   : > { %9278 = vst [vmem:[#allocation60_spill] sm:$0xff] %v6070_v61  ;;  %9279 = vst [vmem:[#allocation61_spill] sm:$0xff] %v6072_v44  ;;  %v1201_v61 = vsel %vm1197_vm13, %v6002_v7, -inf  ;;  %v1204_v44 = vsel %vm1197_vm13, %v6024_v6, -inf }
  0xe4   : > { %1189 = vmax.xlane.f32.xlu1 %v1188_v43  ;;  %1186 = vmax.xlane.f32.xlu0 %v1185_v10  ;;  %v1198_v43 = vsel %vm1197_vm13, %v6006_v53, -inf }
  0xe5   : > { %v6076_v38 = vpop.xlane.xlu1 %385  ;;  %v6078_v5 = vpop.xlane.xlu0 %383 }
  0xe6   : > { %9280 = vst [vmem:[#allocation62_spill] sm:$0xff] %v6076_v38  ;;  %9281 = vst [vmem:[#allocation63_spill] sm:$0xff] %v6078_v5  ;;  %v1207_v5 = vsel %vm1197_vm13, %v6020_v62, -inf }
  0xe8   : > { %1195 = vmax.xlane.f32.xlu1 %v1194_v39  ;;  %1192 = vmax.xlane.f32.xlu0 %v1191_v55 }
  0xe9   : > { %v6082_v22 = vpop.xlane.xlu1 %389  ;;  %v6084_v2 = vpop.xlane.xlu0 %387 }
  0xea   : > { %9282 = vst [vmem:[#allocation64_spill] sm:$0xff] %v6082_v22  ;;  %9283 = vst [vmem:[#allocation65_spill] sm:$0xff] %v6084_v2  ;;  %v1214_v2 = vsel %vm1210_vm14, %v6002_v7, -inf  ;;  %v1217_v22 = vsel %vm1210_vm14, %v6024_v6, -inf }
  0xec   : > { %1202 = vmax.xlane.f32.xlu1 %v1201_v61  ;;  %1199 = vmax.xlane.f32.xlu0 %v1198_v43  ;;  %v1211_v61 = vsel %vm1210_vm14, %v6006_v53, -inf }
  0xed   : > { %v6088_v10 = vpop.xlane.xlu1 %393  ;;  %v6090_v38 = vpop.xlane.xlu0 %391 }
  0xee   : > { %9284 = vst [vmem:[#allocation66_spill] sm:$0xff] %v6088_v10  ;;  %9285 = vst [vmem:[#allocation67_spill] sm:$0xff] %v6090_v38  ;;  %v1220_v38 = vsel %vm1210_vm14, %v6020_v62, -inf }
  0xf0   : > { %1208 = vmax.xlane.f32.xlu1 %v1207_v5  ;;  %1205 = vmax.xlane.f32.xlu0 %v1204_v44 }
  0xf1   : > { %v6094_v55 = vpop.xlane.xlu1 %397  ;;  %v6096_v39 = vpop.xlane.xlu0 %395 }
  0xf2   : > { %9286 = vst [vmem:[#allocation68_spill] sm:$0xff] %v6094_v55  ;;  %9287 = vst [vmem:[#allocation69_spill] sm:$0xff] %v6096_v39 }
  0xf4   : > { %1215 = vmax.xlane.f32.xlu1 %v1214_v2  ;;  %1212 = vmax.xlane.f32.xlu0 %v1211_v61 }
  0xf5   : > { %v6100_v43 = vpop.xlane.xlu1 %401  ;;  %v6102_v10 = vpop.xlane.xlu0 %399 }
  0xf6   : > { %9288 = vst [vmem:[#allocation70_spill] sm:$0xff] %v6100_v43  ;;  %9289 = vst [vmem:[#allocation71_spill] sm:$0xff] %v6102_v10 }
  0xf8   : > { %1221 = vmax.xlane.f32.xlu1 %v1220_v38  ;;  %1218 = vmax.xlane.f32.xlu0 %v1217_v22 }
  0xf9   : > { %v6106_v5 = vpop.xlane.xlu1 %405  ;;  %v6108_v44 = vpop.xlane.xlu0 %403 }
  0xfa   : > { %9290 = vst [vmem:[#allocation72_spill] sm:$0xff] %v6106_v5  ;;  %9291 = vst [vmem:[#allocation73_spill] sm:$0xff] %v6108_v44 }
  0xfd   : > { %v6110_v55 = vpop.xlane.xlu1 %409  ;;  %v6112_v7 = vpop.xlane.xlu0 %407 }
  0xfe   : > { %9292 = vst [vmem:[#allocation74_spill] sm:$0xff] %v6110_v55  ;;  %9293 = vst [vmem:[#allocation75_spill] sm:$0xff] %v6112_v7 }
 0x101   : > { %v6114_v53 = vpop.xlane.xlu1 %413  ;;  %v6116_v2 = vpop.xlane.xlu0 %411 }
 0x102   : > { %9294 = vst [vmem:[#allocation76_spill] sm:$0xff] %v6114_v53  ;;  %9295 = vst [vmem:[#allocation77_spill] sm:$0xff] %v6116_v2 }
 0x105   : > { %v6118_v61 = vpop.xlane.xlu1 %417  ;;  %v6120_v43 = vpop.xlane.xlu0 %415 }
 0x106   : > { %9296 = vst [vmem:[#allocation78_spill] sm:$0xff] %v6118_v61  ;;  %9297 = vst [vmem:[#allocation79_spill] sm:$0xff] %v6120_v43 }
 0x109   : > { %v6122_v62 = vpop.xlane.xlu1 %453  ;;  %v6124_v6 = vpop.xlane.xlu0 %451  ;;  %1283 = vrot.lane.b32.xlu1 %v5763_v33, %s5401_s12 }
 0x10a   : > { %9298 = vst [vmem:[#allocation80_spill] sm:$0xff] %v6122_v62  ;;  %9299 = vst [vmem:[#allocation81_spill] sm:$0xff] %v6124_v6 }
 0x10d   : > { %v6128_v38 = vpop.xlane.xlu1 %457  ;;  %v6130_v22 = vpop.xlane.xlu0 %455  ;;  %1285 = vrot.lane.b32.xlu1 %v5755_v34, %s5401_s12 }
 0x10e   : > { %9300 = vst [vmem:[#allocation82_spill] sm:$0xff] %v6128_v38  ;;  %9301 = vst [vmem:[#allocation83_spill] sm:$0xff] %v6130_v22  ;;  %1281 = vrot.lane.b32.xlu0 %v5758_v57, %s5401_s12 }
 0x111   : > { %v6136_v10 = vpop.xlane.xlu1 %461  ;;  %v6138_v39 = vpop.xlane.xlu0 %459  ;;  %1287 = vrot.lane.b32.xlu1 %v5760_v32, %s5401_s12 }
 0x112   : > { %9302 = vst [vmem:[#allocation84_spill] sm:$0xff] %v6136_v10  ;;  %9303 = vst [vmem:[#allocation85_spill] sm:$0xff] %v6138_v39  ;;  %1289 = vrot.lane.b32.xlu0 %v5781_v52, %s5401_s12 }
 0x115   : > { %v6144_v6 = vpop.xlane.xlu1 %465  ;;  %v6146_v38 = vpop.xlane.xlu0 %463  ;;  %1291 = vrot.lane.b32.xlu1 %v5773_v42, %s5401_s12 }
 0x116   : > { %9304 = vst [vmem:[#allocation86_spill] sm:$0xff] %v6144_v6  ;;  %9305 = vst [vmem:[#allocation87_spill] sm:$0xff] %v6146_v38  ;;  %1293 = vrot.lane.b32.xlu0 %v5932_v12, %s5401_s12 }
 0x119   : > { %v6152_v22 = vpop.xlane.xlu1 %469  ;;  %v6154_v10 = vpop.xlane.xlu0 %467  ;;  %1295 = vrot.lane.b32.xlu1 %v5977_v13, %s5401_s12 }
 0x11a   : > { %9306 = vst [vmem:[#allocation88_spill] sm:$0xff] %v6152_v22  ;;  %9307 = vst [vmem:[#allocation89_spill] sm:$0xff] %v6154_v10  ;;  %1297 = vrot.lane.b32.xlu0 %v5816_v60, %s5401_s12 }
 0x11d   : > { %v6160_v39 = vpop.xlane.xlu1 %473  ;;  %v6162_v6 = vpop.xlane.xlu0 %471  ;;  %1299 = vrot.lane.b32.xlu1 %v5814_v47, %s5401_s12 }
 0x11e   : > { %9308 = vst [vmem:[#allocation90_spill] sm:$0xff] %v6160_v39  ;;  %9309 = vst [vmem:[#allocation91_spill] sm:$0xff] %v6162_v6  ;;  %1301 = vrot.lane.b32.xlu0 %v5830_v41, %s5401_s12 }
 0x121   : > { %v6168_v38 = vpop.xlane.xlu1 %477  ;;  %v6170_v22 = vpop.xlane.xlu0 %475  ;;  %1303 = vrot.lane.b32.xlu1 %v5818_v4, %s5401_s12 }
 0x122   : > { %9310 = vst [vmem:[#allocation92_spill] sm:$0xff] %v6168_v38  ;;  %9311 = vst [vmem:[#allocation93_spill] sm:$0xff] %v6170_v22  ;;  %1305 = vrot.lane.b32.xlu0 %v5860_v46, %s5401_s12 }
 0x125   : > { %v6176_v10 = vpop.xlane.xlu1 %481  ;;  %v6178_v39 = vpop.xlane.xlu0 %479  ;;  %1307 = vrot.lane.b32.xlu1 %v5937_v1, %s5401_s12 }
 0x126   : > { %9312 = vst [vmem:[#allocation94_spill] sm:$0xff] %v6176_v10  ;;  %9313 = vst [vmem:[#allocation95_spill] sm:$0xff] %v6178_v39  ;;  %1309 = vrot.lane.b32.xlu0 %v5958_v56, %s5401_s12 }
 0x129   : > { %v6184_v6 = vpop.xlane.xlu1 %485  ;;  %v6186_v38 = vpop.xlane.xlu0 %483  ;;  %1311 = vrot.lane.b32.xlu1 %v5980_v48, %s5401_s12 }
 0x12a   : > { %9314 = vst [vmem:[#allocation96_spill] sm:$0xff] %v6184_v6  ;;  %9315 = vst [vmem:[#allocation97_spill] sm:$0xff] %v6186_v38  ;;  %1313 = vrot.lane.b32.xlu0 %v5880_v3, %s5401_s12 }
 0x12d   : > { %v6192_v22 = vpop.xlane.xlu1 %489  ;;  %v6194_v10 = vpop.xlane.xlu0 %487  ;;  %1315 = vrot.lane.b32.xlu1 %v5864_v49, %s5401_s12 }
 0x12e   : > { %9316 = vst [vmem:[#allocation98_spill] sm:$0xff] %v6192_v22  ;;  %9317 = vst [vmem:[#allocation99_spill] sm:$0xff] %v6194_v10  ;;  %1317 = vrot.lane.b32.xlu0 %v5897_v19, %s5401_s12 }
 0x131   : > { %v6200_v39 = vpop.xlane.xlu1 %493  ;;  %v6202_v6 = vpop.xlane.xlu0 %491  ;;  %1319 = vrot.lane.b32.xlu1 %v5917_v18, %s5401_s12 }
 0x132   : > { %9318 = vst [vmem:[#allocation100_spill] sm:$0xff] %v6200_v39  ;;  %9319 = vst [vmem:[#allocation101_spill] sm:$0xff] %v6202_v6  ;;  %1321 = vrot.lane.b32.xlu0 %v5942_v21, %s5401_s12 }
 0x135   : > { %v6208_v38 = vpop.xlane.xlu1 %497  ;;  %v6210_v22 = vpop.xlane.xlu0 %495  ;;  %1323 = vrot.lane.b32.xlu1 %v5960_v54, %s5401_s12 }
 0x136   : > { %9320 = vst [vmem:[#allocation102_spill] sm:$0xff] %v6208_v38  ;;  %9321 = vst [vmem:[#allocation103_spill] sm:$0xff] %v6210_v22  ;;  %1325 = vrot.lane.b32.xlu0 %v5982_v51, %s5401_s12 }
 0x139   : > { %v6216_v10 = vpop.xlane.xlu1 %501  ;;  %v6218_v39 = vpop.xlane.xlu0 %499  ;;  %1327 = vrot.lane.b32.xlu1 %v5996_v15, %s5401_s12 }
 0x13a   : > { %9322 = vst [vmem:[#allocation104_spill] sm:$0xff] %v6216_v10  ;;  %9323 = vst [vmem:[#allocation105_spill] sm:$0xff] %v6218_v39  ;;  %1329 = vrot.lane.b32.xlu0 %v5887_v50, %s5401_s12 }
 0x13d   : > { %v6224_v6 = vpop.xlane.xlu1 %505  ;;  %v6226_v38 = vpop.xlane.xlu0 %503  ;;  %1331 = vrot.lane.b32.xlu1 %v5882_v59, %s5401_s12 }
 0x13e   : > { %9324 = vst [vmem:[#allocation106_spill] sm:$0xff] %v6224_v6  ;;  %9325 = vst [vmem:[#allocation107_spill] sm:$0xff] %v6226_v38  ;;  %1333 = vrot.lane.b32.xlu0 %v5902_v20, %s5401_s12 }
 0x141   : > { %v6232_v22 = vpop.xlane.xlu1 %509  ;;  %v6234_v10 = vpop.xlane.xlu0 %507  ;;  %1335 = vrot.lane.b32.xlu1 %v5919_v14, %s5401_s12 }
 0x142   : > { %9326 = vst [vmem:[#allocation108_spill] sm:$0xff] %v6232_v22  ;;  %9327 = vst [vmem:[#allocation109_spill] sm:$0xff] %v6234_v10  ;;  %1337 = vrot.lane.b32.xlu0 %v5944_v37, %s5401_s12  ;;  %v9370_v37 = vld [vmem:[#allocation12_spill] sm:$0xff] }
 0x143   : > { %v9371_v54 = vrot.slane %v9370_v37, 4 }
 0x145   : > { %v6240_v39 = vpop.xlane.xlu1 %513  ;;  %v6242_v6 = vpop.xlane.xlu0 %511  ;;  %1339 = vrot.lane.b32.xlu1 %v5962_v35, %s5401_s12 }
 0x146   : > { %9328 = vst [vmem:[#allocation110_spill] sm:$0xff] %v6240_v39  ;;  %9329 = vst [vmem:[#allocation111_spill] sm:$0xff] %v6242_v6  ;;  %1341 = vrot.lane.b32.xlu0 %v5984_v40, %s5401_s12  ;;  %v9145_v39 = vlaneseq  ;;  %v9353_v40 = vrot.slane %v5667_v24, 4 }
 0x148   : > { %v6263_v62 = vand.u32 127, %v9145_v39 }
 0x149   : > { %v6248_v38 = vpop.xlane.xlu1 %1124  ;;  %v6250_v22 = vpop.xlane.xlu0 %1121  ;;  %1343 = vrot.lane.b32.xlu1 %v5998_v0, %s5401_s12  ;;  %v5243_v0 = vld [vmem:[%s5564_s15 + $0xc8] sm:$0xff] }
 0x14a   : > { %9330 = vst [vmem:[#allocation112_spill] sm:$0xff] %v6248_v38  ;;  %9331 = vst [vmem:[#allocation113_spill] sm:$0xff] %v6250_v22  ;;  %1411 = vrot.lane.b32.xlu0 %v5763_v33, %s5402_s20  ;;  %vm1225_vm15 = vcmp.eq.s32.totalorder %v6263_v62, 0  ;;  %vm1232_vm8 = vcmp.eq.s32.totalorder %v6263_v62, 1  ;;  %vm1239_vm9 = vcmp.eq.s32.totalorder %v6263_v62, 2  ;;  %vm1246_vm10 = vcmp.eq.s32.totalorder %v6263_v62, 3 }
 0x14b   : > { %v666_v15 = vadd.f32 %v5243_v0, %v9353_v40  ;;  %v5245_v0 = vld [vmem:[%s5564_s15 + $0x90] sm:$0xff]  ;;  %vm1253_vm11 = vcmp.eq.s32.totalorder %v6263_v62, 4  ;;  %vm1260_vm12 = vcmp.eq.s32.totalorder %v6263_v62, 5  ;;  %vm1267_vm13 = vcmp.eq.s32.totalorder %v6263_v62, 6 }
 0x14c   : > { %vm1274_vm14 = vcmp.eq.s32.totalorder %v6263_v62, 7 }
 0x14d   : > { %v6256_v10 = vpop.xlane.xlu1 %1130  ;;  %v1128_v6 = vpop.xlane.xlu0 %1127  ;;  %1413 = vrot.lane.b32.xlu1 %v5755_v34, %s5402_s20 }
 0x14e   : > { %9332 = vst [vmem:[#allocation114_spill] sm:$0xff] %v6256_v10  ;;  %1427 = vrot.lane.b32.xlu0 %v5814_v47, %s5402_s20  ;;  %v1230_v53 = vsel %vm1225_vm15, %v1128_v6, 0.0  ;;  %v336_v6 = vld [vmem:[%s9098_s5] sm:$0xff]  ;;  %v9343_v10 = vrot.slane %v5635_v16, 4 }
 0x151   : > { %v6265_v61 = vpop.xlane.xlu1 %1137  ;;  %v6267_v43 = vpop.xlane.xlu0 %1134  ;;  %1409 = vrot.lane.b32.xlu1 %v5758_v57, %s5402_s20 }
 0x152   : > { %9333 = vst [vmem:[#allocation115_spill] sm:$0xff] %v6265_v61  ;;  %9334 = vst [vmem:[#allocation116_spill] sm:$0xff] %v6267_v43  ;;  %1415 = vrot.lane.b32.xlu0 %v5760_v32, %s5402_s20 }
 0x155   : > { %v6277_v2 = vpop.xlane.xlu1 %1143  ;;  %v1141_v39 = vpop.xlane.xlu0 %1140  ;;  %1429 = vrot.lane.b32.xlu1 %v5830_v41, %s5402_s20 }
 0x156   : > { %9335 = vst [vmem:[#allocation117_spill] sm:$0xff] %v6277_v2  ;;  %v1237_v55 = vsel %vm1232_vm8, %v1141_v39, %v1230_v53  ;;  %1539 = vrot.lane.b32.xlu0 %v5763_v33, %s5403_s22  ;;  %v337_v39 = vld [vmem:[%s9098_s5 + $0x8] sm:$0xff] }
 0x157   : > { %v5013_v53 = vpack.c.bf16 %v337_v39, %v336_v6  ;;  %v338_v6 = vld [vmem:[%s9098_s5 + $0x10] sm:$0xff]  ;;  %v339_v39 = vld [vmem:[%s9098_s5 + $0x18] sm:$0xff] }
 0x158   : > { %v5017_v45 = vpack.c.bf16 %v339_v39, %v338_v6  ;;  %v618_v6 = vadd.f32 %v9343_v10, %v5635_v16  ;;  %v341_v16 = vld [vmem:[%s9098_s5 + $0x28] sm:$0xff] }
 0x159   : > { %v6285_v7 = vpop.xlane.xlu1 %1150  ;;  %v6287_v44 = vpop.xlane.xlu0 %1147  ;;  %1417 = vrot.lane.b32.xlu1 %v5781_v52, %s5402_s20  ;;  %5014 = vmatprep.subr.bf16.mxu0 %v5013_v53  ;;  %v5241_v10 = vld [vmem:[%s5564_s15 + $0x8] sm:$0xff] }
 0x15a   : > { %9336 = vst [vmem:[#allocation118_spill] sm:$0xff] %v6285_v7  ;;  %9337 = vst [vmem:[#allocation119_spill] sm:$0xff] %v6287_v44  ;;  %1425 = vrot.lane.b32.xlu0 %v5816_v60, %s5402_s20  ;;  %5016 = vmatpush3.bf16.msra.mxu0 %v5013_v53  ;;  %v9348_v7 = vld [vmem:[#allocation11_spill] sm:$0xff]  ;;  %v9351_v44 = vld [vmem:[#allocation17_spill] sm:$0xff] }
 0x15b   : > { %5018 = vmatprep.subr.bf16.mxu0 %v5017_v45  ;;  %v9349_v61 = vrot.slane %v9348_v7, 4 }
 0x15d   : > { %v6300_v5 = vpop.xlane.xlu1 %1156  ;;  %v1154_v11 = vpop.xlane.xlu0 %1153  ;;  %1431 = vrot.lane.b32.xlu1 %v5818_v4, %s5402_s20  ;;  %v522_v38 = vadd.f32 %v5241_v10, %v9349_v61  ;;  %v342_v61 = vld [vmem:[%s9098_s5 + $0x30] sm:$0xff] }
 0x15e   : > { %9338 = vst [vmem:[#allocation120_spill] sm:$0xff] %v6300_v5  ;;  %v1244_v58 = vsel %vm1239_vm9, %v1154_v11, %v1237_v55  ;;  %1541 = vrot.lane.b32.xlu0 %v5755_v34, %s5403_s22  ;;  %v570_v11 = vadd.f32 %v5238_v36, %v9339_v63  ;;  %v5239_v55 = vld [vmem:[%s5564_s15 + $0x40] sm:$0xff]  ;;  %v9344_v36 = vld [vmem:[#allocation9_spill] sm:$0xff]  ;;  %5020 = vmatpush3.bf16.msra.mxu0 %v5017_v45 }
 0x15f   : > { %v564_v5 = vadd.f32 %v5239_v55, %v9340_v17  ;;  %v9345_v63 = vrot.slane %v9344_v36, 4  ;;  %v9346_v17 = vld [vmem:[#allocation22_spill] sm:$0xff]  ;;  %v523_v10 = vrot.slane %v522_v38, 2 }
 0x160   : > { %v9347_v39 = vrot.slane %v9346_v17, 4  ;;  %v571_v36 = vrot.slane %v570_v11, 2 }
 0x161   : > { %v6320_v2 = vpop.xlane.xlu1 %1163  ;;  %v6322_v53 = vpop.xlane.xlu0 %1160  ;;  %1555 = vrot.lane.b32.xlu1 %v5814_v47, %s5403_s22  ;;  %v516_v9 = vadd.f32 %v5240_v8, %v9345_v63  ;;  %v565_v8 = vrot.slane %v564_v5, 2 }
 0x162   : > { %9341 = vst [vmem:[#allocation121_spill] sm:$0xff] %v6320_v2  ;;  %9342 = vst [vmem:[#allocation122_spill] sm:$0xff] %v6322_v53  ;;  %1419 = vrot.lane.b32.xlu0 %v5773_v42, %s5402_s20  ;;  %v612_v55 = vadd.f32 %v9347_v39, %v9346_v17  ;;  %v340_v2 = vld [vmem:[%s9098_s5 + $0x20] sm:$0xff]  ;;  %v619_v17 = vrot.slane %v618_v6, 2  ;;  %v6366_v22 = vadd.f32 %v571_v36, %v570_v11 }
 0x163   : > { %v5021_v53 = vpack.c.bf16 %v341_v16, %v340_v2  ;;  %v517_v7 = vrot.slane %v516_v9, 2  ;;  %v343_v16 = vld [vmem:[%s9098_s5 + $0x38] sm:$0xff]  ;;  %v9356_v11 = vld [vmem:[#allocation8_spill] sm:$0xff] }
 0x164   : > { %v613_v2 = vrot.slane %v612_v55, 2  ;;  %v5025_v43 = vpack.c.bf16 %v343_v16, %v342_v61  ;;  %v9357_v36 = vrot.slane %v9356_v11, 4 }
 0x165   : > { %v6347_v63 = vpop.xlane.xlu1 %1169  ;;  %v1167_v45 = vpop.xlane.xlu0 %1166  ;;  %1433 = vrot.lane.b32.xlu1 %v5860_v46, %s5402_s20  ;;  %5022 = vmatprep.subr.bf16.mxu0 %v5021_v53  ;;  %v6386_v24 = vadd.f32 %v517_v7, %v516_v9  ;;  %v5246_v9 = vld [vmem:[%s5564_s15 + $0x58] sm:$0xff]  ;;  %v9360_v7 = vld [vmem:[#allocation16_spill] sm:$0xff] }
 0x166   : > { %9350 = vst [vmem:[#allocation9_spill] sm:$0xff] %v6347_v63  ;;  %v1251_v39 = vsel %vm1246_vm10, %v1167_v45, %v1244_v58  ;;  %1443 = vrot.lane.b32.xlu0 %v5864_v49, %s5402_s20  ;;  %5024 = vmatpush3.bf16.msra.mxu0 %v5021_v53  ;;  %v5242_v63 = vld [vmem:[%s5564_s15 + $0x50] sm:$0xff]  ;;  %v9352_v58 = vrot.slane %v9351_v44, 4  ;;  %v6368_v53 = vadd.f32 %v565_v8, %v564_v5 }
 0x167   : > { %v6379_v44 = vadd.f32 %v619_v17, %v618_v6  ;;  %5026 = vmatprep.subr.bf16.mxu0 %v5025_v43  ;;  %v5244_v5 = vld [vmem:[%s5564_s15 + $0x10] sm:$0xff]  ;;  %v6388_v40 = vadd.f32 %v613_v2, %v612_v55  ;;  %v344_v6 = vld [vmem:[%s9098_s5 + $0x40] sm:$0xff]  ;;  %v345_v17 = vld [vmem:[%s9098_s5 + $0x48] sm:$0xff]  ;;  %v9361_v55 = vrot.slane %v9360_v7, 4  ;;  %v519_v37 = vrot.slane %v6386_v24, 1 }
 0x168   : > { %v6364_v45 = vadd.f32 %v5242_v63, %v9352_v58  ;;  %v528_v8 = vadd.f32 %v5244_v5, %v9357_v36  ;;  %v9358_v63 = vld [vmem:[#allocation24_spill] sm:$0xff]  ;;  %v524_v58 = vadd.f32 %v523_v10, %v522_v38  ;;  %v5029_v11 = vpack.c.bf16 %v345_v17, %v344_v6  ;;  %v5247_v10 = vld [vmem:[%s5564_s15 + $0x98] sm:$0xff]  ;;  %v9365_v5 = vld [vmem:[#allocation10_spill] sm:$0xff] }
 0x169   : > { %v6373_v35 = vpop.xlane.xlu1 %1176  ;;  %v6375_v51 = vpop.xlane.xlu0 %1173  ;;  %1537 = vrot.lane.b32.xlu1 %v5758_v57, %s5403_s22  ;;  %v9359_v61 = vrot.slane %v9358_v63, 4  ;;  %v6404_v2 = vadd.f32 %v5246_v9, %v9361_v55  ;;  %v9363_v9 = vld [vmem:[#allocation23_spill] sm:$0xff] }
 0x16a   : > { %9354 = vst [vmem:[#allocation22_spill] sm:$0xff] %v6373_v35  ;;  %9355 = vst [vmem:[#allocation11_spill] sm:$0xff] %v6375_v51  ;;  %1543 = vrot.lane.b32.xlu0 %v5760_v32, %s5403_s22  ;;  %5028 = vmatpush3.bf16.msra.mxu0 %v5025_v43  ;;  %v9364_v7 = vrot.slane %v9363_v9, 4  ;;  %v5248_v55 = vld [vmem:[%s5564_s15 + $0x18] sm:$0xff]  ;;  %v9366_v43 = vrot.slane %v9365_v5, 4  ;;  %v5251_v51 = vld [vmem:[%s5564_s15 + $0x28] sm:$0xff] }
 0x16b   : > { %v6393_v16 = vadd.f32 %v5245_v0, %v9359_v61  ;;  %v667_v0 = vrot.slane %v666_v15, 2  ;;  %5030 = vmatprep.subr.bf16.mxu0 %v5029_v11  ;;  %v546_v14 = vadd.f32 %v5251_v51, %v9371_v54  ;;  %v525_v54 = vrot.slane %v524_v58, 1  ;;  %v5253_v51 = vld [vmem:[%s5564_s15 + $0x60] sm:$0xff] }
 0x16c   : > { %v6418_v6 = vadd.f32 %v5247_v10, %v9364_v7  ;;  %v534_v36 = vadd.f32 %v5248_v55, %v9366_v43  ;;  %v346_v10 = vld [vmem:[%s9098_s5 + $0x50] sm:$0xff]  ;;  %v5249_v7 = vld [vmem:[%s5564_s15 + $0x20] sm:$0xff]  ;;  %v9369_v55 = vrot.slane %v5670_v25, 4 }
 0x16d   : > { %v6410_v63 = vpop.xlane.xlu1 %1182  ;;  %v1180_v61 = vpop.xlane.xlu0 %1179  ;;  %1557 = vrot.lane.b32.xlu1 %v5830_v41, %s5403_s22  ;;  %v5250_v43 = vld [vmem:[%s5564_s15 + $0xc0] sm:$0xff]  ;;  %v6446_v50 = vadd.f32 %v667_v0, %v666_v15  ;;  %v9376_v15 = vld [vmem:[#allocation19_spill] sm:$0xff] }
 0x16e   : > { %9362 = vst [vmem:[#allocation17_spill] sm:$0xff] %v6410_v63  ;;  %v1258_v17 = vsel %vm1253_vm11, %v1180_v61, %v1251_v39  ;;  %1667 = vrot.lane.b32.xlu0 %v5763_v33, %s5404_s9  ;;  %5032 = vmatpush3.bf16.msra.mxu0 %v5029_v11  ;;  %v347_v39 = vld [vmem:[%s9098_s5 + $0x58] sm:$0xff]  ;;  %v529_v61 = vrot.slane %v528_v8, 2  ;;  %v9367_v63 = vld [vmem:[#allocation13_spill] sm:$0xff]  ;;  %v6441_v38 = vadd.f32 %v5250_v43, %v9369_v55  ;;  %v535_v9 = vrot.slane %v534_v36, 2 }
 0x16f   : > { %v9368_v35 = vrot.slane %v9367_v63, 4  ;;  %v5033_v11 = vpack.c.bf16 %v347_v39, %v346_v10  ;;  %v5252_v63 = vld [vmem:[%s5564_s15 + $0x30] sm:$0xff]  ;;  %v9377_v0 = vrot.slane %v9376_v15, 4 }
 0x171   : > { %v540_v5 = vadd.f32 %v5249_v7, %v9368_v35  ;;  %v6448_v21 = vpop.xlane.xlu1 %1189  ;;  %v6450_v48 = vpop.xlane.xlu0 %1186  ;;  %1421 = vrot.lane.b32.xlu1 %v5932_v12, %s5402_s20  ;;  %v530_v35 = vadd.f32 %v529_v61, %v528_v8  ;;  %v9374_v7 = vld [vmem:[#allocation15_spill] sm:$0xff]  ;;  %5034 = vmatprep.subr.bf16.mxu0 %v5033_v11  ;;  %v588_v43 = vadd.f32 %v5253_v51, %v9377_v0  ;;  %v348_v8 = vld [vmem:[%s9098_s5 + $0x60] sm:$0xff]  ;;  %v349_v61 = vld [vmem:[%s9098_s5 + $0x68] sm:$0xff] }
 0x172   : > { %9372 = vst [vmem:[#allocation8_spill] sm:$0xff] %v6448_v21  ;;  %9373 = vst [vmem:[#allocation24_spill] sm:$0xff] %v6450_v48  ;;  %v9375_v10 = vrot.slane %v9374_v7, 4  ;;  %1435 = vrot.lane.b32.xlu0 %v5937_v1, %s5402_s20  ;;  %5036 = vmatpush3.bf16.msra.mxu0 %v5033_v11  ;;  %v5037_v21 = vpack.c.bf16 %v349_v61, %v348_v8  ;;  %v520_v48 = vadd.f32 %v519_v37, %v6386_v24  ;;  %v5254_v37 = vld [vmem:[%s5564_s15 + $0x38] sm:$0xff] }
 0x173   : > { %v541_v25 = vrot.slane %v540_v5, 2  ;;  %v531_v55 = vrot.slane %v530_v35, 1  ;;  %v526_v1 = vadd.f32 %v525_v54, %v524_v58  ;;  %v583_v58 = vrot.slane %v6404_v2, 2 }
 0x174   : > { %v552_v39 = vadd.f32 %v5252_v63, %v9375_v10  ;;  %v536_v63 = vadd.f32 %v535_v9, %v534_v36  ;;  %v547_v10 = vrot.slane %v546_v14, 2  ;;  %5038 = vmatprep.subr.bf16.mxu0 %v5037_v21  ;;  %v589_v61 = vrot.slane %v588_v43, 2 }
 0x175   : > { %v542_v7 = vadd.f32 %v541_v25, %v540_v5  ;;  %v6471_v15 = vpop.xlane.xlu1 %1195  ;;  %v1193_v11 = vpop.xlane.xlu0 %1192  ;;  %1445 = vrot.lane.b32.xlu1 %v5897_v19, %s5402_s20  ;;  %v532_v51 = vadd.f32 %v531_v55, %v530_v35  ;;  %v350_v5 = vld [vmem:[%s9098_s5 + $0x70] sm:$0xff] }
 0x176   : > { %v553_v12 = vrot.slane %v552_v39, 2  ;;  %v537_v0 = vrot.slane %v536_v63, 1  ;;  %v548_v41 = vadd.f32 %v547_v10, %v546_v14  ;;  %v1265_v9 = vsel %vm1260_vm12, %v1193_v11, %v1258_v17  ;;  %1459 = vrot.lane.b32.xlu0 %v5882_v59, %s5402_s20  ;;  %5040 = vmatpush3.bf16.msra.mxu0 %v5037_v21  ;;  %v351_v14 = vld [vmem:[%s9098_s5 + $0x78] sm:$0xff]  ;;  %v9378_v17 = vld [vmem:[#allocation14_spill] sm:$0xff] }
 0x177   : > { %v543_v33 = vrot.slane %v542_v7, 1  ;;  %v9379_v54 = vrot.slane %v9378_v17, 4  ;;  %v5041_v55 = vpack.c.bf16 %v351_v14, %v350_v5  ;;  %v932_v21 = vsel %vm931_vm0, %v526_v1, %v520_v48  ;;  %v5256_v10 = vld [vmem:[%s5564_s15 + $0x70] sm:$0xff] }
 0x178   : > { %v554_v24 = vadd.f32 %v553_v12, %v552_v39  ;;  %v538_v35 = vadd.f32 %v537_v0, %v536_v63  ;;  %v549_v25 = vrot.slane %v548_v41, 1  ;;  %v9380_v1 = vrot.slane %v6368_v53, 1 }
 0x179   : > { %v558_v8 = vadd.f32 %v5254_v37, %v9379_v54  ;;  %v544_v12 = vadd.f32 %v543_v33, %v542_v7  ;;  %v6492_v11 = vpop.xlane.xlu1 %1202  ;;  %v6494_v36 = vpop.xlane.xlu0 %1199  ;;  %1545 = vrot.lane.b32.xlu1 %v5781_v52, %s5403_s22  ;;  %v934_v37 = vsel %vm933_vm1, %v532_v51, %v932_v21  ;;  %5042 = vmatprep.subr.bf16.mxu0 %v5041_v55  ;;  %v9381_v7 = vrot.slane %v6366_v22, 1 }
 0x17a   : > { %v555_v39 = vrot.slane %v554_v24, 1  ;;  %v550_v63 = vadd.f32 %v549_v25, %v548_v41  ;;  %1553 = vrot.lane.b32.xlu0 %v5816_v60, %s5403_s22  ;;  %v568_v48 = vadd.f32 %v9380_v1, %v6368_v53  ;;  %5044 = vmatpush3.bf16.msra.mxu0 %v5041_v55  ;;  %v936_v51 = vsel %vm935_vm2, %v538_v35, %v934_v37  ;;  %v9383_v53 = vld [vmem:[#allocation18_spill] sm:$0xff] }
 0x17b   : > { %v559_v0 = vrot.slane %v558_v8, 2  ;;  %v574_v41 = vadd.f32 %v9381_v7, %v6366_v22  ;;  %v9382_v14 = vrot.slane %v6364_v45, 2  ;;  %v584_v17 = vadd.f32 %v583_v58, %v6404_v2  ;;  %v9385_v22 = vld [vmem:[#allocation21_spill] sm:$0xff] }
 0x17c   : > { %v556_v33 = vadd.f32 %v555_v39, %v554_v24  ;;  %v938_v24 = vsel %vm937_vm3, %v544_v12, %v936_v51  ;;  %v590_v54 = vadd.f32 %v589_v61, %v588_v43  ;;  %v5255_v39 = vld [vmem:[%s5564_s15 + $0x68] sm:$0xff]  ;;  %v9384_v21 = vrot.slane %v9383_v53, 4  ;;  %v5257_v61 = vld [vmem:[%s5564_s15 + $0xd0] sm:$0xff] }
 0x17d   : > { %v560_v5 = vadd.f32 %v559_v0, %v558_v8  ;;  %v578_v25 = vadd.f32 %v9382_v14, %v6364_v45  ;;  %v9386_v55 = vrot.slane %v9385_v22, 4  ;;  %v6520_v0 = vpop.xlane.xlu1 %1208  ;;  %v1206_v35 = vpop.xlane.xlu0 %1205  ;;  %1559 = vrot.lane.b32.xlu1 %v5818_v4, %s5403_s22  ;;  %v940_v2 = vsel %vm939_vm4, %v550_v63, %v938_v24  ;;  %v5258_v22 = vld [vmem:[%s5564_s15 + $0x78] sm:$0xff] }
 0x17e   : > { %v594_v1 = vadd.f32 %v5255_v39, %v9384_v21  ;;  %9387 = vst [vmem:[#allocation16_spill] sm:$0xff] %v6520_v0  ;;  %v585_v43 = vrot.slane %v584_v17, 1  ;;  %v9388_v12 = vrot.slane %v5678_v27, 4  ;;  %1669 = vrot.lane.b32.xlu0 %v5755_v34, %s5404_s9  ;;  %v942_v7 = vsel %vm941_vm5, %v556_v33, %v940_v2 }
 0x17f   : > { %v600_v8 = vadd.f32 %v5256_v10, %v9386_v55  ;;  %v561_v45 = vrot.slane %v560_v5, 1  ;;  %v579_v58 = vrot.slane %v578_v25, 1  ;;  %v1272_v10 = vsel %vm1267_vm13, %v1206_v35, %v1265_v9  ;;  %v9389_v55 = vld [vmem:[#allocation20_spill] sm:$0xff] }
 0x180   : > { %v6528_v37 = vadd.f32 %v5257_v61, %v9388_v12  ;;  %v591_v51 = vrot.slane %v590_v54, 1  ;;  %v586_v53 = vadd.f32 %v585_v43, %v584_v17  ;;  %v595_v63 = vrot.slane %v594_v1, 2 }
 0x181   : > { %v562_v14 = vadd.f32 %v561_v45, %v560_v5  ;;  %v580_v39 = vadd.f32 %v579_v58, %v578_v25  ;;  %v601_v21 = vrot.slane %v600_v8, 2  ;;  %v9390_v27 = vrot.slane %v9389_v55, 4  ;;  %v6539_v0 = vpop.xlane.xlu1 %1215  ;;  %v6541_v9 = vpop.xlane.xlu0 %1212  ;;  %1683 = vrot.lane.b32.xlu1 %v5814_v47, %s5404_s9 }
 0x182   : > { %v592_v24 = vadd.f32 %v591_v51, %v590_v54  ;;  %v945_v12 = vsel %vm931_vm0, %v574_v41, %v568_v48  ;;  %v596_v5 = vadd.f32 %v595_v63, %v594_v1  ;;  %v9391_v17 = vrot.slane %v6393_v16, 2  ;;  %1423 = vrot.lane.b32.xlu0 %v5977_v13, %s5402_s20 }
 0x183   : > { %v606_v61 = vadd.f32 %v5258_v22, %v9390_v27  ;;  %v944_v33 = vsel %vm943_vm6, %v562_v14, %v942_v7  ;;  %v946_v25 = vsel %vm933_vm1, %v580_v39, %v945_v12  ;;  %v9392_v35 = vrot.slane %v6441_v38, 2 }
 0x184   : > { %v626_v54 = vadd.f32 %v9391_v17, %v6393_v16  ;;  %v673_v41 = vrot.slane %v6528_v37, 2  ;;  %4989 = vmatprep.mubr.f32.mxu0 %v944_v33  ;;  %v602_v45 = vadd.f32 %v601_v21, %v600_v8  ;;  %v597_v1 = vrot.slane %v596_v5, 1 }
 0x185   : > { %v6553_v48 = vadd.f32 %v9392_v35, %v6441_v38  ;;  %v607_v2 = vrot.slane %v606_v61, 2  ;;  %v947_v58 = vsel %vm935_vm2, %v586_v53, %v946_v25  ;;  %v631_v7 = vrot.slane %v6418_v6, 2  ;;  %v6562_v14 = vpop.xlane.xlu1 %1221  ;;  %v1219_v39 = vpop.xlane.xlu0 %1218  ;;  %1437 = vrot.lane.b32.xlu1 %v5958_v56, %s5402_s20  ;;  %v9396_v25 = vld [vmem:[#allocation26_spill] sm:$0xff]  ;;  %v5260_v35 = vld [vmem:[%s5564_s15 + $0xa8] sm:$0xff] }
 0x186   : > { %v627_v43 = vrot.slane %v626_v54, 1  ;;  %v603_v16 = vrot.slane %v602_v45, 1  ;;  %v948_v38 = vsel %vm937_vm3, %v592_v24, %v947_v58  ;;  %v598_v8 = vadd.f32 %v597_v1, %v596_v5  ;;  %1441 = vrot.lane.b32.xlu0 %v5880_v3, %s5402_s20  ;;  %v5259_v5 = vld [vmem:[%s5564_s15 + $0xa0] sm:$0xff] }
 0x187   : > { %v608_v51 = vadd.f32 %v607_v2, %v606_v61  ;;  %v9393_v53 = vrot.slane %v6388_v40, 1  ;;  %v9394_v21 = vrot.slane %v6379_v44, 1  ;;  %v632_v55 = vadd.f32 %v631_v7, %v6418_v6  ;;  %v9398_v6 = vld [vmem:[#allocation25_spill] sm:$0xff]  ;;  %v5261_v7 = vld [vmem:[%s5564_s15 + $0xb0] sm:$0xff] }
 0x188   : > { %v6575_v24 = vsel %vm1274_vm14, %v1219_v39, %v1272_v10  ;;  %v604_v27 = vadd.f32 %v603_v16, %v602_v45  ;;  %v628_v12 = vadd.f32 %v627_v43, %v626_v54  ;;  %v9397_v17 = vrot.slane %v9396_v25, 4  ;;  %v5262_v54 = vld [vmem:[%s5564_s15 + $0xb8] sm:$0xff] }
 0x189   : > { %v616_v63 = vadd.f32 %v9393_v53, %v6388_v40  ;;  %v622_v22 = vadd.f32 %v9394_v21, %v6379_v44  ;;  %9395 = vst [vmem:[#allocation23_spill] sm:$0xff] %v6575_v24  ;;  %v609_v61 = vrot.slane %v608_v51, 1  ;;  %v949_v40 = vsel %vm939_vm4, %v598_v8, %v948_v38  ;;  %v9401_v43 = vld [vmem:[#allocation27_spill] sm:$0xff]  ;;  %v6593_v8 = vpop.permute.xlu1 %1283  ;;  %v6595_v53 = vpop.permute.xlu0 %1281  ;;  %1447 = vrot.lane.b32.xlu1 %v5917_v18, %s5402_s20 }
 0x18a   : > { %v633_v33 = vrot.slane %v632_v55, 1  ;;  %v636_v44 = vadd.f32 %v5259_v5, %v9397_v17  ;;  %v9399_v2 = vrot.slane %v9398_v6, 4  ;;  %v950_v58 = vsel %vm941_vm5, %v604_v27, %v949_v40  ;;  %1461 = vrot.lane.b32.xlu0 %v5902_v20, %s5402_s20 }
 0x18b   : > { %v610_v10 = vadd.f32 %v609_v61, %v608_v51  ;;  %v9400_v45 = vrot.slane %v5662_v23, 4  ;;  %v9402_v38 = vrot.slane %v9401_v43, 4  ;;  %v952_v27 = vsel %vm931_vm0, %v622_v22, %v616_v63  ;;  %v5263_v23 = vld [vmem:[%s5564_s15 + $0xd8] sm:$0xff] }
 0x18c   : > { %v642_v1 = vadd.f32 %v5260_v35, %v9399_v2  ;;  %v634_v21 = vadd.f32 %v633_v33, %v632_v55  ;;  %v637_v5 = vrot.slane %v636_v44, 2  ;;  %v663_v61 = vrot.slane %v6553_v48, 1 }
 0x18d   : > { %v648_v16 = vadd.f32 %v5261_v7, %v9400_v45  ;;  %v654_v39 = vadd.f32 %v5262_v54, %v9402_v38  ;;  %v9403_v40 = vrot.slane %v5675_v26, 4  ;;  %v951_v17 = vsel %vm943_vm6, %v610_v10, %v950_v58  ;;  %v6609_v22 = vpop.permute.xlu1 %1285  ;;  %v6611_v45 = vpop.permute.xlu0 %1289  ;;  %1547 = vrot.lane.b32.xlu1 %v5773_v42, %s5403_s22 }
 0x18e   : > { %v643_v51 = vrot.slane %v642_v1, 2  ;;  %4990 = vmatmul.mubr.f32.vlgmr.msra.gmra.mrb[0].mxu0 %v951_v17  ;;  %v638_v6 = vadd.f32 %v637_v5, %v636_v44  ;;  %v953_v33 = vsel %vm933_vm1, %v628_v12, %v952_v27  ;;  %v674_v44 = vadd.f32 %v673_v41, %v6528_v37  ;;  %1561 = vrot.lane.b32.xlu0 %v5860_v46, %s5403_s22 }
 0x18f   : > { %v678_v25 = vadd.f32 %v5263_v23, %v9403_v40  ;;  %v649_v35 = vrot.slane %v648_v16, 2  ;;  %v655_v55 = vrot.slane %v654_v39, 2  ;;  %v954_v63 = vsel %vm935_vm2, %v634_v21, %v953_v33  ;;  %v5264_v23 = vld [vmem:[%s5564_s15 + $0xe0] sm:$0xff]  ;;  %v5265_v40 = vld [vmem:[%s5564_s15 + $0xe8] sm:$0xff] }
 0x190   : > { %v644_v2 = vadd.f32 %v643_v51, %v642_v1  ;;  %v639_v26 = vrot.slane %v638_v6, 1  ;;  %v664_v1 = vadd.f32 %v663_v61, %v6553_v48  ;;  %v9405_v37 = vrot.slane %v5686_v29, 4 }
 0x191   : > { %v650_v7 = vadd.f32 %v649_v35, %v648_v16  ;;  %v656_v58 = vadd.f32 %v655_v55, %v654_v39  ;;  %v9404_v16 = vrot.slane %v6446_v50, 1  ;;  %v679_v43 = vrot.slane %v678_v25, 2  ;;  %v6630_v61 = vpop.permute.xlu1 %1287  ;;  %v6632_v35 = vpop.permute.xlu0 %1293  ;;  %1571 = vrot.lane.b32.xlu1 %v5864_v49, %s5403_s22 }
 0x192   : > { %v645_v10 = vrot.slane %v644_v2, 1  ;;  %v640_v38 = vadd.f32 %v639_v26, %v638_v6  ;;  %v675_v39 = vrot.slane %v674_v44, 1  ;;  %v684_v41 = vadd.f32 %v5264_v23, %v9405_v37  ;;  %1665 = vrot.lane.b32.xlu0 %v5758_v57, %s5404_s9 }
 0x193   : > { %v651_v12 = vrot.slane %v650_v7, 1  ;;  %v670_v54 = vadd.f32 %v9404_v16, %v6446_v50  ;;  %v657_v5 = vrot.slane %v656_v58, 1  ;;  %v680_v27 = vadd.f32 %v679_v43, %v678_v25  ;;  %v5266_v25 = vld [vmem:[%s5564_s15 + $0xf0] sm:$0xff] }
 0x194   : > { %v646_v21 = vadd.f32 %v645_v10, %v644_v2  ;;  %v9406_v17 = vrot.slane %v5683_v28, 4  ;;  %v955_v6 = vsel %vm937_vm3, %v640_v38, %v954_v63  ;;  %v9407_v2 = vrot.slane %v5694_v31, 4  ;;  %v5267_v63 = vld [vmem:[%s5564_s15 + $0xf8] sm:$0xff] }
 0x195   : > { %v652_v51 = vadd.f32 %v651_v12, %v650_v7  ;;  %v658_v50 = vadd.f32 %v657_v5, %v656_v58  ;;  %v676_v55 = vadd.f32 %v675_v39, %v674_v44  ;;  %v681_v33 = vrot.slane %v680_v27, 1  ;;  %v6649_v5 = vpop.permute.xlu1 %1291  ;;  %v6651_v23 = vpop.permute.xlu0 %1297  ;;  %1671 = vrot.lane.b32.xlu1 %v5760_v32, %s5404_s9 }
 0x196   : > { %v690_v48 = vadd.f32 %v5265_v40, %v9406_v17  ;;  %v696_v29 = vadd.f32 %v5266_v25, %v9407_v2  ;;  %v956_v28 = vsel %vm939_vm4, %v646_v21, %v955_v6  ;;  %v685_v26 = vrot.slane %v684_v41, 2 }
 0x197   : > { %v957_v7 = vsel %vm941_vm5, %v652_v51, %v956_v28  ;;  %v682_v16 = vadd.f32 %v681_v33, %v680_v27  ;;  %v9408_v43 = vrot.slane %v5691_v30, 4  ;;  %v959_v38 = vsel %vm931_vm0, %v670_v54, %v664_v1  ;;  %v9409_v51 = vld [vmem:[#allocation29_spill] sm:$0xff] }
 0x198   : > { %v691_v10 = vrot.slane %v690_v48, 2  ;;  %v697_v12 = vrot.slane %v696_v29, 2  ;;  %v958_v58 = vsel %vm943_vm6, %v658_v50, %v957_v7  ;;  %v686_v44 = vadd.f32 %v685_v26, %v684_v41  ;;  %1685 = vrot.lane.b32.xlu0 %v9409_v51, %s5404_s9  ;;  %v9410_v41 = vld [vmem:[#allocation28_spill] sm:$0xff] }
 0x199   : > { %v702_v31 = vadd.f32 %v5267_v63, %v9408_v43  ;;  %4992 = vmatprep.mubr.f32.mxu0 %v958_v58  ;;  %v960_v30 = vsel %vm933_vm1, %v676_v55, %v959_v38  ;;  %v6659_v50 = vpop.permute.xlu1 %1295  ;;  %v6661_v6 = vpop.permute.xlu0 %1301  ;;  %1795 = vrot.lane.b32.xlu1 %v9410_v41, %s5405_s19  ;;  %v9415_v38 = vld [vmem:[#allocation36_spill] sm:$0xff] }
 0x19a   : > { %v692_v21 = vadd.f32 %v691_v10, %v690_v48  ;;  %v698_v39 = vadd.f32 %v697_v12, %v696_v29  ;;  %v687_v37 = vrot.slane %v686_v44, 1  ;;  %v961_v54 = vsel %vm935_vm2, %v682_v16, %v960_v30  ;;  %v9411_v29 = vld [vmem:[#allocation43_spill] sm:$0xff]  ;;  %v9413_v16 = vld [vmem:[#allocation32_spill] sm:$0xff] }
 0x19b   : > { %v703_v27 = vrot.slane %v702_v31, 2  ;;  %v9412_v12 = vld [vmem:[#allocation39_spill] sm:$0xff] }
 0x19c   : > { %v693_v40 = vrot.slane %v692_v21, 1  ;;  %v699_v1 = vrot.slane %v698_v39, 1  ;;  %v688_v48 = vadd.f32 %v687_v37, %v686_v44  ;;  %1439 = vrot.lane.b32.xlu0 %v9411_v29, %s5402_s20  ;;  %v9416_v44 = vld [vmem:[#allocation37_spill] sm:$0xff] }
 0x19d   : > { %v704_v17 = vadd.f32 %v703_v27, %v702_v31  ;;  %v6669_v26 = vpop.permute.xlu1 %1299  ;;  %v6671_v10 = vpop.permute.xlu0 %1305  ;;  %1449 = vrot.lane.b32.xlu1 %v9412_v12, %s5402_s20  ;;  %v9419_v27 = vld [vmem:[#allocation38_spill] sm:$0xff] }
 0x19e   : > { %v694_v25 = vadd.f32 %v693_v40, %v692_v21  ;;  %v700_v2 = vadd.f32 %v699_v1, %v698_v39  ;;  %v962_v55 = vsel %vm937_vm3, %v688_v48, %v961_v54 }
 0x19f   : > { %v705_v28 = vrot.slane %v704_v17, 1 }
 0x1a0   : > { %v963_v7 = vsel %vm939_vm4, %v694_v25, %v962_v55  ;;  %1457 = vrot.lane.b32.xlu0 %v9413_v16, %s5402_s20 }
 0x1a1   : > { %v706_v33 = vadd.f32 %v705_v28, %v704_v17  ;;  %v964_v58 = vsel %vm941_vm5, %v700_v2, %v963_v7  ;;  %v6679_v43 = vpop.permute.xlu1 %1303  ;;  %v6681_v31 = vpop.permute.xlu0 %1309  ;;  %1463 = vrot.lane.b32.xlu1 %v9415_v38, %s5402_s20  ;;  %v9428_v2 = vld [vmem:[#allocation41_spill] sm:$0xff]  ;;  %v9429_v28 = vld [vmem:[#allocation40_spill] sm:$0xff] }
 0x1a2   : > { %9414 = vst [vmem:[#allocation10_spill] sm:$0xff] %v6681_v31 }
 0x1a3   : > { %v965_v63 = vsel %vm943_vm6, %v706_v33, %v964_v58 }
 0x1a4   : > { %4993 = vmatmul.mubr.f32.gmra.mrb[2].mxu0 %v965_v63  ;;  %1549 = vrot.lane.b32.xlu0 %v9416_v44, %s5403_s22 }
 0x1a5   : > { %v6687_v21 = vpop.permute.xlu1 %1307  ;;  %v6689_v39 = vpop.permute.xlu0 %1313  ;;  %1563 = vrot.lane.b32.xlu1 %v9419_v27, %s5403_s22 }
 0x1a6   : > { %9417 = vst [vmem:[#allocation13_spill] sm:$0xff] %v6687_v21  ;;  %9418 = vst [vmem:[#allocation12_spill] sm:$0xff] %v6689_v39  ;;  %v9456_v39 = vld [vmem:[#allocation46_spill] sm:$0xff]  ;;  %v5408_v21 = vmov 0  }
 0x1a7   : > { %5109 = vset.pattern.permute.xlu0 %v5408_v21 }
 0x1a8   : > { %1573 = vrot.lane.b32.xlu0 %v5897_v19, %s5403_s22 }
 0x1a9   : > { %v6695_v30 = vpop.permute.xlu1 %1311  ;;  %v6697_v37 = vpop.permute.xlu0 %1317  ;;  %1587 = vrot.lane.b32.xlu1 %v5882_v59, %s5403_s22 }
 0x1aa   : > { %9420 = vst [vmem:[#allocation15_spill] sm:$0xff] %v6695_v30  ;;  %9421 = vst [vmem:[#allocation19_spill] sm:$0xff] %v6697_v37 }
 0x1ac   : > { %1673 = vrot.lane.b32.xlu0 %v5781_v52, %s5404_s9 }
 0x1ad   : > { %v6703_v40 = vpop.permute.xlu1 %1315  ;;  %v6705_v1 = vpop.permute.xlu0 %1321  ;;  %1681 = vrot.lane.b32.xlu1 %v5816_v60, %s5404_s9 }
 0x1ae   : > { %9422 = vst [vmem:[#allocation14_spill] sm:$0xff] %v6703_v40  ;;  %9423 = vst [vmem:[#allocation18_spill] sm:$0xff] %v6705_v1 }
 0x1b0   : > { %1687 = vrot.lane.b32.xlu0 %v5818_v4, %s5404_s9 }
 0x1b1   : > { %v6711_v54 = vpop.permute.xlu1 %1319  ;;  %v6713_v17 = vpop.permute.xlu0 %1325  ;;  %1797 = vrot.lane.b32.xlu1 %v5755_v34, %s5405_s19 }
 0x1b2   : > { %9424 = vst [vmem:[#allocation21_spill] sm:$0xff] %v6711_v54  ;;  %9425 = vst [vmem:[#allocation20_spill] sm:$0xff] %v6713_v17 }
 0x1b4   : > { %1811 = vrot.lane.b32.xlu0 %v5814_v47, %s5405_s19 }
 0x1b5   : > { %v6719_v48 = vpop.permute.xlu1 %1323  ;;  %v6721_v25 = vpop.permute.xlu0 %1329  ;;  %1451 = vrot.lane.b32.xlu1 %v9428_v2, %s5402_s20 }
 0x1b6   : > { %9426 = vst [vmem:[#allocation26_spill] sm:$0xff] %v6719_v48  ;;  %9427 = vst [vmem:[#allocation25_spill] sm:$0xff] %v6721_v25  ;;  %v9440_v25 = vld [vmem:[#allocation44_spill] sm:$0xff]  ;;  %v9441_v48 = vld [vmem:[#allocation42_spill] sm:$0xff] }
 0x1b8   : > { %1465 = vrot.lane.b32.xlu0 %v9429_v28, %s5402_s20 }
 0x1b9   : > { %v6727_v55 = vpop.permute.xlu1 %1327  ;;  %v6729_v33 = vpop.permute.xlu0 %1333  ;;  %1551 = vrot.lane.b32.xlu1 %v5977_v13, %s5403_s22 }
 0x1ba   : > { %9430 = vst [vmem:[#allocation27_spill] sm:$0xff] %v6727_v55  ;;  %9431 = vst [vmem:[#allocation29_spill] sm:$0xff] %v6729_v33 }
 0x1bc   : > { %1565 = vrot.lane.b32.xlu0 %v5958_v56, %s5403_s22 }
 0x1bd   : > { %v6735_v7 = vpop.permute.xlu1 %1331  ;;  %v6737_v58 = vpop.permute.xlu0 %1337  ;;  %1569 = vrot.lane.b32.xlu1 %v5880_v3, %s5403_s22 }
 0x1be   : > { %9432 = vst [vmem:[#allocation28_spill] sm:$0xff] %v6735_v7  ;;  %9433 = vst [vmem:[#allocation43_spill] sm:$0xff] %v6737_v58 }
 0x1c0   : > { %1575 = vrot.lane.b32.xlu0 %v5917_v18, %s5403_s22 }
 0x1c1   : > { %v6743_v63 = vpop.permute.xlu1 %1335  ;;  %v6745_v24 = vpop.permute.xlu0 %1341  ;;  %1589 = vrot.lane.b32.xlu1 %v5902_v20, %s5403_s22 }
 0x1c2   : > { %9434 = vst [vmem:[#allocation37_spill] sm:$0xff] %v6743_v63  ;;  %9435 = vst [vmem:[#allocation38_spill] sm:$0xff] %v6745_v24 }
 0x1c4   : > { %1675 = vrot.lane.b32.xlu0 %v5773_v42, %s5404_s9 }
 0x1c5   : > { %v6751_v33 = vpop.permute.xlu1 %1339  ;;  %v6753_v7 = vpop.permute.xlu0 %1411  ;;  %1689 = vrot.lane.b32.xlu1 %v5860_v46, %s5404_s9 }
 0x1c6   : > { %9436 = vst [vmem:[#allocation123_spill] sm:$0xff] %v6751_v33 }
 0x1c8   : > { %1699 = vrot.lane.b32.xlu0 %v5864_v49, %s5404_s9 }
 0x1c9   : > { %v6759_v58 = vpop.permute.xlu1 %1343  ;;  %v6761_v63 = vpop.permute.xlu0 %1427  ;;  %1793 = vrot.lane.b32.xlu1 %v5758_v57, %s5405_s19 }
 0x1ca   : > { %9437 = vst [vmem:[#allocation124_spill] sm:$0xff] %v6759_v58  ;;  %9438 = vst [vmem:[#allocation125_spill] sm:$0xff] %v6761_v63 }
 0x1cc   : > { %1799 = vrot.lane.b32.xlu0 %v5760_v32, %s5405_s19 }
 0x1cd   : > { %v6767_v24 = vpop.permute.xlu1 %1413  ;;  %v6769_v33 = vpop.permute.xlu0 %1415  ;;  %1813 = vrot.lane.b32.xlu1 %v9409_v51, %s5405_s19 }
 0x1ce   : > { %9439 = vst [vmem:[#allocation126_spill] sm:$0xff] %v6767_v24 }
 0x1d0   : > { %1923 = vrot.lane.b32.xlu0 %v9410_v41, %s5406_s21 }
 0x1d1   : > { %v6775_v58 = vpop.permute.xlu1 %1409  ;;  %v6777_v55 = vpop.permute.xlu0 %1539  ;;  %1453 = vrot.lane.b32.xlu1 %v9440_v25, %s5402_s20 }
 0x1d4   : > { %1467 = vrot.lane.b32.xlu0 %v9441_v48, %s5402_s20 }
 0x1d5   : > { %v6783_v17 = vpop.permute.xlu1 %1429  ;;  %v6785_v54 = vpop.permute.xlu0 %1425  ;;  %1567 = vrot.lane.b32.xlu1 %v9411_v29, %s5403_s22 }
 0x1d6   : > { %9442 = vst [vmem:[#allocation127_spill] sm:$0xff] %v6783_v17  ;;  %9443 = vst [vmem:[#allocation128_spill] sm:$0xff] %v6785_v54 }
 0x1d8   : > { %1577 = vrot.lane.b32.xlu0 %v9412_v12, %s5403_s22 }
 0x1d9   : > { %v6791_v1 = vpop.permute.xlu1 %1417  ;;  %v6793_v40 = vpop.permute.xlu0 %1541  ;;  %1585 = vrot.lane.b32.xlu1 %v9413_v16, %s5403_s22 }
 0x1da   : > { %9444 = vst [vmem:[#allocation129_spill] sm:$0xff] %v6791_v1  ;;  %9445 = vst [vmem:[#allocation130_spill] sm:$0xff] %v6793_v40 }
 0x1dc   : > { %1591 = vrot.lane.b32.xlu0 %v9415_v38, %s5403_s22 }
 0x1dd   : > { %v6799_v37 = vpop.permute.xlu1 %1431  ;;  %v6801_v17 = vpop.permute.xlu0 %1419  ;;  %1677 = vrot.lane.b32.xlu1 %v9416_v44, %s5404_s9 }
 0x1de   : > { %9446 = vst [vmem:[#allocation131_spill] sm:$0xff] %v6799_v37  ;;  %9447 = vst [vmem:[#allocation132_spill] sm:$0xff] %v6801_v17 }
 0x1e0   : > { %1691 = vrot.lane.b32.xlu0 %v9419_v27, %s5404_s9 }
 0x1e1   : > { %v6807_v54 = vpop.permute.xlu1 %1555  ;;  %v6809_v63 = vpop.permute.xlu0 %1443  ;;  %1701 = vrot.lane.b32.xlu1 %v5897_v19, %s5404_s9 }
 0x1e2   : > { %9448 = vst [vmem:[#allocation133_spill] sm:$0xff] %v6807_v54  ;;  %9449 = vst [vmem:[#allocation134_spill] sm:$0xff] %v6809_v63 }
 0x1e4   : > { %1715 = vrot.lane.b32.xlu0 %v5882_v59, %s5404_s9 }
 0x1e5   : > { %v6815_v30 = vpop.permute.xlu1 %1433  ;;  %v6817_v37 = vpop.permute.xlu0 %1543  ;;  %1801 = vrot.lane.b32.xlu1 %v5781_v52, %s5405_s19 }
 0x1e6   : > { %9450 = vst [vmem:[#allocation135_spill] sm:$0xff] %v6815_v30  ;;  %9451 = vst [vmem:[#allocation136_spill] sm:$0xff] %v6817_v37 }
 0x1e8   : > { %1809 = vrot.lane.b32.xlu0 %v5816_v60, %s5405_s19 }
 0x1e9   : > { %v6823_v40 = vpop.permute.xlu1 %1537  ;;  %v6825_v54 = vpop.permute.xlu0 %1667  ;;  %1815 = vrot.lane.b32.xlu1 %v5818_v4, %s5405_s19 }
 0x1ea   : > { %9452 = vst [vmem:[#allocation137_spill] sm:$0xff] %v6823_v40  ;;  %9453 = vst [vmem:[#allocation138_spill] sm:$0xff] %v6825_v54  ;;  %v9459_v54 = vld [vmem:[#allocation45_spill] sm:$0xff] }
 0x1ec   : > { %1925 = vrot.lane.b32.xlu0 %v5755_v34, %s5406_s21 }
 0x1ed   : > { %v6831_v63 = vpop.permute.xlu1 %1557  ;;  %v6833_v30 = vpop.permute.xlu0 %1435  ;;  %1939 = vrot.lane.b32.xlu1 %v5814_v47, %s5406_s21 }
 0x1ee   : > { %9454 = vst [vmem:[#allocation139_spill] sm:$0xff] %v6831_v63  ;;  %9455 = vst [vmem:[#allocation140_spill] sm:$0xff] %v6833_v30 }
 0x1f0   : > { %1455 = vrot.lane.b32.xlu0 %v9456_v39, %s5402_s20 }
 0x1f1   : > { %v6839_v37 = vpop.permute.xlu1 %1421  ;;  %v6841_v40 = vpop.permute.xlu0 %1459  ;;  %1469 = vrot.lane.b32.xlu1 %v9459_v54, %s5402_s20 }
 0x1f2   : > { %9457 = vst [vmem:[#allocation141_spill] sm:$0xff] %v6839_v37  ;;  %9458 = vst [vmem:[#allocation142_spill] sm:$0xff] %v6841_v40 }
 0x1f4   : > { %1579 = vrot.lane.b32.xlu0 %v9428_v2, %s5403_s22 }
 0x1f5   : > { %v6847_v17 = vpop.permute.xlu1 %1445  ;;  %v6849_v63 = vpop.permute.xlu0 %1553  ;;  %1593 = vrot.lane.b32.xlu1 %v9429_v28, %s5403_s22 }
 0x1f6   : > { %9460 = vst [vmem:[#allocation143_spill] sm:$0xff] %v6847_v17  ;;  %9461 = vst [vmem:[#allocation144_spill] sm:$0xff] %v6849_v63 }
 0x1f8   : > { %1679 = vrot.lane.b32.xlu0 %v5977_v13, %s5404_s9 }
 0x1f9   : > { %v6855_v30 = vpop.permute.xlu1 %1545  ;;  %v6857_v37 = vpop.permute.xlu0 %1669  ;;  %1693 = vrot.lane.b32.xlu1 %v5958_v56, %s5404_s9 }
 0x1fa   : > { %9462 = vst [vmem:[#allocation145_spill] sm:$0xff] %v6855_v30  ;;  %9463 = vst [vmem:[#allocation146_spill] sm:$0xff] %v6857_v37 }
 0x1fc   : > { %1697 = vrot.lane.b32.xlu0 %v5880_v3, %s5404_s9 }
 0x1fd   : > { %v6863_v40 = vpop.permute.xlu1 %1559  ;;  %v6865_v17 = vpop.permute.xlu0 %1423  ;;  %1703 = vrot.lane.b32.xlu1 %v5917_v18, %s5404_s9 }
 0x1fe   : > { %9464 = vst [vmem:[#allocation147_spill] sm:$0xff] %v6863_v40  ;;  %9465 = vst [vmem:[#allocation148_spill] sm:$0xff] %v6865_v17 }
 0x200   : > { %1717 = vrot.lane.b32.xlu0 %v5902_v20, %s5404_s9 }
 0x201   : > { %v6871_v63 = vpop.permute.xlu1 %1683  ;;  %v6873_v30 = vpop.permute.xlu0 %1441  ;;  %1803 = vrot.lane.b32.xlu1 %v5773_v42, %s5405_s19 }
 0x202   : > { %9466 = vst [vmem:[#allocation149_spill] sm:$0xff] %v6871_v63  ;;  %9467 = vst [vmem:[#allocation150_spill] sm:$0xff] %v6873_v30 }
 0x204   : > { %1817 = vrot.lane.b32.xlu0 %v5860_v46, %s5405_s19 }
 0x205   : > { %v6879_v37 = vpop.permute.xlu1 %1437  ;;  %v6881_v40 = vpop.permute.xlu0 %1461  ;;  %1827 = vrot.lane.b32.xlu1 %v5864_v49, %s5405_s19 }
 0x206   : > { %9468 = vst [vmem:[#allocation151_spill] sm:$0xff] %v6879_v37  ;;  %9469 = vst [vmem:[#allocation152_spill] sm:$0xff] %v6881_v40  ;;  %v9474_v40 = vld [vmem:[#allocation47_spill] sm:$0xff] }
 0x208   : > { %1921 = vrot.lane.b32.xlu0 %v5758_v57, %s5406_s21 }
 0x209   : > { %v6887_v17 = vpop.permute.xlu1 %1447  ;;  %v6889_v63 = vpop.permute.xlu0 %1561  ;;  %1927 = vrot.lane.b32.xlu1 %v5760_v32, %s5406_s21 }
 0x20a   : > { %9470 = vst [vmem:[#allocation153_spill] sm:$0xff] %v6887_v17  ;;  %9471 = vst [vmem:[#allocation154_spill] sm:$0xff] %v6889_v63 }
 0x20c   : > { %1941 = vrot.lane.b32.xlu0 %v9409_v51, %s5406_s21 }
 0x20d   : > { %v6895_v30 = vpop.permute.xlu1 %1547  ;;  %v6897_v37 = vpop.permute.xlu0 %1665  ;;  %2051 = vrot.lane.b32.xlu1 %v9410_v41, %s5407_s8 }
 0x20e   : > { %9472 = vst [vmem:[#allocation155_spill] sm:$0xff] %v6895_v30  ;;  %9473 = vst [vmem:[#allocation156_spill] sm:$0xff] %v6897_v37 }
 0x210   : > { %1471 = vrot.lane.b32.xlu0 %v9474_v40, %s5402_s20  ;;  %s5409_s20 = smov 8  }
 0x211   : > { %v6903_v17 = vpop.permute.xlu1 %1571  ;;  %v6905_v63 = vpop.permute.xlu0 %1685  ;;  %1581 = vrot.lane.b32.xlu1 %v9440_v25, %s5403_s22 }
 0x212   : > { %9475 = vst [vmem:[#allocation157_spill] sm:$0xff] %v6903_v17  ;;  %9476 = vst [vmem:[#allocation158_spill] sm:$0xff] %v6905_v63 }
 0x214   : > { %1595 = vrot.lane.b32.xlu0 %v9441_v48, %s5403_s22 }
 0x215   : > { %v6911_v30 = vpop.permute.xlu1 %1671  ;;  %v6913_v37 = vpop.permute.xlu0 %1439  ;;  %1695 = vrot.lane.b32.xlu1 %v9411_v29, %s5404_s9 }
 0x216   : > { %9477 = vst [vmem:[#allocation159_spill] sm:$0xff] %v6911_v30  ;;  %9478 = vst [vmem:[#allocation160_spill] sm:$0xff] %v6913_v37 }
 0x218   : > { %1705 = vrot.lane.b32.xlu0 %v9412_v12, %s5404_s9 }
 0x219   : > { %v6919_v1 = vpop.permute.xlu1 %1795  ;;  %v6921_v17 = vpop.permute.xlu0 %1457  ;;  %1713 = vrot.lane.b32.xlu1 %v9413_v16, %s5404_s9 }
 0x21a   : > { %9479 = vst [vmem:[#allocation161_spill] sm:$0xff] %v6919_v1  ;;  %9480 = vst [vmem:[#allocation162_spill] sm:$0xff] %v6921_v17 }
 0x21c   : > { %1719 = vrot.lane.b32.xlu0 %v9415_v38, %s5404_s9 }
 0x21d   : > { %v6927_v63 = vpop.permute.xlu1 %1449  ;;  %v6929_v30 = vpop.permute.xlu0 %1549  ;;  %1805 = vrot.lane.b32.xlu1 %v9416_v44, %s5405_s19 }
 0x21e   : > { %9481 = vst [vmem:[#allocation163_spill] sm:$0xff] %v6927_v63  ;;  %9482 = vst [vmem:[#allocation164_spill] sm:$0xff] %v6929_v30 }
 0x220   : > { %1819 = vrot.lane.b32.xlu0 %v9419_v27, %s5405_s19 }
 0x221   : > { %v6935_v37 = vpop.permute.xlu1 %1463  ;;  %v6937_v1 = vpop.permute.xlu0 %1573  ;;  %1829 = vrot.lane.b32.xlu1 %v5897_v19, %s5405_s19 }
 0x222   : > { %9483 = vst [vmem:[#allocation165_spill] sm:$0xff] %v6935_v37  ;;  %9484 = vst [vmem:[#allocation166_spill] sm:$0xff] %v6937_v1 }
 0x224   : > { %1843 = vrot.lane.b32.xlu0 %v5882_v59, %s5405_s19 }
 0x225   : > { %v6943_v17 = vpop.permute.xlu1 %1563  ;;  %v6945_v63 = vpop.permute.xlu0 %1673  ;;  %1929 = vrot.lane.b32.xlu1 %v5781_v52, %s5406_s21 }
 0x226   : > { %9485 = vst [vmem:[#allocation167_spill] sm:$0xff] %v6943_v17  ;;  %9486 = vst [vmem:[#allocation168_spill] sm:$0xff] %v6945_v63 }
 0x228   : > { %1937 = vrot.lane.b32.xlu0 %v5816_v60, %s5406_s21 }
 0x229   : > { %v6951_v30 = vpop.permute.xlu1 %1587  ;;  %v6953_v37 = vpop.permute.xlu0 %1687  ;;  %1943 = vrot.lane.b32.xlu1 %v5818_v4, %s5406_s21 }
 0x22a   : > { %9487 = vst [vmem:[#allocation169_spill] sm:$0xff] %v6951_v30  ;;  %9488 = vst [vmem:[#allocation170_spill] sm:$0xff] %v6953_v37 }
 0x22c   : > { %2053 = vrot.lane.b32.xlu0 %v5755_v34, %s5407_s8 }
 0x22d   : > { %v6959_v1 = vpop.permute.xlu1 %1681  ;;  %v6961_v17 = vpop.permute.xlu0 %1811  ;;  %2067 = vrot.lane.b32.xlu1 %v5814_v47, %s5407_s8 }
 0x22e   : > { %9489 = vst [vmem:[#allocation171_spill] sm:$0xff] %v6959_v1  ;;  %9490 = vst [vmem:[#allocation172_spill] sm:$0xff] %v6961_v17 }
 0x230   : > { %1583 = vrot.lane.b32.xlu0 %v9456_v39, %s5403_s22 }
 0x231   : > { %v6967_v63 = vpop.permute.xlu1 %1797  ;;  %v6969_v30 = vpop.permute.xlu0 %1465  ;;  %1597 = vrot.lane.b32.xlu1 %v9459_v54, %s5403_s22 }
 0x232   : > { %9491 = vst [vmem:[#allocation173_spill] sm:$0xff] %v6967_v63  ;;  %9492 = vst [vmem:[#allocation174_spill] sm:$0xff] %v6969_v30 }
 0x234   : > { %1707 = vrot.lane.b32.xlu0 %v9428_v2, %s5404_s9 }
 0x235   : > { %v6975_v37 = vpop.permute.xlu1 %1451  ;;  %v6977_v1 = vpop.permute.xlu0 %1565  ;;  %1721 = vrot.lane.b32.xlu1 %v9429_v28, %s5404_s9 }
 0x236   : > { %9493 = vst [vmem:[#allocation175_spill] sm:$0xff] %v6975_v37  ;;  %9494 = vst [vmem:[#allocation176_spill] sm:$0xff] %v6977_v1 }
 0x238   : > { %1807 = vrot.lane.b32.xlu0 %v5977_v13, %s5405_s19 }
 0x239   : > { %v6983_v17 = vpop.permute.xlu1 %1551  ;;  %v6985_v63 = vpop.permute.xlu0 %1575  ;;  %1821 = vrot.lane.b32.xlu1 %v5958_v56, %s5405_s19 }
 0x23a   : > { %9495 = vst [vmem:[#allocation177_spill] sm:$0xff] %v6983_v17  ;;  %9496 = vst [vmem:[#allocation178_spill] sm:$0xff] %v6985_v63 }
 0x23c   : > { %1825 = vrot.lane.b32.xlu0 %v5880_v3, %s5405_s19 }
 0x23d   : > { %v6991_v30 = vpop.permute.xlu1 %1569  ;;  %v6993_v37 = vpop.permute.xlu0 %1675  ;;  %1831 = vrot.lane.b32.xlu1 %v5917_v18, %s5405_s19 }
 0x23e   : > { %9497 = vst [vmem:[#allocation179_spill] sm:$0xff] %v6991_v30  ;;  %9498 = vst [vmem:[#allocation180_spill] sm:$0xff] %v6993_v37 }
 0x240   : > { %1845 = vrot.lane.b32.xlu0 %v5902_v20, %s5405_s19 }
 0x241   : > { %v6999_v1 = vpop.permute.xlu1 %1589  ;;  %v7001_v17 = vpop.permute.xlu0 %1699  ;;  %1931 = vrot.lane.b32.xlu1 %v5773_v42, %s5406_s21 }
 0x242   : > { %9499 = vst [vmem:[#allocation181_spill] sm:$0xff] %v6999_v1  ;;  %9500 = vst [vmem:[#allocation182_spill] sm:$0xff] %v7001_v17 }
 0x244   : > { %1945 = vrot.lane.b32.xlu0 %v5860_v46, %s5406_s21 }
 0x245   : > { %v7007_v63 = vpop.permute.xlu1 %1689  ;;  %v7009_v30 = vpop.permute.xlu0 %1799  ;;  %1955 = vrot.lane.b32.xlu1 %v5864_v49, %s5406_s21 }
 0x246   : > { %9501 = vst [vmem:[#allocation183_spill] sm:$0xff] %v7007_v63  ;;  %9502 = vst [vmem:[#allocation184_spill] sm:$0xff] %v7009_v30 }
 0x248   : > { %2049 = vrot.lane.b32.xlu0 %v5758_v57, %s5407_s8 }
 0x249   : > { %v7015_v37 = vpop.permute.xlu1 %1793  ;;  %v7017_v1 = vpop.permute.xlu0 %1923  ;;  %2055 = vrot.lane.b32.xlu1 %v5760_v32, %s5407_s8 }
 0x24a   : > { %9503 = vst [vmem:[#allocation185_spill] sm:$0xff] %v7015_v37  ;;  %9504 = vst [vmem:[#allocation186_spill] sm:$0xff] %v7017_v1 }
 0x24c   : > { %2069 = vrot.lane.b32.xlu0 %v9409_v51, %s5407_s8 }
 0x24d   : > { %v7023_v17 = vpop.permute.xlu1 %1813  ;;  %v7025_v63 = vpop.permute.xlu0 %1467  ;;  %1599 = vrot.lane.b32.xlu1 %v9474_v40, %s5403_s22 }
 0x24e   : > { %9505 = vst [vmem:[#allocation187_spill] sm:$0xff] %v7023_v17  ;;  %9506 = vst [vmem:[#allocation188_spill] sm:$0xff] %v7025_v63 }
 0x250   : > { %1709 = vrot.lane.b32.xlu0 %v9440_v25, %s5404_s9 }
 0x251   : > { %v7031_v30 = vpop.permute.xlu1 %1453  ;;  %v7033_v37 = vpop.permute.xlu0 %1577  ;;  %1723 = vrot.lane.b32.xlu1 %v9441_v48, %s5404_s9 }
 0x252   : > { %9507 = vst [vmem:[#allocation189_spill] sm:$0xff] %v7031_v30  ;;  %9508 = vst [vmem:[#allocation190_spill] sm:$0xff] %v7033_v37 }
 0x254   : > { %1823 = vrot.lane.b32.xlu0 %v9411_v29, %s5405_s19 }
 0x255   : > { %v7039_v1 = vpop.permute.xlu1 %1567  ;;  %v7041_v17 = vpop.permute.xlu0 %1591  ;;  %1833 = vrot.lane.b32.xlu1 %v9412_v12, %s5405_s19 }
 0x256   : > { %9509 = vst [vmem:[#allocation191_spill] sm:$0xff] %v7039_v1  ;;  %9510 = vst [vmem:[#allocation192_spill] sm:$0xff] %v7041_v17 }
 0x258   : > { %1841 = vrot.lane.b32.xlu0 %v9413_v16, %s5405_s19 }
 0x259   : > { %v7047_v63 = vpop.permute.xlu1 %1585  ;;  %v7049_v30 = vpop.permute.xlu0 %1691  ;;  %1847 = vrot.lane.b32.xlu1 %v9415_v38, %s5405_s19 }
 0x25a   : > { %9511 = vst [vmem:[#allocation193_spill] sm:$0xff] %v7047_v63  ;;  %9512 = vst [vmem:[#allocation194_spill] sm:$0xff] %v7049_v30 }
 0x25c   : > { %1933 = vrot.lane.b32.xlu0 %v9416_v44, %s5406_s21 }
 0x25d   : > { %v7055_v37 = vpop.permute.xlu1 %1677  ;;  %v7057_v1 = vpop.permute.xlu0 %1715  ;;  %1947 = vrot.lane.b32.xlu1 %v9419_v27, %s5406_s21 }
 0x25e   : > { %9513 = vst [vmem:[#allocation195_spill] sm:$0xff] %v7055_v37  ;;  %9514 = vst [vmem:[#allocation196_spill] sm:$0xff] %v7057_v1 }
 0x260   : > { %1957 = vrot.lane.b32.xlu0 %v5897_v19, %s5406_s21 }
 0x261   : > { %v7063_v17 = vpop.f32.mrb[0].mxu0  ;;  %v7067_v30 = vpop.permute.xlu1 %1701  ;;  %1971 = vrot.lane.b32.xlu1 %v5882_v59, %s5406_s21 }
 0x262   : > { %v7065_v63 = vpop.f32.mrb[1].mxu0  ;;  %9515 = vst [vmem:[#allocation197_spill] sm:$0xff] %v7067_v30  ;;  %v7069_v24 = vpop.permute.xlu0 %1809 }
 0x263   : > { %9516 = vst [vmem:[#allocation198_spill] sm:$0xff] %v7069_v24 }
 0x264   : > { %2057 = vrot.lane.b32.xlu0 %v5781_v52, %s5407_s8 }
 0x265   : > { %v7075_v1 = vpop.permute.xlu1 %1801  ;;  %2065 = vrot.lane.b32.xlu1 %v5816_v60, %s5407_s8 }
 0x266   : > { %9517 = vst [vmem:[#allocation199_spill] sm:$0xff] %v7075_v1  ;;  %v7077_v37 = vpop.permute.xlu0 %1925 }
 0x267   : > { %9518 = vst [vmem:[#allocation200_spill] sm:$0xff] %v7077_v37 }
 0x268   : > { %2071 = vrot.lane.b32.xlu0 %v5818_v4, %s5407_s8 }
 0x269   : > { %v7083_v30 = vpop.permute.xlu1 %1815  ;;  %1711 = vrot.lane.b32.xlu1 %v9456_v39, %s5404_s9 }
 0x26a   : > { %9519 = vst [vmem:[#allocation201_spill] sm:$0xff] %v7083_v30  ;;  %v7085_v24 = vpop.permute.xlu0 %1455 }
 0x26b   : > { %9520 = vst [vmem:[#allocation202_spill] sm:$0xff] %v7085_v24 }
 0x26c   : > { %1725 = vrot.lane.b32.xlu0 %v9459_v54, %s5404_s9 }
 0x26d   : > { %v7091_v1 = vpop.permute.xlu1 %1939  ;;  %1835 = vrot.lane.b32.xlu1 %v9428_v2, %s5405_s19 }
 0x26e   : > { %9521 = vst [vmem:[#allocation203_spill] sm:$0xff] %v7091_v1  ;;  %v7093_v37 = vpop.permute.xlu0 %1579 }
 0x26f   : > { %9522 = vst [vmem:[#allocation204_spill] sm:$0xff] %v7093_v37 }
 0x270   : > { %1849 = vrot.lane.b32.xlu0 %v9429_v28, %s5405_s19 }
 0x271   : > { %v7099_v21 = vpop.permute.xlu1 %1469  ;;  %1935 = vrot.lane.b32.xlu1 %v5977_v13, %s5406_s21 }
 0x272   : > { %9523 = vst [vmem:[#allocation205_spill] sm:$0xff] %v7099_v21  ;;  %v7101_v30 = vpop.permute.xlu0 %1679 }
 0x273   : > { %9524 = vst [vmem:[#allocation206_spill] sm:$0xff] %v7101_v30 }
 0x274   : > { %1949 = vrot.lane.b32.xlu0 %v5958_v56, %s5406_s21 }
 0x275   : > { %v7109_v1 = vpop.permute.xlu1 %1593  ;;  %1953 = vrot.lane.b32.xlu1 %v5880_v3, %s5406_s21 }
 0x276   : > { %9525 = vst [vmem:[#allocation207_spill] sm:$0xff] %v7109_v1  ;;  %v7111_v37 = vpop.permute.xlu0 %1697 }
 0x277   : > { %v7107_v24 = vpop.f32.mrb[2].mxu0  ;;  %9526 = vst [vmem:[#allocation208_spill] sm:$0xff] %v7111_v37 }
 0x278   : > { %1959 = vrot.lane.b32.xlu0 %v5917_v18, %s5406_s21 }
 0x279   : > { %v7117_v21 = vpop.permute.xlu1 %1693  ;;  %1973 = vrot.lane.b32.xlu1 %v5902_v20, %s5406_s21 }
 0x27a   : > { %9527 = vst [vmem:[#allocation209_spill] sm:$0xff] %v7117_v21  ;;  %v7119_v30 = vpop.permute.xlu0 %1717 }
 0x27b   : > { %9528 = vst [vmem:[#allocation210_spill] sm:$0xff] %v7119_v30 }
 0x27c   : > { %2059 = vrot.lane.b32.xlu0 %v5773_v42, %s5407_s8 }
 0x27d   : > { %v7125_v31 = vpop.permute.xlu1 %1703  ;;  %2073 = vrot.lane.b32.xlu1 %v5860_v46, %s5407_s8 }
 0x27e   : > { %9529 = vst [vmem:[#allocation211_spill] sm:$0xff] %v7125_v31  ;;  %v7127_v1 = vpop.permute.xlu0 %1817 }
 0x27f   : > { %9530 = vst [vmem:[#allocation212_spill] sm:$0xff] %v7127_v1 }
 0x280   : > { %2083 = vrot.lane.b32.xlu0 %v5864_v49, %s5407_s8 }
 0x281   : > { %v7133_v37 = vpop.permute.xlu1 %1803  ;;  %1727 = vrot.lane.b32.xlu1 %v9474_v40, %s5404_s9  ;;  %s5410_s9 = smov 120  }
 0x282   : > { %v7135_v21 = vpop.permute.xlu0 %1921 }
 0x283   : > { %9531 = vst [vmem:[#allocation213_spill] sm:$0xff] %v7135_v21 }
 0x284   : > { %1837 = vrot.lane.b32.xlu0 %v9440_v25, %s5405_s19 }
 0x285   : > { %v7141_v30 = vpop.permute.xlu1 %1827  ;;  %1851 = vrot.lane.b32.xlu1 %v9441_v48, %s5405_s19 }
 0x286   : > { %9532 = vst [vmem:[#allocation214_spill] sm:$0xff] %v7141_v30  ;;  %v7143_v31 = vpop.permute.xlu0 %1941 }
 0x287   : > { %9533 = vst [vmem:[#allocation215_spill] sm:$0xff] %v7143_v31 }
 0x288   : > { %1951 = vrot.lane.b32.xlu0 %v9411_v29, %s5406_s21 }
 0x289   : > { %v7149_v49 = vpop.permute.xlu1 %1927  ;;  %1961 = vrot.lane.b32.xlu1 %v9412_v12, %s5406_s21 }
 0x28a   : > { %9534 = vst [vmem:[#allocation216_spill] sm:$0xff] %v7149_v49  ;;  %v7151_v1 = vpop.permute.xlu0 %1471 }
 0x28b   : > { %9535 = vst [vmem:[#allocation217_spill] sm:$0xff] %v7151_v1 }
 0x28c   : > { %1969 = vrot.lane.b32.xlu0 %v9413_v16, %s5406_s21 }
 0x28d   : > { %v7157_v21 = vpop.permute.xlu1 %2051  ;;  %1975 = vrot.lane.b32.xlu1 %v9415_v38, %s5406_s21 }
 0x28e   : > { %9536 = vst [vmem:[#allocation218_spill] sm:$0xff] %v7157_v21  ;;  %v7159_v30 = vpop.permute.xlu0 %1595 }
 0x28f   : > { %9537 = vst [vmem:[#allocation219_spill] sm:$0xff] %v7159_v30 }
 0x290   : > { %2061 = vrot.lane.b32.xlu0 %v9416_v44, %s5407_s8 }
 0x291   : > { %v7165_v31 = vpop.permute.xlu1 %1581  ;;  %2075 = vrot.lane.b32.xlu1 %v9419_v27, %s5407_s8 }
 0x292   : > { %9538 = vst [vmem:[#allocation220_spill] sm:$0xff] %v7165_v31  ;;  %v7167_v49 = vpop.permute.xlu0 %1705 }
 0x293   : > { %9539 = vst [vmem:[#allocation221_spill] sm:$0xff] %v7167_v49 }
 0x294   : > { %2085 = vrot.lane.b32.xlu0 %v5897_v19, %s5407_s8 }
 0x295   : > { %v7173_v1 = vpop.permute.xlu1 %1695  ;;  %2099 = vrot.lane.b32.xlu1 %v5882_v59, %s5407_s8 }
 0x296   : > { %9540 = vst [vmem:[#allocation222_spill] sm:$0xff] %v7173_v1  ;;  %v7175_v21 = vpop.permute.xlu0 %1719 }
 0x297   : > { %9541 = vst [vmem:[#allocation223_spill] sm:$0xff] %v7175_v21 }
 0x298   : > { %1839 = vrot.lane.b32.xlu0 %v9456_v39, %s5405_s19 }
 0x299   : > { %v7181_v30 = vpop.permute.xlu1 %1713  ;;  %1853 = vrot.lane.b32.xlu1 %v9459_v54, %s5405_s19 }
 0x29a   : > { %9542 = vst [vmem:[#allocation224_spill] sm:$0xff] %v7181_v30  ;;  %v7183_v31 = vpop.permute.xlu0 %1819 }
 0x29b   : > { %9543 = vst [vmem:[#allocation225_spill] sm:$0xff] %v7183_v31 }
 0x29c   : > { %1963 = vrot.lane.b32.xlu0 %v9428_v2, %s5406_s21 }
 0x29d   : > { %v7189_v49 = vpop.permute.xlu1 %1805  ;;  %1977 = vrot.lane.b32.xlu1 %v9429_v28, %s5406_s21 }
 0x29e   : > { %v7191_v1 = vpop.permute.xlu0 %1843 }
 0x29f   : > { %9544 = vst [vmem:[#allocation226_spill] sm:$0xff] %v7191_v1 }
 0x2a0   : > { %2063 = vrot.lane.b32.xlu0 %v5977_v13, %s5407_s8 }
 0x2a1   : > { %v7197_v21 = vpop.permute.xlu1 %1829  ;;  %2077 = vrot.lane.b32.xlu1 %v5958_v56, %s5407_s8 }
 0x2a2   : > { %9545 = vst [vmem:[#allocation227_spill] sm:$0xff] %v7197_v21  ;;  %v7199_v30 = vpop.permute.xlu0 %1937 }
 0x2a3   : > { %9546 = vst [vmem:[#allocation228_spill] sm:$0xff] %v7199_v30 }
 0x2a4   : > { %2081 = vrot.lane.b32.xlu0 %v5880_v3, %s5407_s8 }
 0x2a5   : > { %v7205_v59 = vpop.permute.xlu1 %1929  ;;  %2087 = vrot.lane.b32.xlu1 %v5917_v18, %s5407_s8 }
 0x2a6   : > { %v7207_v31 = vpop.permute.xlu0 %2053 }
 0x2a8   : > { %2101 = vrot.lane.b32.xlu0 %v5902_v20, %s5407_s8 }
 0x2a9   : > { %v7213_v1 = vpop.permute.xlu1 %1943  ;;  %1855 = vrot.lane.b32.xlu1 %v9474_v40, %s5405_s19 }
 0x2aa   : > { %9547 = vst [vmem:[#allocation229_spill] sm:$0xff] %v7213_v1  ;;  %v7215_v21 = vpop.permute.xlu0 %1583 }
 0x2ab   : > { %9548 = vst [vmem:[#allocation230_spill] sm:$0xff] %v7215_v21 }
 0x2ac   : > { %1965 = vrot.lane.b32.xlu0 %v9440_v25, %s5406_s21 }
 0x2ad   : > { %v7221_v19 = vpop.permute.xlu1 %2067  ;;  %1979 = vrot.lane.b32.xlu1 %v9441_v48, %s5406_s21 }
 0x2ae   : > { %9549 = vst [vmem:[#allocation231_spill] sm:$0xff] %v7221_v19  ;;  %v7223_v30 = vpop.permute.xlu0 %1707 }
 0x2af   : > { %9550 = vst [vmem:[#allocation232_spill] sm:$0xff] %v7223_v30  ;;  %v7245_v30 = vpop.f32.mrb[3].mxu0 }
 0x2b0   : > { %2079 = vrot.lane.b32.xlu0 %v9411_v29, %s5407_s8  ;;  %9555 = vst [vmem:[#allocation237_spill] sm:$0xff] %v7245_v30  ;;  %v9560_v30 = vld [vmem:[#allocation113_spill] sm:$0xff] }
 0x2b1   : > { %v7229_v20 = vpop.permute.xlu1 %1597  ;;  %2089 = vrot.lane.b32.xlu1 %v9412_v12, %s5407_s8 }
 0x2b2   : > { %9551 = vst [vmem:[#allocation233_spill] sm:$0xff] %v7229_v20  ;;  %v7231_v18 = vpop.permute.xlu0 %1807 }
 0x2b3   : > { %9552 = vst [vmem:[#allocation234_spill] sm:$0xff] %v7231_v18 }
 0x2b4   : > { %2097 = vrot.lane.b32.xlu0 %v9413_v16, %s5407_s8 }
 0x2b5   : > { %v7237_v21 = vpop.permute.xlu1 %1721  ;;  %2103 = vrot.lane.b32.xlu1 %v9415_v38, %s5407_s8 }
 0x2b6   : > { %9553 = vst [vmem:[#allocation235_spill] sm:$0xff] %v7237_v21  ;;  %v7239_v1 = vpop.permute.xlu0 %1825 }
 0x2b7   : > { %9554 = vst [vmem:[#allocation236_spill] sm:$0xff] %v7239_v1 }
 0x2b8   : > { %1967 = vrot.lane.b32.xlu0 %v9456_v39, %s5406_s21 }
 0x2b9   : > { %v7247_v20 = vpop.permute.xlu1 %1821  ;;  %1981 = vrot.lane.b32.xlu1 %v9459_v54, %s5406_s21 }
 0x2ba   : > { %9556 = vst [vmem:[#allocation238_spill] sm:$0xff] %v7247_v20  ;;  %v7249_v19 = vpop.permute.xlu0 %1845 }
 0x2bb   : > { %9557 = vst [vmem:[#allocation239_spill] sm:$0xff] %v7249_v19  ;;  %v1228_v19 = vsel %vm1225_vm15, %v9560_v30, 0.0 }
 0x2bc   : > { %2091 = vrot.lane.b32.xlu0 %v9428_v2, %s5407_s8  ;;  %v9562_v2 = vld [vmem:[#allocation119_spill] sm:$0xff] }
 0x2bd   : > { %v7255_v21 = vpop.permute.xlu1 %1831  ;;  %2105 = vrot.lane.b32.xlu1 %v9429_v28, %s5407_s8 }
 0x2be   : > { %9558 = vst [vmem:[#allocation240_spill] sm:$0xff] %v7255_v21  ;;  %v7257_v1 = vpop.permute.xlu0 %1945  ;;  %v9561_v21 = vld [vmem:[#allocation116_spill] sm:$0xff] }
 0x2bf   : > { %9559 = vst [vmem:[#allocation241_spill] sm:$0xff] %v7257_v1  ;;  %v1235_v28 = vsel %vm1232_vm8, %v9561_v21, %v1228_v19  ;;  %v9563_v1 = vld [vmem:[#allocation122_spill] sm:$0xff]  ;;  %v9567_v19 = vld [vmem:[#allocation11_spill] sm:$0xff] }
 0x2c0   : > { %1983 = vrot.lane.b32.xlu0 %v9474_v40, %s5406_s21  ;;  %v1242_v12 = vsel %vm1239_vm9, %v9562_v2, %v1235_v28  ;;  %v9568_v2 = vld [vmem:[#allocation115_spill] sm:$0xff] }
 0x2c1   : > { %v7266_v38 = vpop.permute.xlu1 %1931  ;;  %2093 = vrot.lane.b32.xlu1 %v9440_v25, %s5407_s8  ;;  %v1249_v30 = vsel %vm1246_vm10, %v9563_v1, %v1242_v12  ;;  %v9569_v1 = vld [vmem:[#allocation24_spill] sm:$0xff] }
 0x2c2   : > { %v7268_v16 = vpop.permute.xlu0 %2049  ;;  %v1256_v21 = vsel %vm1253_vm11, %v9567_v19, %v1249_v30  ;;  %v9571_v30 = vld [vmem:[#allocation121_spill] sm:$0xff] }
 0x2c3   : > { %v1263_v28 = vsel %vm1260_vm12, %v9569_v1, %v1256_v21 }
 0x2c4   : > { %2107 = vrot.lane.b32.xlu0 %v9441_v48, %s5407_s8  ;;  %v9566_v48 = vld [vmem:[#allocation112_spill] sm:$0xff] }
 0x2c5   : > { %v7283_v20 = vpop.permute.xlu1 %1955  ;;  %2095 = vrot.lane.b32.xlu1 %v9456_v39, %s5407_s8  ;;  %v1229_v25 = vsel %vm1225_vm15, %v9566_v48, 0.0  ;;  %v1270_v48 = vsel %vm1267_vm13, %v6494_v36, %v1263_v28  ;;  %v9574_v36 = vld [vmem:[#allocation8_spill] sm:$0xff] }
 0x2c6   : > { %9564 = vst [vmem:[#allocation113_spill] sm:$0xff] %v7283_v20  ;;  %v7285_v18 = vpop.permute.xlu0 %2069  ;;  %v1236_v12 = vsel %vm1232_vm8, %v9568_v2, %v1229_v25  ;;  %v9570_v20 = vld [vmem:[#allocation118_spill] sm:$0xff]  ;;  %v1277_v25 = vsel %vm1274_vm14, %v6541_v9, %v1270_v48 }
 0x2c7   : > { %9565 = vst [vmem:[#allocation116_spill] sm:$0xff] %v7285_v18  ;;  %v1243_v39 = vsel %vm1239_vm9, %v9570_v20, %v1236_v12  ;;  %v9573_v20 = vld [vmem:[#allocation22_spill] sm:$0xff]  ;;  %v9575_v12 = vlaneseq }
 0x2c8   : > { %2109 = vrot.lane.b32.xlu0 %v9459_v54, %s5407_s8  ;;  %v1250_v19 = vsel %vm1246_vm10, %v9571_v30, %v1243_v39 }
 0x2c9   : > { %v7315_v2 = vpop.permute.xlu1 %2055  ;;  %2111 = vrot.lane.b32.xlu1 %v9474_v40, %s5407_s8  ;;  %v1257_v21 = vsel %vm1253_vm11, %v9573_v20, %v1250_v19  ;;  %v7329_v9 = vshrl.u32 %v9575_v12, 7  ;;  %v9604_v40 = vld [vmem:[#allocation51_spill] sm:$0xff] }
 0x2ca   : > { %v7317_v54 = vpop.permute.xlu0 %1709  ;;  %v1264_v39 = vsel %vm1260_vm12, %v9574_v36, %v1257_v21 }
 0x2cb   : > { %9572 = vst [vmem:[#allocation119_spill] sm:$0xff] %v7317_v54  ;;  %9576 = vst [vmem:[#allocation122_spill] sm:$0xff] %v7329_v9  ;;  %v1271_v1 = vsel %vm1267_vm13, %v6492_v11, %v1264_v39  ;;  %v9194_v19 = vsub.s32 1, %v7329_v9  ;;  %v9583_v39 = vld [vmem:[#allocation114_spill] sm:$0xff] }
 0x2cc   : > { %2586 = vrot.lane.b32.xlu0 %v1277_v25, %s5409_s20  ;;  %v1278_v28 = vsel %vm1274_vm14, %v6539_v0, %v1271_v1  ;;  %v332_v25 = vld [vmem:[%s9094_s1] sm:$0x3]  ;;  %v7353_v0 = vsub.s32 0, %v7329_v9  ;;  %v1231_v12 = vsel %vm1225_vm15, %v9583_v39, 0.0  ;;  %v9589_v39 = vld [vmem:[#allocation17_spill] sm:$0xff]  ;;  %vm2385_vm15 = vcmask 64512  }
 0x2cd   : > { %v7337_v48 = vpop.permute.xlu1 %1599  ;;  %2373 = vrot.lane.b32.xlu1 %v7065_v63, %s5409_s20  ;;  %v2716_v63 = vrot.slane %v332_v25, %v9194_v19  ;;  %v9586_v19 = vld [vmem:[#allocation9_spill] sm:$0xff] }
 0x2ce   : > { %9577 = vst [vmem:[#allocation112_spill] sm:$0xff] %v7337_v48  ;;  %v7339_v30 = vpop.permute.xlu0 %1823  ;;  %9581 = vst [vmem:[#allocation118_spill] sm:$0xff] %v7353_v0  ;;  %v2709_v1 = vrot.slane %v332_v25, %v7353_v0 }
 0x2cf   : > { %9578 = vst [vmem:[#allocation11_spill] sm:$0xff] %v7339_v30  ;;  %v9609_v30 = vld [vmem:[#allocation57_spill] sm:$0xff] }
 0x2d0   : > { %2588 = vrot.lane.b32.xlu0 %v1278_v28, %s5409_s20  ;;  %v9584_v28 = vld [vmem:[#allocation117_spill] sm:$0xff] }
 0x2d1   : > { %v7348_v11 = vpop.permute.xlu1 %1723 }
 0x2d2   : > { %9579 = vst [vmem:[#allocation115_spill] sm:$0xff] %v7348_v11  ;;  %v7350_v20 = vpop.permute.xlu0 %1841  ;;  %v9585_v11 = vld [vmem:[#allocation120_spill] sm:$0xff] }
 0x2d3   : > { %9580 = vst [vmem:[#allocation24_spill] sm:$0xff] %v7350_v20  ;;  %v1238_v20 = vsel %vm1232_vm8, %v9584_v28, %v1231_v12  ;;  %v9590_v12 = vld [vmem:[#allocation16_spill] sm:$0xff]  ;;  %vm2736_vm8 = vcmask 261120  }
 0x2d4   : > { %2375 = vrot.lane.b32.xlu0 %v7063_v17, %s5409_s20  ;;  %v1245_v17 = vsel %vm1239_vm9, %v9585_v11, %v1238_v20  ;;  %vm3048_vm9 = vcmask 254976  }
 0x2d5   : > { %v7359_v21 = vpop.permute.xlu1 %1833 }
 0x2d6   : > { %9582 = vst [vmem:[#allocation121_spill] sm:$0xff] %v7359_v21  ;;  %v7361_v36 = vpop.permute.xlu0 %1933  ;;  %v1252_v21 = vsel %vm1246_vm10, %v9586_v19, %v1245_v17 }
 0x2d7   : > { %v1259_v25 = vsel %vm1253_vm11, %v9589_v39, %v1252_v21 }
 0x2d8   : > { %2718 = vbcast.lane.b32.xlu0 %v2716_v63, 256  ;;  %v1266_v63 = vsel %vm1260_vm12, %v6471_v15, %v1259_v25  ;;  %v333_v15 = vld [vmem:[%s9095_s2] sm:$0x3] }
 0x2d9   : > { %v7376_v48 = vpop.permute.xlu1 %1847  ;;  %v1273_v11 = vsel %vm1267_vm13, %v9590_v12, %v1266_v63  ;;  %v2918_v63 = vsub.s32 4, %v7329_v9 }
 0x2da   : > { %9587 = vst [vmem:[#allocation22_spill] sm:$0xff] %v7376_v48  ;;  %v7378_v54 = vpop.permute.xlu0 %1957  ;;  %v1280_v19 = vsel %vm1274_vm14, %v6562_v14, %v1273_v11  ;;  %v7409_v14 = vld [vmem:[%s9096_s3] sm:$0xff]  ;;  %v9603_v48 = vld [vmem:[#allocation49_spill] sm:$0xff] }
 0x2db   : > { %9588 = vst [vmem:[#allocation8_spill] sm:$0xff] %v7378_v54  ;;  %9594 = vst [vmem:[#allocation9_spill] sm:$0xff] %v7409_v14  ;;  %v2891_v25 = vrot.slane %v7409_v14, %v7353_v0  ;;  %v2919_v11 = vrot.slane %v7409_v14, %v2918_v63  ;;  %v7440_v63 = vsub.s32 %v6263_v62, %v7329_v9 }
 0x2dc   : > { %2711 = vbcast.lane.b32.xlu0 %v2709_v1, 256 }
 0x2dd   : > { %v7392_v20 = vpop.permute.xlu1 %1947 }
 0x2de   : > { %9591 = vst [vmem:[#allocation114_spill] sm:$0xff] %v7392_v20  ;;  %v7394_v28 = vpop.permute.xlu0 %2057 }
 0x2e0   : > { %2592 = vrot.lane.b32.xlu0 %v1280_v19, %s5409_s20  ;;  %v2932_v19 = vsub.s32 6, %v7329_v9  ;;  %v9613_v9 = vld [vmem:[#allocation50_spill] sm:$0xff] }
 0x2e1   : > { %v7397_v21 = vpop.permute.xlu1 %1971 }
 0x2e2   : > { %9592 = vst [vmem:[#allocation117_spill] sm:$0xff] %v7397_v21  ;;  %v7399_v1 = vpop.permute.xlu0 %2071 }
 0x2e3   : > { %9593 = vst [vmem:[#allocation120_spill] sm:$0xff] %v7399_v1  ;;  %v427_v1 = vmul.f32 0.0078125, %v9609_v30 }
 0x2e4   : > { %2379 = vrot.lane.b32.xlu0 %v7107_v24, %s5409_s20 }
 0x2e5   : > { %v7411_v17 = vpop.permute.xlu1 %2065 }
 0x2e6   : > { %9595 = vst [vmem:[#allocation17_spill] sm:$0xff] %v7411_v17  ;;  %v7413_v39 = vpop.permute.xlu0 %1725 }
 0x2e7   : > { %9596 = vst [vmem:[#allocation16_spill] sm:$0xff] %v7413_v39 }
 0x2e8   : > { %2851 = vperm.xlu0 %5109, %v333_v15   ;;  %v2933_v15 = vrot.slane %v7409_v14, %v2932_v19 }
 0x2e9   : > { %v7418_v24 = vpop.permute.xlu1 %1711 }
 0x2ea   : > { %9597 = vst [vmem:[#allocation242_spill] sm:$0xff] %v7418_v24  ;;  %v7420_v12 = vpop.permute.xlu0 %1849  ;;  %v419_v24 = vmul.f32 0.0078125, %v9603_v48  ;;  %v9607_v48 = vld [vmem:[#allocation48_spill] sm:$0xff] }
 0x2eb   : > { %9598 = vst [vmem:[#allocation243_spill] sm:$0xff] %v7420_v12  ;;  %v420_v12 = vmul.f32 0.0078125, %v9604_v40  ;;  %v421_v40 = vmul.f32 0.0078125, %v9607_v48 }
 0x2ec   : > { %2893 = vbcast.lane.b32.xlu0 %v2891_v25, 256  ;;  %v335_v25 = vld [vmem:[%s9097_s4] sm:$0xff]  ;;  %v2212_v14 = vrot.slane %v419_v24, %v7440_v63 }
 0x2ed   : > { %v7424_v21 = vpop.permute.xlu1 %1835  ;;  %v2220_v24 = vrot.slane %v421_v40, %v7440_v63 }
 0x2ee   : > { %9599 = vst [vmem:[#allocation244_spill] sm:$0xff] %v7424_v21  ;;  %v7426_v54 = vpop.permute.xlu0 %1949 }
 0x2ef   : > { %9600 = vst [vmem:[#allocation245_spill] sm:$0xff] %v7426_v54  ;;  %v9610_v54 = vld [vmem:[#allocation59_spill] sm:$0xff] }
 0x2f0   : > { %2921 = vbcast.lane.b32.xlu0 %v2919_v11, 256  ;;  %v429_v20 = vmul.f32 0.0078125, %v9610_v54 }
 0x2f1   : > { %v7429_v39 = vpop.permute.xlu1 %1935 }
 0x2f2   : > { %9601 = vst [vmem:[#allocation246_spill] sm:$0xff] %v7429_v39  ;;  %v7431_v0 = vpop.permute.xlu0 %1959  ;;  %v9615_v39 = vld [vmem:[#allocation58_spill] sm:$0xff] }
 0x2f3   : > { %9602 = vst [vmem:[#allocation247_spill] sm:$0xff] %v7431_v0  ;;  %v2216_v0 = vrot.slane %v420_v12, %v7440_v63  ;;  %v9614_v12 = vld [vmem:[#allocation53_spill] sm:$0xff]  ;;  %v430_v30 = vmul.f32 0.0078125, %v9615_v39 }
 0x2f4   : > { %2935 = vbcast.lane.b32.xlu0 %v2933_v15, 256  ;;  %v9608_v15 = vld [vmem:[#allocation56_spill] sm:$0xff]  ;;  %v9621_v39 = vld [vmem:[#allocation61_spill] sm:$0xff] }
 0x2f5   : > { %v7442_v11 = vpop.permute.xlu1 %1953  ;;  %v428_v21 = vmul.f32 0.0078125, %v9608_v15  ;;  %v2337_v17 = vsel %vm931_vm0, %v2216_v0, %v2212_v14  ;;  %v2244_v15 = vrot.slane %v427_v1, %v7440_v63  ;;  %v9617_v0 = vld [vmem:[#allocation52_spill] sm:$0xff] }
 0x2f6   : > { %9605 = vst [vmem:[#allocation49_spill] sm:$0xff] %v7442_v11  ;;  %v7444_v19 = vpop.permute.xlu0 %2059  ;;  %v422_v11 = vmul.f32 0.0078125, %v9613_v9  ;;  %v2338_v54 = vsel %vm933_vm1, %v2220_v24, %v2337_v17  ;;  %v7471_v14 = vmul.f32 0.0078125, %v9617_v0  ;;  %v7481_v24 = vmul.f32 0.0078125, %v9621_v39  ;;  %v9626_v39 = vld [vmem:[#allocation72_spill] sm:$0xff] }
 0x2f7   : > { %9606 = vst [vmem:[#allocation51_spill] sm:$0xff] %v7444_v19  ;;  %v2248_v48 = vrot.slane %v428_v21, %v7440_v63  ;;  %v9619_v21 = vld [vmem:[#allocation55_spill] sm:$0xff] }
 0x2f8   : > { %3499 = vperm.xlu0 %5109, %v335_v25   ;;  %v423_v25 = vmul.f32 0.0078125, %v9614_v12  ;;  %v2224_v9 = vrot.slane %v422_v11, %v7440_v63  ;;  %9618 = vst [vmem:[#allocation59_spill] sm:$0xff] %v7471_v14  ;;  %v7475_v12 = vmul.f32 0.0078125, %v9619_v21 }
 0x2f9   : > { %v7452_v18 = vpop.permute.xlu1 %1973  ;;  %v2344_v17 = vsel %vm931_vm0, %v2248_v48, %v2244_v15  ;;  %v9625_v15 = vld [vmem:[#allocation60_spill] sm:$0xff] }
 0x2fa   : > { %9611 = vst [vmem:[#allocation48_spill] sm:$0xff] %v7452_v18  ;;  %v7454_v62 = vpop.permute.xlu0 %2083  ;;  %v2252_v18 = vrot.slane %v429_v20, %v7440_v63  ;;  %v2228_v40 = vrot.slane %v423_v25, %v7440_v63  ;;  %9620 = vst [vmem:[#allocation50_spill] sm:$0xff] %v7475_v12  ;;  %v2339_v1 = vsel %vm935_vm2, %v2224_v9, %v2338_v54  ;;  %v9623_v54 = vld [vmem:[#allocation54_spill] sm:$0xff]  ;;  %v7507_v25 = vmul.f32 0.0078125, %v9626_v39 }
 0x2fb   : > { %9612 = vst [vmem:[#allocation56_spill] sm:$0xff] %v7454_v62  ;;  %v2256_v20 = vrot.slane %v430_v30, %v7440_v63  ;;  %v7494_v9 = vmul.f32 0.0078125, %v9623_v54  ;;  %v7499_v30 = vmul.f32 0.0078125, %v9625_v15  ;;  %v1379_v54 = vmax.f32 %v5755_v34, %v6609_v22 }
 0x2fc   : > { %v7491_v21 = vsel %vm937_vm3, %v2228_v40, %v2339_v1  ;;  %9627 = vst [vmem:[#allocation52_spill] sm:$0xff] %v7507_v25  ;;  %v1378_v40 = vmax.f32 %v9410_v41, %v6593_v8  ;;  %v1377_v1 = vmax.f32 %v5758_v57, %v6595_v53  ;;  %v1381_v15 = vmax.f32 %v5781_v52, %v6611_v45 }
 0x2fd   : > { %v7465_v19 = vpop.permute.xlu1 %2073  ;;  %9622 = vst [vmem:[#allocation53_spill] sm:$0xff] %v7491_v21  ;;  %9624 = vst [vmem:[#allocation58_spill] sm:$0xff] %v7494_v9  ;;  %v1383_v39 = vmax.f32 %v9416_v44, %v6632_v35  ;;  %v1382_v8 = vmax.f32 %v5773_v42, %v6649_v5  ;;  %v1385_v57 = vmax.f32 %v5816_v60, %v6651_v23  ;;  %v9628_v35 = vld [vmem:[#allocation10_spill] sm:$0xff]  ;;  %v9629_v5 = vld [vmem:[#allocation13_spill] sm:$0xff] }
 0x2fe   : > { %v7467_v62 = vpop.permute.xlu0 %1837  ;;  %v1506_v34 = vmax.f32 %v1378_v40, %v6753_v7  ;;  %v1384_v52 = vmax.f32 %v5977_v13, %v6659_v50  ;;  %v1386_v53 = vmax.f32 %v5814_v47, %v6669_v26  ;;  %v1389_v22 = vmax.f32 %v5860_v46, %v6671_v10  ;;  %v9631_v50 = vld [vmem:[#allocation129_spill] sm:$0xff]  ;;  %v9633_v10 = vld [vmem:[#allocation136_spill] sm:$0xff] }
 0x2ff   : > { %9616 = vst [vmem:[#allocation57_spill] sm:$0xff] %v7467_v62  ;;  %v2345_v62 = vsel %vm933_vm1, %v2252_v18, %v2344_v17  ;;  %v1388_v42 = vmax.f32 %v5818_v4, %v6679_v43  ;;  %v1505_v60 = vmax.f32 %v1377_v1, %v6775_v58  ;;  %v9632_v4 = vld [vmem:[#allocation132_spill] sm:$0xff]  ;;  %v9634_v44 = vld [vmem:[#allocation137_spill] sm:$0xff]  ;;  %v9637_v1 = vld [vmem:[#allocation130_spill] sm:$0xff] }
 0x300   : > { %v7502_v18 = vsel %vm935_vm2, %v2256_v20, %v2345_v62  ;;  %v1380_v62 = vmax.f32 %v5760_v32, %v6630_v61  ;;  %v1387_v32 = vmax.f32 %v9409_v51, %v6661_v6  ;;  %v1634_v61 = vmax.f32 %v1506_v34, %v6777_v55  ;;  %v9630_v51 = vld [vmem:[#allocation126_spill] sm:$0xff]  ;;  %v9636_v58 = vld [vmem:[#allocation12_spill] sm:$0xff]  ;;  %v9656_v9 = vld [vmem:[#allocation213_spill] sm:$0xff] }
 0x301   : > { %v7484_v11 = vpop.permute.xlu1 %1727  ;;  %v1507_v47 = vmax.f32 %v1379_v54, %v9630_v51  ;;  %v1509_v6 = vmax.f32 %v1381_v15, %v9631_v50  ;;  %v1510_v26 = vmax.f32 %v1382_v8, %v9632_v4  ;;  %v1633_v55 = vmax.f32 %v1505_v60, %v9634_v44  ;;  %v9638_v54 = vld [vmem:[#allocation141_spill] sm:$0xff]  ;;  %v9640_v50 = vld [vmem:[#allocation155_spill] sm:$0xff]  ;;  %v9641_v13 = vld [vmem:[#allocation156_spill] sm:$0xff] }
 0x302   : > { %v7486_v0 = vpop.permute.xlu0 %1951  ;;  %v1508_v45 = vmax.f32 %v1380_v62, %v6769_v33  ;;  %v9635_v33 = vld [vmem:[#allocation138_spill] sm:$0xff]  ;;  %v1511_v34 = vmax.f32 %v1383_v39, %v9638_v54  ;;  %v9639_v15 = vld [vmem:[#allocation145_spill] sm:$0xff]  ;;  %v9642_v8 = vld [vmem:[#allocation159_spill] sm:$0xff] }
 0x303   : > { %v1762_v7 = vmax.f32 %v1634_v61, %v9635_v33  ;;  %v1635_v62 = vmax.f32 %v1507_v47, %v9637_v1  ;;  %v1637_v51 = vmax.f32 %v1509_v6, %v9639_v15  ;;  %v1638_v17 = vmax.f32 %v1510_v26, %v9640_v50  ;;  %v9644_v60 = vld [vmem:[#allocation15_spill] sm:$0xff]  ;;  %v9645_v44 = vld [vmem:[#allocation146_spill] sm:$0xff]  ;;  %v9646_v40 = vld [vmem:[#allocation164_spill] sm:$0xff] }
 0x304   : > { %v1636_v43 = vmax.f32 %v1508_v45, %v9633_v10  ;;  %v1761_v23 = vmax.f32 %v1633_v55, %v9641_v13  ;;  %v9643_v45 = vld [vmem:[#allocation161_spill] sm:$0xff]  ;;  %v1639_v12 = vmax.f32 %v1511_v34, %v9646_v40  ;;  %v9647_v47 = vld [vmem:[#allocation168_spill] sm:$0xff]  ;;  %v9655_v34 = vld [vmem:[#allocation199_spill] sm:$0xff] }
 0x305   : > { %v7519_v20 = vpop.permute.xlu1 %1851  ;;  %v1890_v10 = vmax.f32 %v1762_v7, %v9643_v45  ;;  %v1763_v33 = vmax.f32 %v1635_v62, %v9645_v44  ;;  %v1765_v1 = vmax.f32 %v1637_v51, %v9647_v47  ;;  %v9648_v26 = vld [vmem:[#allocation180_spill] sm:$0xff]  ;;  %v9651_v7 = vld [vmem:[#allocation186_spill] sm:$0xff]  ;;  %v9653_v61 = vld [vmem:[#allocation173_spill] sm:$0xff] }
 0x306   : > { %v7521_v48 = vpop.permute.xlu0 %1969  ;;  %v1764_v4 = vmax.f32 %v1636_v43, %v9642_v8  ;;  %v1766_v54 = vmax.f32 %v1638_v17, %v9648_v26  ;;  %v9649_v13 = vld [vmem:[#allocation184_spill] sm:$0xff]  ;;  %v9650_v43 = vld [vmem:[#allocation185_spill] sm:$0xff]  ;;  %v9654_v44 = vld [vmem:[#allocation195_spill] sm:$0xff] }
 0x307   : > { %v1889_v15 = vmax.f32 %v1761_v23, %v9650_v43  ;;  %v2018_v50 = vmax.f32 %v1890_v10, %v9651_v7  ;;  %v9652_v8 = vld [vmem:[#allocation148_spill] sm:$0xff]  ;;  %v1891_v62 = vmax.f32 %v1763_v33, %v9653_v61  ;;  %v1767_v40 = vmax.f32 %v1639_v12, %v9654_v44  ;;  %v9658_v26 = vld [vmem:[#allocation218_spill] sm:$0xff] }
 0x308   : > { %v1892_v55 = vmax.f32 %v1764_v4, %v9649_v13  ;;  %v1512_v45 = vmax.f32 %v1384_v52, %v9652_v8  ;;  %v1893_v51 = vmax.f32 %v1765_v1, %v9655_v34  ;;  %v1894_v47 = vmax.f32 %v1766_v54, %v7133_v37  ;;  %v9657_v21 = vld [vmem:[#allocation216_spill] sm:$0xff]  ;;  %v9659_v13 = vld [vmem:[#allocation125_spill] sm:$0xff]  ;;  %v9664_v8 = vld [vmem:[#allocation206_spill] sm:$0xff] }
 0x309   : > { %v7549_v46 = vpop.permute.xlu1 %1961  ;;  %v2017_v14 = vmax.f32 %v1889_v15, %v9656_v9  ;;  %v2146_v4 = vmax.f32 %v2018_v50, %v9658_v26  ;;  %v1514_v23 = vmax.f32 %v1386_v53, %v9659_v13  ;;  %v9660_v43 = vld [vmem:[#allocation200_spill] sm:$0xff]  ;;  %v1895_v52 = vmax.f32 %v1767_v40, %v7189_v49  ;;  %v9661_v1 = vld [vmem:[#allocation177_spill] sm:$0xff] }
 0x30a   : > { %v7551_v41 = vpop.permute.xlu0 %2061  ;;  %v2020_v17 = vmax.f32 %v1892_v55, %v9657_v21  ;;  %v2019_v10 = vmax.f32 %v1891_v62, %v9660_v43  ;;  %v2021_v61 = vmax.f32 %v1893_v51, %v7205_v59  ;;  %v1640_v37 = vmax.f32 %v1512_v45, %v9661_v1  ;;  %v9662_v55 = vld [vmem:[#allocation127_spill] sm:$0xff]  ;;  %v9663_v7 = vld [vmem:[#allocation128_spill] sm:$0xff]  ;;  %v9675_v1 = vld [vmem:[#allocation149_spill] sm:$0xff] }
 0x30b   : > { %v2022_v9 = vmax.f32 %v1894_v47, %v7266_v38  ;;  %v2145_v21 = vmax.f32 %v2017_v14, %v7268_v16  ;;  %v1515_v53 = vmax.f32 %v1387_v32, %v9662_v55  ;;  %v2023_v49 = vmax.f32 %v1895_v52, %v7361_v36  ;;  %v9665_v45 = vld [vmem:[#allocation51_spill] sm:$0xff]  ;;  %v9667_v16 = vld [vmem:[#allocation133_spill] sm:$0xff]  ;;  %v9671_v13 = vld [vmem:[#allocation140_spill] sm:$0xff] }
 0x30c   : > { %v2148_v54 = vmax.f32 %v2020_v17, %v7315_v2  ;;  %v2147_v15 = vmax.f32 %v2019_v10, %v7207_v31  ;;  %v2149_v59 = vmax.f32 %v2021_v61, %v7394_v28  ;;  %v1513_v50 = vmax.f32 %v1385_v57, %v9663_v7  ;;  %v9666_v38 = vld [vmem:[#allocation131_spill] sm:$0xff]  ;;  %v9670_v57 = vld [vmem:[#allocation234_spill] sm:$0xff]  ;;  %v9673_v43 = vld [vmem:[#allocation144_spill] sm:$0xff] }
 0x30d   : > { %v7571_v39 = vpop.permute.xlu1 %1975  ;;  %v1768_v62 = vmax.f32 %v1640_v37, %v9664_v8  ;;  %v2630_v44 = vrot.slane %v2146_v4, 7  ;;  %v2150_v40 = vmax.f32 %v2022_v9, %v9665_v45  ;;  %v1516_v34 = vmax.f32 %v1388_v42, %v9666_v38  ;;  %v9668_v2 = vld [vmem:[#allocation135_spill] sm:$0xff]  ;;  %v9676_v9 = vld [vmem:[#allocation246_spill] sm:$0xff] }
 0x30e   : > { %v7573_v6 = vpop.permute.xlu0 %2085  ;;  %v1642_v14 = vmax.f32 %v1514_v23, %v9667_v16  ;;  %v1517_v51 = vmax.f32 %v1389_v22, %v9668_v2  ;;  %v2151_v32 = vmax.f32 %v2023_v49, %v7551_v41  ;;  %v9669_v28 = vld [vmem:[#allocation139_spill] sm:$0xff]  ;;  %v2634_v4 = vrot.slane %v2148_v54, 5  ;;  %v9679_v7 = vld [vmem:[#allocation154_spill] sm:$0xff] }
 0x30f   : > { %v1643_v47 = vmax.f32 %v1515_v53, %v9669_v28  ;;  %v1896_v17 = vmax.f32 %v1768_v62, %v9670_v57  ;;  %v2631_v26 = vsel %vm931_vm0, %v2630_v44, %v2145_v21  ;;  %v9672_v42 = vmax.f32 %v9419_v27, %v9629_v5  ;;  %v9674_v52 = vld [vmem:[#allocation147_spill] sm:$0xff]  ;;  %v9681_v44 = vld [vmem:[#allocation172_spill] sm:$0xff]  ;;  %v9685_v28 = vld [vmem:[#allocation198_spill] sm:$0xff] }
 0x310   : > { %v1641_v22 = vmax.f32 %v1513_v50, %v9673_v43  ;;  %v2632_v10 = vrot.slane %v2147_v15, 6  ;;  %v2636_v41 = vrot.slane %v2149_v59, 4  ;;  %v1644_v61 = vmax.f32 %v1516_v34, %v9674_v52  ;;  %v9677_v49 = vld [vmem:[#allocation151_spill] sm:$0xff]  ;;  %v9682_v34 = vld [vmem:[#allocation158_spill] sm:$0xff] }
 0x311   : > { %v7591_v33 = vpop.permute.xlu1 %2075  ;;  %v1518_v23 = vmax.f32 %v9672_v42, %v9671_v13  ;;  %v1770_v37 = vmax.f32 %v1642_v14, %v9675_v1  ;;  %v2024_v55 = vmax.f32 %v1896_v17, %v9676_v9  ;;  %v2638_v53 = vrot.slane %v2150_v40, 3  ;;  %v9680_v59 = vld [vmem:[#allocation171_spill] sm:$0xff]  ;;  %v9687_v42 = vld [vmem:[#allocation176_spill] sm:$0xff] }
 0x312   : > { %v7593_v12 = vpop.permute.xlu0 %1839  ;;  %v9678_v21 = vmax.f32 %v5958_v56, %v9628_v35  ;;  %v1645_v8 = vmax.f32 %v1517_v51, %v9679_v7  ;;  %v2633_v27 = vsel %vm933_vm1, %v2632_v10, %v2631_v26  ;;  %v2640_v5 = vrot.slane %v2151_v32, 2  ;;  %v9683_v14 = vld [vmem:[#allocation167_spill] sm:$0xff]  ;;  %v9684_v35 = vld [vmem:[#allocation170_spill] sm:$0xff] }
 0x313   : > { %v1769_v62 = vmax.f32 %v1641_v22, %v9680_v59  ;;  %v1898_v45 = vmax.f32 %v1770_v37, %v9681_v44  ;;  %v2635_v38 = vsel %vm935_vm2, %v2634_v4, %v2633_v27  ;;  %v1771_v16 = vmax.f32 %v1643_v47, %v9682_v34  ;;  %v9686_v57 = vld [vmem:[#allocation203_spill] sm:$0xff]  ;;  %v9691_v37 = vld [vmem:[#allocation228_spill] sm:$0xff] }
 0x314   : > { %v1519_v54 = vmax.f32 %v9678_v21, %v9677_v49  ;;  %v1646_v56 = vmax.f32 %v1518_v23, %v9683_v14  ;;  %v1772_v2 = vmax.f32 %v1644_v61, %v9684_v35  ;;  %v2637_v51 = vsel %vm937_vm3, %v2636_v41, %v2635_v38  ;;  %v9688_v22 = vld [vmem:[#allocation183_spill] sm:$0xff]  ;;  %v9690_v41 = vld [vmem:[#allocation194_spill] sm:$0xff]  ;;  %v9698_v44 = vld [vmem:[#allocation160_spill] sm:$0xff] }
 0x315   : > { %v7610_v31 = vpop.permute.xlu1 %2099  ;;  %v1897_v32 = vmax.f32 %v1769_v62, %v9685_v28  ;;  %v2026_v17 = vmax.f32 %v1898_v45, %v9686_v57  ;;  %v2639_v26 = vsel %vm939_vm4, %v2638_v53, %v2637_v51  ;;  %v1773_v4 = vmax.f32 %v1645_v8, %v9688_v22  ;;  %v9689_v10 = vld [vmem:[#allocation187_spill] sm:$0xff]  ;;  %v9695_v8 = vld [vmem:[#allocation209_spill] sm:$0xff]  ;;  %v9703_v51 = vld [vmem:[#allocation14_spill] sm:$0xff] }
 0x316   : > { %v7612_v36 = vpop.permute.xlu0 %1963  ;;  %v1647_v43 = vmax.f32 %v1519_v54, %v9687_v42  ;;  %v1899_v52 = vmax.f32 %v1771_v16, %v9689_v10  ;;  %v2641_v47 = vsel %vm941_vm5, %v2640_v5, %v2639_v26  ;;  %v1774_v1 = vmax.f32 %v1646_v56, %v9690_v41  ;;  %v9693_v21 = vld [vmem:[#allocation19_spill] sm:$0xff]  ;;  %v9694_v54 = vld [vmem:[#allocation33_spill] sm:$0xff]  ;;  %v9704_v28 = vld [vmem:[#allocation30_spill] sm:$0xff] }
 0x317   : > { %v2025_v9 = vmax.f32 %v1897_v32, %v9691_v37  ;;  %v1395_v7 = vmax.f32 %v9694_v54, %v9693_v21  ;;  %v9697_v5 = vld [vmem:[#allocation215_spill] sm:$0xff]  ;;  %v9699_v45 = vmax.f32 %v9411_v29, %v9644_v60  ;;  %v9701_v16 = vld [vmem:[#allocation225_spill] sm:$0xff]  ;;  %v1394_v32 = vmax.f32 %v9704_v28, %v9703_v51  ;;  %v9705_v57 = vld [vmem:[#allocation238_spill] sm:$0xff] }
 0x318   : > { %v1775_v27 = vmax.f32 %v1647_v43, %v9695_v8  ;;  %v2027_v62 = vmax.f32 %v1899_v52, %v9697_v5  ;;  %v1902_v14 = vmax.f32 %v1774_v1, %v9701_v16  ;;  %v9702_v56 = vld [vmem:[#allocation17_spill] sm:$0xff]  ;;  %v9707_v42 = vld [vmem:[#allocation116_spill] sm:$0xff]  ;;  %v9708_v29 = vld [vmem:[#allocation191_spill] sm:$0xff] }
 0x319   : > { %v7631_v50 = vpop.permute.xlu1 %1853  ;;  %v1520_v38 = vmax.f32 %v9699_v45, %v9698_v44  ;;  %v2153_v35 = vmax.f32 %v2025_v9, %v9702_v56  ;;  %v9706_v26 = vld [vmem:[#allocation241_spill] sm:$0xff]  ;;  %v9711_v1 = vld [vmem:[#allocation18_spill] sm:$0xff]  ;;  %v9712_v37 = vld [vmem:[#allocation39_spill] sm:$0xff] }
 0x31a   : > { %v2064_v15 = vpop.permute.xlu0 %2063  ;;  %v2155_v43 = vmax.f32 %v2027_v62, %v9707_v42  ;;  %v9709_v10 = vld [vmem:[#allocation229_spill] sm:$0xff]  ;;  %v1397_v9 = vmax.f32 %v9712_v37, %v9711_v1  ;;  %v9717_v5 = vld [vmem:[#allocation120_spill] sm:$0xff]  ;;  %v9725_v42 = vld [vmem:[#allocation46_spill] sm:$0xff] }
 0x31b   : > { %v2152_v40 = vmax.f32 %v2024_v55, %v2064_v15  ;;  %v9692_v55 = vld [vmem:[#allocation231_spill] sm:$0xff]  ;;  %v9696_v15 = vld [vmem:[#allocation212_spill] sm:$0xff]  ;;  %v1648_v60 = vmax.f32 %v1520_v38, %v9708_v29  ;;  %v9715_v54 = vld [vmem:[#allocation245_spill] sm:$0xff] }
 0x31c   : > { %v2154_v49 = vmax.f32 %v2026_v17, %v9692_v55  ;;  %v1901_v59 = vmax.f32 %v1773_v4, %v9696_v15  ;;  %v1903_v17 = vmax.f32 %v1775_v27, %v9705_v57  ;;  %v9713_v55 = vld [vmem:[#allocation21_spill] sm:$0xff]  ;;  %v9716_v15 = vld [vmem:[#allocation222_spill] sm:$0xff]  ;;  %v9718_v45 = vld [vmem:[#allocation20_spill] sm:$0xff]  ;;  %v2646_v56 = vrot.slane %v2155_v43, 6 }
 0x31d   : > { %v2642_v13 = vrot.slane %v2152_v40, 1  ;;  %v7647_v23 = vpop.permute.xlu1 %1977  ;;  %v9700_v40 = vld [vmem:[#allocation201_spill] sm:$0xff]  ;;  %v9719_v38 = vld [vmem:[#allocation44_spill] sm:$0xff]  ;;  %v9731_v43 = vld [vmem:[#allocation43_spill] sm:$0xff] }
 0x31e   : > { %v7649_v61 = vpop.permute.xlu0 %2081  ;;  %v1900_v34 = vmax.f32 %v1772_v2, %v9700_v40  ;;  %v2644_v52 = vrot.slane %v2154_v49, 7  ;;  %v2031_v8 = vmax.f32 %v1903_v17, %v9715_v54  ;;  %v1399_v40 = vmax.f32 %v9719_v38, %v9718_v45  ;;  %v9721_v16 = vld [vmem:[#allocation41_spill] sm:$0xff]  ;;  %v9723_v17 = vld [vmem:[#allocation32_spill] sm:$0xff]  ;;  %v9735_v38 = vld [vmem:[#allocation38_spill] sm:$0xff] }
 0x31f   : > { %v2643_v53 = vsel %vm943_vm6, %v2642_v13, %v2641_v47  ;;  %v2029_v13 = vmax.f32 %v1901_v59, %v9706_v26  ;;  %v9710_v47 = vld [vmem:[#allocation114_spill] sm:$0xff]  ;;  %v1776_v59 = vmax.f32 %v1648_v60, %v9716_v15  ;;  %v9726_v29 = vld [vmem:[#allocation29_spill] sm:$0xff]  ;;  %v9734_v54 = vld [vmem:[#allocation36_spill] sm:$0xff] }
 0x320   : > { %2686 = vrot.lane.b32.xlu1 %v2643_v53, %s5407_s8  ;;  %v2028_v2 = vmax.f32 %v1900_v34, %v9709_v10  ;;  %v2030_v41 = vmax.f32 %v1902_v14, %v9710_v47  ;;  %v9714_v53 = vld [vmem:[#allocation35_spill] sm:$0xff]  ;;  %v2645_v44 = vsel %vm931_vm0, %v2644_v52, %v2153_v35  ;;  %v9720_v34 = vld [vmem:[#allocation26_spill] sm:$0xff]  ;;  %v9729_v52 = vld [vmem:[#allocation28_spill] sm:$0xff] }
 0x321   : > { %v2078_v22 = vpop.permute.xlu1 %2077  ;;  %v1396_v21 = vmax.f32 %v9714_v53, %v9713_v55  ;;  %v2157_v27 = vmax.f32 %v2029_v13, %v7465_v19  ;;  %v1398_v14 = vmax.f32 %v9721_v16, %v9720_v34  ;;  %v9722_v19 = vld [vmem:[#allocation25_spill] sm:$0xff]  ;;  %v9724_v13 = vld [vmem:[#allocation27_spill] sm:$0xff]  ;;  %v2647_v37 = vsel %vm933_vm1, %v2646_v56, %v2645_v44  ;;  %v9741_v44 = vld [vmem:[#allocation134_spill] sm:$0xff] }
 0x322   : > { %v7673_v4 = vpop.permute.xlu0 %2101  ;;  %v2156_v62 = vmax.f32 %v2028_v2, %v9717_v5  ;;  %v2158_v49 = vmax.f32 %v2030_v41, %v7591_v33  ;;  %v2159_v51 = vmax.f32 %v2031_v8, %v2078_v22  ;;  %v1401_v26 = vmax.f32 %v9723_v17, %v9722_v19  ;;  %v9727_v33 = vld [vmem:[#allocation34_spill] sm:$0xff]  ;;  %v9728_v10 = vld [vmem:[#allocation11_spill] sm:$0xff]  ;;  %v9732_v22 = vld [vmem:[#allocation40_spill] sm:$0xff] }
 0x323   : > { %v1400_v35 = vmax.f32 %v9725_v42, %v9724_v13  ;;  %v1403_v60 = vmax.f32 %v9727_v33, %v9726_v29  ;;  %v1904_v2 = vmax.f32 %v1776_v59, %v9728_v10  ;;  %v9730_v47 = vld [vmem:[#allocation31_spill] sm:$0xff]  ;;  %v1405_v1 = vmax.f32 %v9732_v22, %v9731_v43  ;;  %v9733_v53 = vld [vmem:[#allocation37_spill] sm:$0xff]  ;;  %v9738_v19 = vld [vmem:[#allocation42_spill] sm:$0xff] }
 0x324   : > { %v1402_v41 = vmax.f32 %v9730_v47, %v9729_v52  ;;  %v2650_v55 = vrot.slane %v2157_v27, 4  ;;  %v1404_v8 = vmax.f32 %v9734_v54, %v9733_v53  ;;  %v2648_v15 = vrot.slane %v2156_v62, 5  ;;  %v9736_v34 = vld [vmem:[#allocation45_spill] sm:$0xff]  ;;  %v9737_v59 = vld [vmem:[#allocation123_spill] sm:$0xff]  ;;  %v9739_v13 = vld [vmem:[#allocation124_spill] sm:$0xff] }
 0x325   : > { %v7692_v28 = vpop.permute.xlu1 %2087  ;;  %v2032_v5 = vmax.f32 %v1904_v2, %v7486_v0  ;;  %v2652_v45 = vrot.slane %v2158_v49, 3  ;;  %v1407_v16 = vmax.f32 %v9736_v34, %v9735_v38  ;;  %v1406_v17 = vmax.f32 %v9738_v19, %v9737_v59  ;;  %v9740_v42 = vld [vmem:[#allocation47_spill] sm:$0xff]  ;;  %v9742_v52 = vld [vmem:[#allocation142_spill] sm:$0xff]  ;;  %v9746_v54 = vld [vmem:[#allocation152_spill] sm:$0xff] }
 0x326   : > { %v7694_v57 = vpop.permute.xlu0 %1965  ;;  %v1408_v29 = vmax.f32 %v9740_v42, %v9739_v13  ;;  %v2654_v33 = vrot.slane %v2159_v51, 2  ;;  %v1522_v56 = vmax.f32 %v1394_v32, %v9741_v44  ;;  %v1530_v62 = vmax.f32 %v1402_v41, %v9742_v52  ;;  %v9743_v2 = vld [vmem:[#allocation143_spill] sm:$0xff]  ;;  %v9744_v43 = vld [vmem:[#allocation150_spill] sm:$0xff]  ;;  %v9747_v34 = vld [vmem:[#allocation153_spill] sm:$0xff] }
 0x327   : > { %v2649_v0 = vsel %vm935_vm2, %v2648_v15, %v2647_v37  ;;  %v1523_v47 = vmax.f32 %v1395_v7, %v9743_v2  ;;  %v9745_v22 = vmax.f32 %v5880_v3, %v9636_v58  ;;  %v1531_v38 = vmax.f32 %v1403_v60, %v9746_v54  ;;  %v9748_v19 = vld [vmem:[#allocation157_spill] sm:$0xff]  ;;  %v9749_v37 = vld [vmem:[#allocation162_spill] sm:$0xff] }
 0x328   : > { %v2651_v51 = vsel %vm937_vm3, %v2650_v55, %v2649_v0  ;;  %v1524_v59 = vmax.f32 %v1396_v21, %v9747_v34  ;;  %v1650_v32 = vmax.f32 %v1522_v56, %v9748_v19  ;;  %v1529_v15 = vmax.f32 %v1401_v26, %v9749_v37  ;;  %v9751_v42 = vld [vmem:[#allocation165_spill] sm:$0xff]  ;;  %v9752_v55 = vld [vmem:[#allocation166_spill] sm:$0xff]  ;;  %v9760_v34 = vld [vmem:[#allocation188_spill] sm:$0xff] }
 0x329   : > { %v7717_v10 = vpop.permute.xlu1 %1855  ;;  %v1521_v53 = vmax.f32 %v9745_v22, %v9744_v43  ;;  %v2653_v41 = vsel %vm939_vm4, %v2652_v45, %v2651_v51  ;;  %v1651_v44 = vmax.f32 %v1523_v47, %v9752_v55  ;;  %v9753_v21 = vld [vmem:[#allocation169_spill] sm:$0xff]  ;;  %v9754_v56 = vld [vmem:[#allocation174_spill] sm:$0xff]  ;;  %v9757_v43 = vld [vmem:[#allocation179_spill] sm:$0xff]  ;;  %v1534_v47 = vmax.f32 %v1406_v17, %v9760_v34 }
 0x32a   : > { %v2080_v27 = vpop.permute.xlu0 %2079  ;;  %v2655_v3 = vsel %vm941_vm5, %v2654_v33, %v2653_v41  ;;  %v1658_v52 = vmax.f32 %v1530_v62, %v9753_v21  ;;  %v1533_v0 = vmax.f32 %v1405_v1, %v9754_v56  ;;  %v9756_v2 = vld [vmem:[#allocation178_spill] sm:$0xff]  ;;  %v9758_v22 = vld [vmem:[#allocation181_spill] sm:$0xff]  ;;  %v9763_v37 = vld [vmem:[#allocation192_spill] sm:$0xff] }
 0x32b   : > { %v2160_v49 = vmax.f32 %v2032_v5, %v2080_v27  ;;  %v9750_v5 = vld [vmem:[#allocation163_spill] sm:$0xff]  ;;  %v1532_v27 = vmax.f32 %v1404_v8, %v9751_v42  ;;  %v1649_v8 = vmax.f32 %v1521_v53, %v9757_v43  ;;  %v1659_v33 = vmax.f32 %v1531_v38, %v9758_v22  ;;  %v9759_v54 = vld [vmem:[#allocation182_spill] sm:$0xff]  ;;  %v9761_v19 = vld [vmem:[#allocation189_spill] sm:$0xff] }
 0x32c   : > { %v1525_v7 = vmax.f32 %v1397_v9, %v9750_v5  ;;  %v1652_v9 = vmax.f32 %v1524_v59, %v9756_v2  ;;  %v1778_v51 = vmax.f32 %v1650_v32, %v9759_v54  ;;  %v1527_v62 = vmax.f32 %v1399_v40, %v9761_v19  ;;  %v9762_v41 = vld [vmem:[#allocation190_spill] sm:$0xff]  ;;  %v9764_v5 = vld [vmem:[#allocation193_spill] sm:$0xff]  ;;  %v9765_v42 = vld [vmem:[#allocation196_spill] sm:$0xff] }
 0x32d   : > { %v2656_v13 = vrot.slane %v2160_v49, 1  ;;  %v7736_v58 = vpop.permute.xlu1 %1979  ;;  %v9755_v49 = vld [vmem:[#allocation175_spill] sm:$0xff]  ;;  %v1786_v59 = vmax.f32 %v1658_v52, %v9765_v42  ;;  %v9767_v21 = vld [vmem:[#allocation202_spill] sm:$0xff]  ;;  %v9768_v56 = vld [vmem:[#allocation204_spill] sm:$0xff] }
 0x32e   : > { %v7738_v60 = vpop.permute.xlu0 %2097  ;;  %v1526_v26 = vmax.f32 %v1398_v14, %v9755_v49  ;;  %v1653_v1 = vmax.f32 %v1525_v7, %v9762_v41  ;;  %v1657_v14 = vmax.f32 %v1529_v15, %v9764_v5  ;;  %v1528_v32 = vmax.f32 %v1400_v35, %v9767_v21  ;;  %v9770_v49 = vld [vmem:[#allocation207_spill] sm:$0xff]  ;;  %v9771_v2 = vld [vmem:[#allocation208_spill] sm:$0xff]  ;;  %v9772_v43 = vld [vmem:[#allocation210_spill] sm:$0xff] }
 0x32f   : > { %v2657_v45 = vsel %vm943_vm6, %v2656_v13, %v2655_v3  ;;  %v1660_v13 = vmax.f32 %v1532_v27, %v9763_v37  ;;  %v9766_v3 = vld [vmem:[#allocation197_spill] sm:$0xff]  ;;  %v1661_v7 = vmax.f32 %v1533_v0, %v9770_v49  ;;  %v1777_v27 = vmax.f32 %v1649_v8, %v9771_v2  ;;  %v9773_v22 = vld [vmem:[#allocation211_spill] sm:$0xff]  ;;  %v9774_v54 = vld [vmem:[#allocation214_spill] sm:$0xff] }
 0x330   : > { %2688 = vrot.lane.b32.xlu1 %v2657_v45, %s5407_s8  ;;  %v1779_v53 = vmax.f32 %v1651_v44, %v9766_v3  ;;  %v1654_v17 = vmax.f32 %v1526_v26, %v9768_v56  ;;  %v9769_v45 = vld [vmem:[#allocation205_spill] sm:$0xff]  ;;  %v1787_v15 = vmax.f32 %v1659_v33, %v9772_v43  ;;  %v1780_v52 = vmax.f32 %v1652_v9, %v9773_v22  ;;  %v9775_v34 = vld [vmem:[#allocation23_spill] sm:$0xff]  ;;  %v9778_v26 = vld [vmem:[#allocation220_spill] sm:$0xff] }
 0x331   : > { %v7757_v55 = vpop.permute.xlu1 %2089  ;;  %v1535_v40 = vmax.f32 %v1407_v16, %v9769_v45  ;;  %v1906_v44 = vmax.f32 %v1778_v51, %v9774_v54  ;;  %v9776_v19 = vld [vmem:[#allocation217_spill] sm:$0xff]  ;;  %v9777_v35 = vld [vmem:[#allocation219_spill] sm:$0xff]  ;;  %v1655_v5 = vmax.f32 %v1527_v62, %v9778_v26  ;;  %v9781_v8 = vld [vmem:[#allocation224_spill] sm:$0xff] }
 0x332   : > { %v7759_v38 = vpop.permute.xlu0 %1967  ;;  %v1536_v41 = vmax.f32 %v1408_v29, %v9776_v19  ;;  %v1662_v37 = vmax.f32 %v1534_v47, %v9777_v35  ;;  %v9779_v16 = vld [vmem:[#allocation221_spill] sm:$0xff]  ;;  %v9780_v0 = vld [vmem:[#allocation223_spill] sm:$0xff]  ;;  %v1785_v21 = vmax.f32 %v1657_v14, %v9781_v8  ;;  %v9782_v33 = vld [vmem:[#allocation226_spill] sm:$0xff] }
 0x333   : > { %v1781_v42 = vmax.f32 %v1653_v1, %v9779_v16  ;;  %v1788_v3 = vmax.f32 %v1660_v13, %v9780_v0  ;;  %v1914_v56 = vmax.f32 %v1786_v59, %v9782_v33  ;;  %v9783_v9 = vld [vmem:[#allocation227_spill] sm:$0xff]  ;;  %v9784_v2 = vld [vmem:[#allocation230_spill] sm:$0xff]  ;;  %v9785_v43 = vld [vmem:[#allocation232_spill] sm:$0xff] }
 0x334   : > { %2590 = vrot.lane.b32.xlu1 %v9775_v34, %s5409_s20  ;;  %v1907_v45 = vmax.f32 %v1779_v53, %v9783_v9  ;;  %v1656_v29 = vmax.f32 %v1528_v32, %v9784_v2  ;;  %v1782_v47 = vmax.f32 %v1654_v17, %v9785_v43  ;;  %v9786_v22 = vld [vmem:[#allocation233_spill] sm:$0xff]  ;;  %v9788_v34 = vld [vmem:[#allocation235_spill] sm:$0xff]  ;;  %v9789_v19 = vld [vmem:[#allocation236_spill] sm:$0xff] }
 0x335   : > { %v7779_v51 = vpop.permute.xlu1 %2103  ;;  %v1663_v62 = vmax.f32 %v1535_v40, %v9786_v22  ;;  %v9787_v54 = vld [vmem:[#allocation113_spill] sm:$0xff]  ;;  %v1789_v13 = vmax.f32 %v1661_v7, %v9788_v34  ;;  %v1905_v14 = vmax.f32 %v1777_v27, %v9789_v19  ;;  %v9790_v35 = vld [vmem:[#allocation239_spill] sm:$0xff]  ;;  %v9791_v26 = vld [vmem:[#allocation240_spill] sm:$0xff] }
 0x336   : > { %v7781_v49 = vpop.permute.xlu0 %2091  ;;  %v2034_v1 = vmax.f32 %v1906_v44, %v9787_v54  ;;  %v1915_v59 = vmax.f32 %v1787_v15, %v9790_v35  ;;  %v1908_v53 = vmax.f32 %v1780_v52, %v9791_v26  ;;  %v9792_v16 = vld [vmem:[#allocation237_spill] sm:$0xff]  ;;  %v9793_v0 = vld [vmem:[#allocation119_spill] sm:$0xff]  ;;  %v9794_v32 = vld [vmem:[#allocation112_spill] sm:$0xff] }
 0x337   : > { %v1783_v8 = vmax.f32 %v1655_v5, %v9793_v0  ;;  %v1664_v33 = vmax.f32 %v1536_v41, %v9794_v32  ;;  %v9795_v17 = vld [vmem:[#allocation115_spill] sm:$0xff]  ;;  %v9796_v40 = vld [vmem:[#allocation56_spill] sm:$0xff]  ;;  %v9798_v7 = vld [vmem:[#allocation121_spill] sm:$0xff] }
 0x338   : > { %2377 = vrot.lane.b32.xlu1 %v9792_v16, %s5409_s20  ;;  %v1790_v9 = vmax.f32 %v1662_v37, %v9795_v17  ;;  %v2162_v2 = vmax.f32 %v2034_v1, %v9796_v40  ;;  %v9797_v44 = vld [vmem:[#allocation24_spill] sm:$0xff]  ;;  %v1909_v22 = vmax.f32 %v1781_v42, %v9798_v7  ;;  %v9799_v27 = vld [vmem:[#allocation22_spill] sm:$0xff]  ;;  %v9801_v35 = vld [vmem:[#allocation117_spill] sm:$0xff] }
 0x339   : > { %v1913_v43 = vmax.f32 %v1785_v21, %v9797_v44  ;;  %v1916_v54 = vmax.f32 %v1788_v3, %v9799_v27  ;;  %v9800_v15 = vld [vmem:[#allocation8_spill] sm:$0xff]  ;;  %v1982_v52 = vpop.permute.xlu1 %1981  ;;  %v2042_v26 = vmax.f32 %v1914_v56, %v9801_v35  ;;  %v9803_v41 = vld [vmem:[#allocation242_spill] sm:$0xff]  ;;  %v9804_v37 = vld [vmem:[#allocation243_spill] sm:$0xff]  ;;  %v1792_v25 = vmax.f32 %v1664_v33, %v7484_v11 }
 0x33a   : > { %v2035_v34 = vmax.f32 %v1907_v45, %v9800_v15  ;;  %v7801_v19 = vpop.permute.xlu0 %1983  ;;  %v9802_v5 = vld [vmem:[#allocation16_spill] sm:$0xff]  ;;  %v1784_v0 = vmax.f32 %v1656_v29, %v9803_v41  ;;  %v1917_v32 = vmax.f32 %v1789_v13, %v9804_v37  ;;  %v9806_v21 = vld [vmem:[#allocation247_spill] sm:$0xff]  ;;  %v9807_v42 = vld [vmem:[#allocation49_spill] sm:$0xff]  ;;  %v2658_v45 = vrot.slane %v2162_v2, 7 }
 0x33b   : > { %v1791_v16 = vmax.f32 %v1663_v62, %v9802_v5  ;;  %v9805_v1 = vld [vmem:[#allocation244_spill] sm:$0xff]  ;;  %v2036_v40 = vmax.f32 %v1908_v53, %v9806_v21  ;;  %v2033_v44 = vmax.f32 %v1905_v14, %v9807_v42  ;;  %v9809_v27 = vld [vmem:[#allocation57_spill] sm:$0xff]  ;;  %v2041_v62 = vmax.f32 %v1913_v43, %v7521_v48 }
 0x33c   : > { %v1910_v17 = vmax.f32 %v1782_v47, %v9805_v1  ;;  %v9808_v3 = vld [vmem:[#allocation48_spill] sm:$0xff]  ;;  %v1911_v15 = vmax.f32 %v1783_v8, %v9809_v27  ;;  %v2163_v56 = vmax.f32 %v2035_v34, %v7573_v6  ;;  %v2037_v29 = vmax.f32 %v1909_v22, %v7549_v46  ;;  %v9810_v21 = vld [vmem:[#allocation73_spill] sm:$0xff] }
 0x33d   : > { %v2043_v7 = vmax.f32 %v1915_v59, %v9808_v3  ;;  %v2044_v13 = vmax.f32 %v1916_v54, %v7571_v39  ;;  %v2170_v47 = vmax.f32 %v2042_v26, %v7610_v31  ;;  %v2106_v53 = vpop.permute.xlu1 %2105  ;;  %v1918_v14 = vmax.f32 %v1790_v9, %v7519_v20 }
 0x33e   : > { %v2108_v35 = vpop.permute.xlu0 %2107  ;;  %v2038_v59 = vmax.f32 %v1910_v17, %v7612_v36  ;;  %v2161_v8 = vmax.f32 %v2033_v44, %v7649_v61  ;;  %v2164_v11 = vmax.f32 %v2036_v40, %v7692_v28  ;;  %v2045_v6 = vmax.f32 %v1917_v32, %v7647_v23 }
 0x33f   : > { %v2169_v48 = vmax.f32 %v2041_v62, %v7738_v60  ;;  %v2165_v46 = vmax.f32 %v2037_v29, %v7757_v55  ;;  %v2172_v39 = vmax.f32 %v2044_v13, %v7779_v51  ;;  %v2660_v33 = vrot.slane %v2163_v56, 6  ;;  %v9812_v56 = vld [vmem:[#allocation63_spill] sm:$0xff] }
 0x340   : > { %v2171_v31 = vmax.f32 %v2043_v7, %v7673_v4  ;;  %v2039_v2 = vmax.f32 %v1911_v15, %v7694_v57  ;;  %v2166_v20 = vmax.f32 %v2038_v59, %v7781_v49  ;;  %v1912_v36 = vmax.f32 %v1784_v0, %v7593_v12 }
 0x341   : > { %v2672_v61 = vrot.slane %v2170_v47, 7  ;;  %v1919_v28 = vmax.f32 %v1791_v16, %v7631_v50  ;;  %v2173_v9 = vmax.f32 %v2045_v6, %v2106_v53  ;;  %v2094_v23 = vpop.permute.xlu1 %2093  ;;  %v2659_v60 = vsel %vm931_vm0, %v2658_v45, %v2161_v8  ;;  %v9814_v8 = vld [vmem:[#allocation62_spill] sm:$0xff]  ;;  %v9815_v6 = vld [vmem:[#allocation52_spill] sm:$0xff] }
 0x342   : > { %v2110_v43 = vpop.permute.xlu0 %2109  ;;  %v2662_v55 = vrot.slane %v2164_v11, 5  ;;  %v2046_v51 = vmax.f32 %v1918_v14, %v7736_v58  ;;  %v2167_v22 = vmax.f32 %v2039_v2, %v2094_v23  ;;  %v2664_v54 = vrot.slane %v2165_v46, 4 }
 0x343   : > { %v2673_v4 = vsel %vm931_vm0, %v2672_v61, %v2169_v48  ;;  %v2676_v57 = vrot.slane %v2172_v39, 5  ;;  %v2047_v34 = vmax.f32 %v1919_v28, %v1982_v52  ;;  %v2674_v49 = vrot.slane %v2171_v31, 6  ;;  %v9816_v39 = vld [vmem:[#allocation74_spill] sm:$0xff]  ;;  %v9817_v31 = vld [vmem:[#allocation77_spill] sm:$0xff] }
 0x344   : > { %v2040_v12 = vmax.f32 %v1912_v36, %v7759_v38  ;;  %v2666_v26 = vrot.slane %v2166_v20, 3  ;;  %v2174_v5 = vmax.f32 %v2046_v51, %v2108_v35  ;;  %v2661_v50 = vsel %vm933_vm1, %v2660_v33, %v2659_v60  ;;  %v9811_v38 = vld [vmem:[#allocation75_spill] sm:$0xff]  ;;  %v9818_v28 = vld [vmem:[#allocation53_spill] sm:$0xff]  ;;  %v9821_v60 = vld [vmem:[#allocation58_spill] sm:$0xff] }
 0x345   : > { %v2678_v16 = vrot.slane %v2173_v9, 4  ;;  %v2668_v41 = vrot.slane %v2167_v22, 2  ;;  %v2175_v0 = vmax.f32 %v2047_v34, %v2110_v43  ;;  %v2096_v37 = vpop.permute.xlu1 %2095  ;;  %v2663_v58 = vsel %vm935_vm2, %v2662_v55, %v2661_v50  ;;  %v9819_v9 = vld [vmem:[#allocation59_spill] sm:$0xff]  ;;  %v9822_v22 = vld [vmem:[#allocation50_spill] sm:$0xff] }
 0x346   : > { %v7836_v32 = vpop.permute.xlu0 %2586  ;;  %v1920_v1 = vmax.f32 %v1792_v25, %v7717_v10  ;;  %v2675_v17 = vsel %vm933_vm1, %v2674_v49, %v2673_v4  ;;  %v2168_v52 = vmax.f32 %v2040_v12, %v2096_v37  ;;  %v443_v40 = vmul.f32 0.0078125, %v9810_v21  ;;  %v9824_v12 = vld [vmem:[#allocation122_spill] sm:$0xff]  ;;  %v9827_v37 = vld [vmem:[#allocation76_spill] sm:$0xff] }
 0x347   : > { %v445_v42 = vmul.f32 0.0078125, %v9811_v38  ;;  %v2665_v44 = vsel %vm937_vm3, %v2664_v54, %v2663_v58  ;;  %v2677_v3 = vsel %vm935_vm2, %v2676_v57, %v2675_v17  ;;  %v2680_v27 = vrot.slane %v2174_v5, 3  ;;  %v9826_v5 = vld [vmem:[#allocation9_spill] sm:$0xff]  ;;  %v9828_v17 = vld [vmem:[#allocation79_spill] sm:$0xff] }
 0x348   : > { %v2667_v7 = vsel %vm939_vm4, %v2666_v26, %v2665_v44  ;;  %v2048_v45 = vmax.f32 %v1920_v1, %v7801_v19  ;;  %v2670_v15 = vrot.slane %v2168_v52, 1  ;;  %v433_v62 = vmul.f32 0.0078125, %v9812_v56  ;;  %v9829_v56 = vld [vmem:[#allocation78_spill] sm:$0xff] }
 0x349   : > { %v2679_v25 = vsel %vm937_vm3, %v2678_v16, %v2677_v3  ;;  %v2669_v10 = vsel %vm941_vm5, %v2668_v41, %v2667_v7  ;;  %v2682_v29 = vrot.slane %v2175_v0, 2  ;;  %v2112_v13 = vpop.permute.xlu1 %2111  ;;  %v2264_v53 = vrot.slane %v7499_v30, %v7440_v63 }
 0x34a   : > { %v7850_v47 = vpop.permute.xlu0 %2588  ;;  %v9813_v35 = vrot.slane %v7481_v24, %v7440_v63  ;;  %v2176_v14 = vmax.f32 %v2048_v45, %v2112_v13  ;;  %v2671_v59 = vsel %vm943_vm6, %v2670_v15, %v2669_v10  ;;  %v434_v11 = vmul.f32 0.0078125, %v9814_v8 }
 0x34b   : > { %v2312_v48 = vrot.slane %v9815_v6, %v7440_v63  ;;  %v2308_v46 = vrot.slane %v443_v40, %v7440_v63  ;;  %v446_v33 = vmul.f32 0.0078125, %v9816_v39  ;;  %2690 = vrot.lane.b32.xlu1 %v2671_v59, %s5407_s8  ;;  %v2316_v30 = vrot.slane %v445_v42, %v7440_v63 }
 0x34c   : > { %v2347_v19 = vsel %vm937_vm3, %v9813_v35, %v7502_v18  ;;  %v447_v24 = vmul.f32 0.0078125, %v9817_v31  ;;  %v2681_v18 = vsel %vm939_vm4, %v2680_v27, %v2679_v25  ;;  %v2684_v2 = vrot.slane %v2176_v14, 1 }
 0x34d   : > { %v2268_v20 = vrot.slane %v433_v62, %v7440_v63  ;;  %v2683_v36 = vsel %vm941_vm5, %v2682_v29, %v2681_v18  ;;  %v9820_v23 = vrot.slane %v9819_v9, %v7440_v63  ;;  %v2240_v55 = vrot.slane %v9821_v60, %v7440_v63  ;;  %v2374_v38 = vpop.permute.xlu1 %2373 }
 0x34e   : > { %v2376_v61 = vpop.permute.xlu0 %2375  ;;  %v2348_v51 = vsel %vm939_vm4, %v2264_v53, %v2347_v19  ;;  %v9823_v4 = vrot.slane %v9822_v22, %v7440_v63  ;;  %v2685_v57 = vsel %vm943_vm6, %v2684_v2, %v2683_v36  ;;  %v2358_v34 = vsel %vm931_vm0, %v2312_v48, %v2308_v46 }
 0x34f   : > { %v2341_v43 = vsel %vm939_vm4, %v9820_v23, %v9818_v28  ;;  %v2320_v49 = vrot.slane %v446_v33, %v7440_v63  ;;  %2692 = vrot.lane.b32.xlu1 %v2685_v57, %s5407_s8  ;;  %v9825_v26 = vsub.s32 1, %v9824_v12  ;;  %v2904_v16 = vsub.s32 2, %v9824_v12 }
 0x350   : > { %v2342_v54 = vsel %vm941_vm5, %v9823_v4, %v2341_v43  ;;  %v2272_v41 = vrot.slane %v434_v11, %v7440_v63  ;;  %v2359_v0 = vsel %vm933_vm1, %v2316_v30, %v2358_v34  ;;  %v448_v58 = vmul.f32 0.0078125, %v9827_v37 }
 0x351   : > { %v2898_v50 = vrot.slane %v9826_v5, %v9825_v26  ;;  %v2324_v1 = vrot.slane %v447_v24, %v7440_v63  ;;  %v449_v52 = vmul.f32 0.0078125, %v9828_v17  ;;  %v2349_v21 = vsel %vm941_vm5, %v2268_v20, %v2348_v51 }
 0x352   : > { %v7897_v40 = vpop.permute.xlu0 %2718  ;;  %v2360_v42 = vsel %vm935_vm2, %v2320_v49, %v2359_v0  ;;  %v2343_v44 = vsel %vm943_vm6, %v2240_v55, %v2342_v54  ;;  %v2905_v3 = vrot.slane %v9826_v5, %v2904_v16  ;;  %v2911_v7 = vsub.s32 3, %v9824_v12 }
 0x353   : > { %2900 = vbcast.lane.b32.xlu1 %v2898_v50, 256  ;;  %v2328_v45 = vrot.slane %v448_v58, %v7440_v63  ;;  %v2361_v27 = vsel %vm937_vm3, %v2324_v1, %v2360_v42  ;;  %v2350_v15 = vsel %vm943_vm6, %v2272_v41, %v2349_v21  ;;  %v450_v62 = vmul.f32 0.0078125, %v9829_v56  ;;  %v9830_v1 = vld [vmem:[#allocation64_spill] sm:$0xff] }
 0x354   : > { %v2332_v25 = vrot.slane %v449_v52, %v7440_v63  ;;  %v2387_v10 = vsel %vm2385_vm15, %v2350_v15, %v2376_v61  ;;  %v2386_v29 = vsel %vm2385_vm15, %v2343_v44, %v2374_v38  ;;  %v2912_v19 = vrot.slane %v9826_v5, %v2911_v7  ;;  %v9831_v52 = vld [vmem:[#allocation65_spill] sm:$0xff]  ;;  %v9832_v38 = vld [vmem:[#allocation67_spill] sm:$0xff] }
 0x355   : > { %v2721_v53 = vmul.f32 %v7897_v40, %v2386_v29  ;;  %v2723_v35 = vmul.f32 %v7897_v40, %v2387_v10  ;;  %v2925_v14 = vsub.s32 5, %v9824_v12  ;;  %v2362_v59 = vsel %vm939_vm4, %v2328_v45, %v2361_v27 }
 0x356   : > { %v7910_v13 = vpop.permute.xlu0 %2711  ;;  %v2336_v8 = vrot.slane %v450_v62, %v7440_v63  ;;  %v2363_v6 = vsel %vm941_vm5, %v2332_v25, %v2362_v59  ;;  %v2939_v31 = vsub.s32 7, %v9824_v12  ;;  %v436_v17 = vmul.f32 0.0078125, %v9830_v1  ;;  %v9841_v1 = vld [vmem:[#allocation71_spill] sm:$0xff] }
 0x357   : > { %2907 = vbcast.lane.b32.xlu1 %v2905_v3, 256  ;;  %v2744_v48 = vsel %vm2736_vm8, %v2721_v53, 0.0  ;;  %v2758_v46 = vsel %vm2736_vm8, %v2723_v35, 0.0  ;;  %v2720_v39 = vmul.f32 %v7910_v13, %v2386_v29  ;;  %v2722_v33 = vmul.f32 %v7910_v13, %v2387_v10  ;;  %v9833_v29 = vld [vmem:[#allocation66_spill] sm:$0xff] }
 0x358   : > { %v2926_v30 = vrot.slane %v9826_v5, %v2925_v14  ;;  %v2745_v24 = vrot.slane %v2744_v48, 4  ;;  %v2759_v18 = vrot.slane %v2758_v46, 4  ;;  %v2364_v2 = vsel %vm943_vm6, %v2336_v8, %v2363_v6 }
 0x359   : > { %v2737_v36 = vsel %vm2736_vm8, %v2720_v39, 0.0  ;;  %v2751_v61 = vsel %vm2736_vm8, %v2722_v33, 0.0  ;;  %v2940_v9 = vrot.slane %v9826_v5, %v2939_v31  ;;  %v435_v21 = vmul.f32 0.0078125, %v9831_v52  ;;  %v9842_v52 = vld [vmem:[#allocation91_spill] sm:$0xff] }
 0x35a   : > { %v7918_v11 = vpop.permute.xlu0 %2592  ;;  %v2746_v43 = vadd.f32 %v2745_v24, %v2744_v48  ;;  %v2760_v60 = vadd.f32 %v2759_v18, %v2758_v46  ;;  %v2738_v55 = vrot.slane %v2737_v36, 4  ;;  %v2752_v51 = vrot.slane %v2751_v61, 4  ;;  %v9834_v48 = vld [vmem:[#allocation69_spill] sm:$0xff]  ;;  %v9835_v18 = vld [vmem:[#allocation68_spill] sm:$0xff] }
 0x35b   : > { %2914 = vbcast.lane.b32.xlu1 %v2912_v19, 256  ;;  %v437_v42 = vmul.f32 0.0078125, %v9832_v38  ;;  %v2280_v62 = vrot.slane %v436_v17, %v7440_v63  ;;  %v2276_v10 = vrot.slane %v435_v21, %v7440_v63  ;;  %v438_v53 = vmul.f32 0.0078125, %v9833_v29  ;;  %v9845_v29 = vld [vmem:[#allocation85_spill] sm:$0xff] }
 0x35c   : > { %v2747_v57 = vrot.slane %v2746_v43, 2  ;;  %v2761_v34 = vrot.slane %v2760_v60, 2  ;;  %v2739_v49 = vadd.f32 %v2738_v55, %v2737_v36  ;;  %v2753_v26 = vadd.f32 %v2752_v51, %v2751_v61  ;;  %v9837_v55 = vld [vmem:[#allocation81_spill] sm:$0xff] }
 0x35d   : > { %v2284_v35 = vrot.slane %v437_v42, %v7440_v63  ;;  %v439_v46 = vmul.f32 0.0078125, %v9834_v48  ;;  %v2351_v31 = vsel %vm931_vm0, %v2280_v62, %v2276_v10  ;;  %v2288_v24 = vrot.slane %v438_v53, %v7440_v63 }
 0x35e   : > { %v2380_v20 = vpop.permute.xlu0 %2379  ;;  %v2748_v5 = vadd.f32 %v2747_v57, %v2746_v43  ;;  %v2762_v41 = vadd.f32 %v2761_v34, %v2760_v60  ;;  %v2740_v0 = vrot.slane %v2739_v49, 2  ;;  %v2754_v37 = vrot.slane %v2753_v26, 2  ;;  %v9836_v43 = vld [vmem:[#allocation80_spill] sm:$0xff]  ;;  %v9838_v34 = vld [vmem:[#allocation83_spill] sm:$0xff] }
 0x35f   : > { %v2389_v28 = vsel %vm2385_vm15, %v2364_v2, %v2380_v20  ;;  %2928 = vbcast.lane.b32.xlu1 %v2926_v30, 256  ;;  %v440_v2 = vmul.f32 0.0078125, %v9835_v18  ;;  %v2352_v36 = vsel %vm933_vm1, %v2284_v35, %v2351_v31  ;;  %v2429_v60 = vrot.slane %v9836_v43, %v7440_v63 }
 0x360   : > { %v2727_v23 = vmul.f32 %v7897_v40, %v2389_v28  ;;  %v2726_v4 = vmul.f32 %v7910_v13, %v2389_v28  ;;  %v2749_v7 = vrot.slane %v2748_v5, 1  ;;  %v2763_v45 = vrot.slane %v2762_v41, 1 }
 0x361   : > { %v2741_v27 = vadd.f32 %v2740_v0, %v2739_v49  ;;  %v2755_v15 = vadd.f32 %v2754_v37, %v2753_v26  ;;  %v2425_v51 = vrot.slane %v9837_v55, %v7440_v63  ;;  %v2353_v57 = vsel %vm935_vm2, %v2288_v24, %v2352_v36 }
 0x362   : > { %v2786_v22 = vsel %vm2736_vm8, %v2727_v23, 0.0  ;;  %v2779_v50 = vsel %vm2736_vm8, %v2726_v4, 0.0  ;;  %v2750_v14 = vadd.f32 %v2749_v7, %v2748_v5  ;;  %v2764_v59 = vadd.f32 %v2763_v45, %v2762_v41  ;;  %v9840_v5 = vld [vmem:[#allocation89_spill] sm:$0xff]  ;;  %v9843_v7 = vld [vmem:[#allocation82_spill] sm:$0xff] }
 0x363   : > { %2942 = vbcast.lane.b32.xlu1 %v2940_v9, 256  ;;  %v2787_v54 = vrot.slane %v2786_v22, 4  ;;  %v2780_v58 = vrot.slane %v2779_v50, 4  ;;  %v2742_v8 = vrot.slane %v2741_v27, 1  ;;  %v2756_v6 = vrot.slane %v2755_v15, 1 }
 0x364   : > { %v2292_v9 = vrot.slane %v439_v46, %v7440_v63  ;;  %v2433_v49 = vrot.slane %v9838_v34, %v7440_v63  ;;  %v2457_v41 = vrot.slane %v9840_v5, %v7440_v63  ;;  %v441_v17 = vmul.f32 0.0078125, %v9841_v1  ;;  %v9847_v46 = vld [vmem:[#allocation93_spill] sm:$0xff]  ;;  %v9853_v5 = vld [vmem:[#allocation99_spill] sm:$0xff] }
 0x365   : > { %v2788_v16 = vadd.f32 %v2787_v54, %v2786_v22  ;;  %v2781_v56 = vadd.f32 %v2780_v58, %v2779_v50  ;;  %v2743_v61 = vadd.f32 %v2742_v8, %v2741_v27  ;;  %v2757_v28 = vadd.f32 %v2756_v6, %v2755_v15  ;;  %v9839_v50 = vld [vmem:[#allocation88_spill] sm:$0xff] }
 0x366   : > { %v2296_v54 = vrot.slane %v440_v2, %v7440_v63  ;;  %v2354_v58 = vsel %vm937_vm3, %v2292_v9, %v2353_v57  ;;  %v2465_v21 = vrot.slane %v9842_v52, %v7440_v63  ;;  %v2437_v45 = vrot.slane %v9843_v7, %v7440_v63  ;;  %v9854_v52 = vld [vmem:[#allocation86_spill] sm:$0xff] }
 0x367   : > { %v2789_v44 = vrot.slane %v2788_v16, 2  ;;  %v7939_v3 = vpop.permute.xlu0 %2851  ;;  %v2782_v39 = vrot.slane %v2781_v56, 2  ;;  %v2441_v53 = vrot.slane %v9845_v29, %v7440_v63  ;;  %v2300_v31 = vrot.slane %v441_v17, %v7440_v63  ;;  %v9856_v29 = vld [vmem:[#allocation95_spill] sm:$0xff] }
 0x368   : > { %v7943_v25 = vrot.slane %v7939_v3, 1  ;;  %v2856_v0 = vadd.f32 %v7939_v3, %v2743_v61  ;;  %v2858_v37 = vadd.f32 %v7939_v3, %v2757_v28  ;;  %v9849_v28 = vld [vmem:[#allocation87_spill] sm:$0xff] }
 0x369   : > { %v2790_v19 = vadd.f32 %v2789_v44, %v2788_v16  ;;  %v2783_v23 = vadd.f32 %v2782_v39, %v2781_v56  ;;  %v2461_v16 = vrot.slane %v9839_v50, %v7440_v63  ;;  %v2550_v44 = vsel %vm931_vm0, %v2429_v60, %v2425_v51  ;;  %v9844_v56 = vld [vmem:[#allocation70_spill] sm:$0xff]  ;;  %v9850_v60 = vld [vmem:[#allocation92_spill] sm:$0xff] }
 0x36a   : > { %v2857_v33 = vadd.f32 %v7943_v25, %v2750_v14  ;;  %v2859_v30 = vadd.f32 %v7943_v25, %v2764_v59  ;;  %v7980_v62 = vmul.f32 0.0078125, %v9844_v56  ;;  %v2551_v10 = vsel %vm933_vm1, %v2433_v49, %v2550_v44  ;;  %v9846_v14 = vld [vmem:[#allocation90_spill] sm:$0xff] }
 0x36b   : > { %v2791_v20 = vrot.slane %v2790_v19, 1  ;;  %v2784_v38 = vrot.slane %v2783_v23, 1  ;;  %v7974_v42 = vpop.permute.xlu0 %2893  ;;  %v2469_v59 = vrot.slane %v9846_v14, %v7440_v63  ;;  %v2872_v8 = vmax.f32 %v2856_v0, 0.0 }
 0x36c   : > { %v2873_v22 = vmax.f32 %v2857_v33, 0.0  ;;  %v2875_v4 = vmax.f32 %v2859_v30, 0.0  ;;  %v2874_v6 = vmax.f32 %v2858_v37, 0.0  ;;  %v2473_v39 = vrot.slane %v9847_v46, %v7440_v63 }
 0x36d   : > { %v2792_v26 = vadd.f32 %v2791_v20, %v2790_v19  ;;  %v2557_v19 = vsel %vm931_vm0, %v2461_v16, %v2457_v41  ;;  %v2785_v33 = vadd.f32 %v2784_v38, %v2783_v23  ;;  %v2355_v30 = vsel %vm939_vm4, %v2296_v54, %v2354_v58  ;;  %v9848_v20 = vld [vmem:[#allocation84_spill] sm:$0xff]  ;;  %v9852_v54 = vld [vmem:[#allocation97_spill] sm:$0xff] }
 0x36e   : > { %v2960_v27 = vrot.slane %v2873_v22, 7  ;;  %v2962_v15 = vrot.slane %v2875_v4, 7  ;;  %v2558_v48 = vsel %vm933_vm1, %v2465_v21, %v2557_v19  ;;  %v2552_v24 = vsel %vm935_vm2, %v2437_v45, %v2551_v10  ;;  %v9851_v22 = vld [vmem:[#allocation96_spill] sm:$0xff]  ;;  %v9855_v45 = vld [vmem:[#allocation98_spill] sm:$0xff]  ;;  %v9857_v19 = vld [vmem:[#allocation101_spill] sm:$0xff] }
 0x36f   : > { %v2863_v35 = vadd.f32 %v7943_v25, %v2792_v26  ;;  %v2445_v36 = vrot.slane %v9848_v20, %v7440_v63  ;;  %v2553_v61 = vsel %vm937_vm3, %v2441_v53, %v2552_v24  ;;  %v2449_v9 = vrot.slane %v9849_v28, %v7440_v63  ;;  %v8006_v43 = vpop.permute.xlu0 %2921 }
 0x370   : > { %v7996_v18 = vsel %vm931_vm0, %v2960_v27, %v2872_v8  ;;  %v7999_v2 = vsel %vm931_vm0, %v2962_v15, %v2874_v6  ;;  %v2477_v55 = vrot.slane %v9850_v60, %v7440_v63  ;;  %v2559_v51 = vsel %vm935_vm2, %v2469_v59, %v2558_v48  ;;  %v9858_v8 = vld [vmem:[#allocation104_spill] sm:$0xff]  ;;  %v9859_v48 = vld [vmem:[#allocation105_spill] sm:$0xff] }
 0x371   : > { %v2879_v23 = vmax.f32 %v2863_v35, 0.0  ;;  %v2493_v4 = vrot.slane %v9851_v22, %v7440_v63  ;;  %v2489_v57 = vrot.slane %v9852_v54, %v7440_v63  ;;  %v2560_v34 = vsel %vm937_vm3, %v2473_v39, %v2559_v51 }
 0x372   : > { %v2862_v49 = vadd.f32 %v7939_v3, %v2785_v33  ;;  %v2984_v26 = vmul.f32 %v7996_v18, %v7974_v42  ;;  %v2992_v50 = vmul.f32 %v7999_v2, %v7974_v42  ;;  %v2304_v16 = vrot.slane %v7980_v62, %v7440_v63 }
 0x373   : > { %v2497_v41 = vrot.slane %v9853_v5, %v7440_v63  ;;  %v2988_v0 = vmul.f32 %v7996_v18, %v8006_v43  ;;  %v2554_v37 = vsel %vm939_vm4, %v2445_v36, %v2553_v61  ;;  %v2966_v58 = vrot.slane %v2879_v23, 7  ;;  %v8040_v10 = vpop.permute.xlu0 %2935  ;;  %v9861_v61 = vld [vmem:[#allocation94_spill] sm:$0xff] }
 0x374   : > { %v2996_v1 = vmul.f32 %v7999_v2, %v8006_v43  ;;  %v2356_v17 = vsel %vm941_vm5, %v2300_v31, %v2355_v30  ;;  %v2453_v21 = vrot.slane %v9854_v52, %v7440_v63  ;;  %v2564_v38 = vsel %vm931_vm0, %v2493_v4, %v2489_v57  ;;  %v9860_v30 = vld [vmem:[#allocation107_spill] sm:$0xff] }
 0x375   : > { %v2555_v44 = vsel %vm941_vm5, %v2449_v9, %v2554_v37  ;;  %v2561_v7 = vsel %vm939_vm4, %v2477_v55, %v2560_v34  ;;  %v2501_v27 = vrot.slane %v9855_v45, %v7440_v63  ;;  %v2878_v15 = vmax.f32 %v2862_v49, 0.0  ;;  %v9862_v9 = vld [vmem:[#allocation100_spill] sm:$0xff]  ;;  %v9863_v34 = vld [vmem:[#allocation106_spill] sm:$0xff] }
 0x376   : > { %v3049_v56 = vsel %vm3048_vm9, %v2984_v26, 0.0  ;;  %v3105_v62 = vsel %vm3048_vm9, %v2992_v50, 0.0  ;;  %v2481_v53 = vrot.slane %v9856_v29, %v7440_v63  ;;  %v2565_v35 = vsel %vm933_vm1, %v2497_v41, %v2564_v38 }
 0x377   : > { %v2505_v14 = vrot.slane %v9857_v19, %v7440_v63  ;;  %v3077_v59 = vsel %vm3048_vm9, %v2988_v0, 0.0  ;;  %v2525_v6 = vrot.slane %v9858_v8, %v7440_v63  ;;  %v2521_v46 = vrot.slane %v9859_v48, %v7440_v63 }
 0x378   : > { %v8053_v39 = vsel %vm931_vm0, %v2966_v58, %v2878_v15  ;;  %v3133_v33 = vsel %vm3048_vm9, %v2996_v1, 0.0  ;;  %v2529_v31 = vrot.slane %v9860_v30, %v7440_v63  ;;  %v3050_v24 = vrot.slane %v3049_v56, 4 }
 0x379   : > { %v3106_v20 = vrot.slane %v3105_v62, 4  ;;  %v2990_v36 = vmul.f32 %v7996_v18, %v8040_v10  ;;  %v2485_v28 = vrot.slane %v9861_v61, %v7440_v63  ;;  %v2509_v23 = vrot.slane %v9862_v9, %v7440_v63 }
 0x37a   : > { %v2566_v60 = vsel %vm935_vm2, %v2501_v27, %v2565_v35  ;;  %v3078_v55 = vrot.slane %v3077_v59, 4  ;;  %v2562_v22 = vsel %vm941_vm5, %v2481_v53, %v2561_v7  ;;  %v3008_v4 = vmul.f32 %v8053_v39, %v7974_v42  ;;  %v9864_v7 = vld [vmem:[#allocation102_spill] sm:$0xff]  ;;  %v9867_v53 = vld [vmem:[#allocation108_spill] sm:$0xff] }
 0x37b   : > { %v2567_v51 = vsel %vm937_vm3, %v2505_v14, %v2566_v60  ;;  %v3134_v54 = vrot.slane %v3133_v33, 4  ;;  %v2571_v57 = vsel %vm931_vm0, %v2525_v6, %v2521_v46  ;;  %v2533_v49 = vrot.slane %v9863_v34, %v7440_v63 }
 0x37c   : > { %v3012_v26 = vmul.f32 %v8053_v39, %v8006_v43  ;;  %v8075_v50 = vsel %vm943_vm6, %v2304_v16, %v2356_v17  ;;  %v2572_v5 = vsel %vm933_vm1, %v2529_v31, %v2571_v57  ;;  %v3051_v41 = vadd.f32 %v3050_v24, %v3049_v56  ;;  %v9865_v16 = vld [vmem:[#allocation103_spill] sm:$0xff] }
 0x37d   : > { %v3107_v0 = vadd.f32 %v3106_v20, %v3105_v62  ;;  %v3091_v37 = vsel %vm3048_vm9, %v2990_v36, 0.0  ;;  %v2556_v58 = vsel %vm943_vm6, %v2453_v21, %v2555_v44  ;;  %v8081_v1 = vsel %vm943_vm6, %v2485_v28, %v2562_v22  ;;  %v9866_v62 = vld [vmem:[#allocation109_spill] sm:$0xff] }
 0x37e   : > { %v3079_v52 = vadd.f32 %v3078_v55, %v3077_v59  ;;  %v2568_v38 = vsel %vm939_vm4, %v2509_v23, %v2567_v51  ;;  %v2517_v45 = vrot.slane %v9864_v7, %v7440_v63  ;;  %v2513_v17 = vrot.slane %v9865_v16, %v7440_v63 }
 0x37f   : > { %v3217_v27 = vsel %vm3048_vm9, %v3008_v4, 0.0  ;;  %v3135_v15 = vadd.f32 %v3134_v54, %v3133_v33  ;;  %v2573_v56 = vsel %vm935_vm2, %v2533_v49, %v2572_v5  ;;  %v2537_v21 = vrot.slane %v9866_v62, %v7440_v63 }
 0x380   : > { %v3245_v44 = vsel %vm3048_vm9, %v3012_v26, 0.0  ;;  %v3092_v29 = vrot.slane %v3091_v37, 4  ;;  %v2541_v35 = vrot.slane %v9867_v53, %v7440_v63  ;;  %v2698_v19 = vsel %vm2385_vm15, %v2556_v58, %v7836_v32  ;;  %v9868_v32 = vld [vmem:[#allocation111_spill] sm:$0xff] }
 0x381   : > { %v3052_v14 = vrot.slane %v3051_v41, 2  ;;  %v3108_v59 = vrot.slane %v3107_v0, 2  ;;  %v3218_v6 = vrot.slane %v3217_v27, 4  ;;  %v3080_v48 = vrot.slane %v3079_v52, 2 }
 0x382   : > { %v2998_v46 = vmul.f32 %v7999_v2, %v8040_v10  ;;  %v3136_v30 = vrot.slane %v3135_v15, 2  ;;  %v3246_v31 = vrot.slane %v3245_v44, 4  ;;  %v2574_v36 = vsel %vm937_vm3, %v2537_v21, %v2573_v56 }
 0x383   : > { %v2545_v61 = vrot.slane %v9868_v32, %v7440_v63  ;;  %v3093_v28 = vadd.f32 %v3092_v29, %v3091_v37  ;;  %v2569_v9 = vsel %vm941_vm5, %v2513_v17, %v2568_v38  ;;  %v3053_v23 = vadd.f32 %v3052_v14, %v3051_v41  ;;  %v9869_v38 = vld [vmem:[#allocation110_spill] sm:$0xff] }
 0x384   : > { %v3109_v60 = vadd.f32 %v3108_v59, %v3107_v0  ;;  %v3219_v22 = vadd.f32 %v3218_v6, %v3217_v27  ;;  %v3147_v4 = vsel %vm3048_vm9, %v2998_v46, 0.0  ;;  %v2575_v34 = vsel %vm939_vm4, %v2541_v35, %v2574_v36 }
 0x385   : > { %v3081_v49 = vadd.f32 %v3080_v48, %v3079_v52  ;;  %v3137_v26 = vadd.f32 %v3136_v30, %v3135_v15  ;;  %v3247_v5 = vadd.f32 %v3246_v31, %v3245_v44  ;;  %v3014_v37 = vmul.f32 %v8053_v39, %v8040_v10  ;;  %v8123_v30 = vpop.permute.xlu0 %3499 }
 0x386   : > { %v3094_v58 = vrot.slane %v3093_v28, 2  ;;  %v2549_v7 = vrot.slane %v9869_v38, %v7440_v63  ;;  %v3054_v16 = vrot.slane %v3053_v23, 1  ;;  %v3110_v17 = vrot.slane %v3109_v60, 1 }
 0x387   : > { %v3148_v27 = vrot.slane %v3147_v4, 4  ;;  %v2576_v56 = vsel %vm941_vm5, %v2545_v61, %v2575_v34  ;;  %v3220_v62 = vrot.slane %v3219_v22, 2  ;;  %v3082_v52 = vrot.slane %v3081_v49, 1 }
 0x388   : > { %v3138_v15 = vrot.slane %v3137_v26, 1  ;;  %v3248_v44 = vrot.slane %v3247_v5, 2  ;;  %v8116_v53 = vsel %vm943_vm6, %v2517_v45, %v2569_v9  ;;  %v3095_v35 = vadd.f32 %v3094_v58, %v3093_v28 }
 0x389   : > { %v2577_v63 = vsel %vm943_vm6, %v2549_v7, %v2576_v56  ;;  %v3111_v6 = vadd.f32 %v3110_v17, %v3109_v60  ;;  %v3149_v48 = vadd.f32 %v3148_v27, %v3147_v4  ;;  %v2699_v46 = vsel %vm2385_vm15, %v8081_v1, %v7850_v47 }
 0x38a   : > { %v3249_v36 = vadd.f32 %v3248_v44, %v3247_v5  ;;  %v3139_v61 = vadd.f32 %v3138_v15, %v3137_v26  ;;  %v3096_v28 = vrot.slane %v3095_v35, 1  ;;  %v8144_v58 = vrot.slane %v8123_v30, 1 }
 0x38b   : > { %v3150_v60 = vrot.slane %v3149_v48, 2  ;;  %v8154_v17 = vrot.slane %v8123_v30, 3  ;;  %v8159_v44 = vrot.slane %v8123_v30, 6 }
 0x38c   : > { %v3097_v5 = vadd.f32 %v3096_v28, %v3095_v35 }
 0x392   : > { %v2687_v8 = vpop.permute.xlu1 %2686 }
 0x393   : > { %v2702_v33 = vsel %vm1119_vm7, %v2698_v19, %v2687_v8  ;;  %v3259_v19 = vsel %vm3048_vm9, %v3014_v37, 0.0  ;;  %v3055_v8 = vadd.f32 %v3054_v16, %v3053_v23 }
 0x394   : > { %v2728_v24 = vmul.f32 %v7910_v13, %v2702_v33  ;;  %v2729_v20 = vmul.f32 %v7897_v40, %v2702_v33  ;;  %v3221_v33 = vadd.f32 %v3220_v62, %v3219_v22  ;;  %v3260_v32 = vrot.slane %v3259_v19, 4 }
 0x395   : > { %v8133_v47 = vadd.f32 %v8123_v30, %v3055_v8 }
 0x396   : > { %v2793_v55 = vsel %vm2736_vm8, %v2728_v24, 0.0  ;;  %v2800_v51 = vsel %vm2736_vm8, %v2729_v20, 0.0  ;;  %v8127_v24 = vsel %vm2385_vm15, %v2577_v63, %v7918_v11  ;;  %v3083_v20 = vadd.f32 %v3082_v52, %v3081_v49 }
 0x397   : > { %v2794_v54 = vrot.slane %v2793_v55, 4  ;;  %v2801_v57 = vrot.slane %v2800_v51, 4  ;;  %v3222_v11 = vrot.slane %v3221_v33, 1  ;;  %v3261_v34 = vadd.f32 %v3260_v32, %v3259_v19 }
 0x399   : > { %v2795_v41 = vadd.f32 %v2794_v54, %v2793_v55  ;;  %v2802_v0 = vadd.f32 %v2801_v57, %v2800_v51  ;;  %v8130_v55 = vrot.slane %v8123_v30, 4  ;;  %v8136_v51 = vadd.f32 %v8123_v30, %v3111_v6 }
 0x39a   : > { %v3250_v57 = vrot.slane %v3249_v36, 1  ;;  %v3262_v15 = vrot.slane %v3261_v34, 2 }
 0x39b   : > { %v2796_v21 = vrot.slane %v2795_v41, 2  ;;  %v2803_v29 = vrot.slane %v2802_v0, 2 }
 0x39c   : > { %v8156_v52 = vadd.f32 %v3250_v57, %v3249_v36  ;;  %v8176_v36 = vadd.f32 %v8130_v55, %v3083_v20  ;;  %v8186_v20 = vadd.f32 %v8159_v44, %v3097_v5 }
 0x39d   : > { %v2797_v14 = vadd.f32 %v2796_v21, %v2795_v41  ;;  %v2804_v59 = vadd.f32 %v2803_v29, %v2802_v0  ;;  %v8147_v41 = vrot.slane %v8123_v30, 2  ;;  %v3151_v0 = vadd.f32 %v3150_v60, %v3149_v48 }
 0x39e   : > { %v3223_v29 = vadd.f32 %v3222_v11, %v3221_v33 }
 0x39f   : > { %v2798_v31 = vrot.slane %v2797_v14, 1  ;;  %v2805_v45 = vrot.slane %v2804_v59, 1  ;;  %v3152_v63 = vrot.slane %v3151_v0, 1 }
 0x3a1   : > { %v2799_v9 = vadd.f32 %v2798_v31, %v2797_v14  ;;  %v2806_v23 = vadd.f32 %v2805_v45, %v2804_v59  ;;  %v8165_v59 = vadd.f32 %v8130_v55, %v3139_v61 }
 0x3a2   : > { %v2689_v1 = vpop.permute.xlu1 %2688 }
 0x3a3   : > { %v2864_v22 = vadd.f32 %v7939_v3, %v2799_v9  ;;  %v2865_v4 = vadd.f32 %v7943_v25, %v2806_v23  ;;  %v2703_v54 = vsel %vm1119_vm7, %v2699_v46, %v2689_v1 }
 0x3a4   : > { %v2730_v49 = vmul.f32 %v7910_v13, %v2703_v54  ;;  %v2731_v26 = vmul.f32 %v7897_v40, %v2703_v54 }
 0x3a5   : > { %v2881_v37 = vmax.f32 %v2865_v4, 0.0  ;;  %v2880_v27 = vmax.f32 %v2864_v22, 0.0 }
 0x3a6   : > { %v2807_v38 = vsel %vm2736_vm8, %v2730_v49, 0.0  ;;  %v2814_v7 = vsel %vm2736_vm8, %v2731_v26, 0.0  ;;  %v8151_v16 = vpop.permute.xlu1 %2590 }
 0x3a7   : > { %v2968_v56 = vrot.slane %v2881_v37, 7  ;;  %v2808_v62 = vrot.slane %v2807_v38, 4  ;;  %v2815_v21 = vrot.slane %v2814_v7, 4  ;;  %v3263_v37 = vadd.f32 %v3262_v15, %v3261_v34 }
 0x3a8   : > { %v3153_v34 = vadd.f32 %v3152_v63, %v3151_v0 }
 0x3a9   : > { %v8162_v35 = vsel %vm931_vm0, %v2968_v56, %v2880_v27  ;;  %v2809_v19 = vadd.f32 %v2808_v62, %v2807_v38  ;;  %v2816_v14 = vadd.f32 %v2815_v21, %v2814_v7 }
 0x3aa   : > { %v3016_v8 = vmul.f32 %v8162_v35, %v7974_v42  ;;  %v3020_v6 = vmul.f32 %v8162_v35, %v8006_v43  ;;  %v3022_v48 = vmul.f32 %v8162_v35, %v8040_v10  ;;  %v2378_v46 = vpop.permute.xlu1 %2377  ;;  %v8197_v0 = vadd.f32 %v8159_v44, %v3153_v34 }
 0x3ab   : > { %v2810_v33 = vrot.slane %v2809_v19, 2  ;;  %v2817_v31 = vrot.slane %v2816_v14, 2  ;;  %v2388_v45 = vsel %vm2385_vm15, %v8075_v50, %v2378_v46 }
 0x3ac   : > { %v3273_v32 = vsel %vm3048_vm9, %v3016_v8, 0.0  ;;  %v3301_v61 = vsel %vm3048_vm9, %v3020_v6, 0.0  ;;  %v2724_v28 = vmul.f32 %v7910_v13, %v2388_v45  ;;  %v2725_v9 = vmul.f32 %v7897_v40, %v2388_v45 }
 0x3ad   : > { %v3274_v23 = vrot.slane %v3273_v32, 4  ;;  %v3302_v60 = vrot.slane %v3301_v61, 4  ;;  %v2811_v1 = vadd.f32 %v2810_v33, %v2809_v19  ;;  %v2818_v11 = vadd.f32 %v2817_v31, %v2816_v14 }
 0x3ae   : > { %v2765_v22 = vsel %vm2736_vm8, %v2724_v28, 0.0  ;;  %v2772_v4 = vsel %vm2736_vm8, %v2725_v9, 0.0  ;;  %v3315_v50 = vsel %vm3048_vm9, %v3022_v48, 0.0  ;;  %v8189_v6 = vadd.f32 %v8123_v30, %v3223_v29 }
 0x3af   : > { %v3275_v54 = vadd.f32 %v3274_v23, %v3273_v32  ;;  %v3303_v57 = vadd.f32 %v3302_v60, %v3301_v61  ;;  %v2812_v49 = vrot.slane %v2811_v1, 1  ;;  %v2819_v26 = vrot.slane %v2818_v11, 1 }
 0x3b0   : > { %v2766_v38 = vrot.slane %v2765_v22, 4  ;;  %v2773_v7 = vrot.slane %v2772_v4, 4  ;;  %v3316_v27 = vrot.slane %v3315_v50, 4  ;;  %v3264_v61 = vrot.slane %v3263_v37, 1 }
 0x3b1   : > { %v3276_v56 = vrot.slane %v3275_v54, 2  ;;  %v3304_v62 = vrot.slane %v3303_v57, 2  ;;  %v2813_v21 = vadd.f32 %v2812_v49, %v2811_v1  ;;  %v2820_v19 = vadd.f32 %v2819_v26, %v2818_v11 }
 0x3b2   : > { %v2767_v14 = vadd.f32 %v2766_v38, %v2765_v22  ;;  %v2774_v8 = vadd.f32 %v2773_v7, %v2772_v4  ;;  %v3317_v48 = vadd.f32 %v3316_v27, %v3315_v50  ;;  %v8194_v29 = vrot.slane %v8123_v30, 5 }
 0x3b3   : > { %v3277_v5 = vadd.f32 %v3276_v56, %v3275_v54  ;;  %v2866_v46 = vadd.f32 %v7939_v3, %v2813_v21  ;;  %v2867_v33 = vadd.f32 %v7943_v25, %v2820_v19  ;;  %v3305_v31 = vadd.f32 %v3304_v62, %v3303_v57 }
 0x3b4   : > { %v2768_v15 = vrot.slane %v2767_v14, 2  ;;  %v2775_v45 = vrot.slane %v2774_v8, 2  ;;  %v3318_v32 = vrot.slane %v3317_v48, 2  ;;  %v8199_v26 = vadd.f32 %v3264_v61, %v3263_v37 }
 0x3b5   : > { %v3278_v28 = vrot.slane %v3277_v5, 1  ;;  %v2883_v9 = vmax.f32 %v2867_v33, 0.0  ;;  %v3306_v23 = vrot.slane %v3305_v31, 1  ;;  %v2882_v4 = vmax.f32 %v2866_v46, 0.0 }
 0x3b6   : > { %v2769_v60 = vadd.f32 %v2768_v15, %v2767_v14  ;;  %v2776_v1 = vadd.f32 %v2775_v45, %v2774_v8  ;;  %v3319_v11 = vadd.f32 %v3318_v32, %v3317_v48  ;;  %9870 = vst [vmem:[#allocation55_spill] sm:$0xff] %v8199_v26 }
 0x3b7   : > { %v3279_v22 = vadd.f32 %v3278_v28, %v3277_v5  ;;  %v2970_v50 = vrot.slane %v2883_v9, 7  ;;  %v3307_v54 = vadd.f32 %v3306_v23, %v3305_v31  ;;  %v8225_v9 = vadd.f32 %v8130_v55, %v8156_v52 }
 0x3b8   : > { %v2770_v49 = vrot.slane %v2769_v60, 1  ;;  %v2777_v57 = vrot.slane %v2776_v1, 1  ;;  %v3320_v63 = vrot.slane %v3319_v11, 1 }
 0x3b9   : > { %v3548_v38 = vadd.f32 %v8123_v30, %v3279_v22  ;;  %v8203_v7 = vsel %vm931_vm0, %v2970_v50, %v2882_v4  ;;  %v3552_v27 = vadd.f32 %v8130_v55, %v3307_v54  ;;  %9871 = vst [vmem:[#allocation61_spill] sm:$0xff] %v8225_v9 }
 0x3ba   : > { %v3024_v56 = vmul.f32 %v8203_v7, %v7974_v42  ;;  %v3028_v62 = vmul.f32 %v8203_v7, %v8006_v43  ;;  %v3030_v21 = vmul.f32 %v8203_v7, %v8040_v10  ;;  %v2771_v19 = vadd.f32 %v2770_v49, %v2769_v60 }
 0x3bb   : > { %v3580_v37 = vadd.f32 %v3548_v38, %v8133_v47  ;;  %v2778_v14 = vadd.f32 %v2777_v57, %v2776_v1  ;;  %v3321_v8 = vadd.f32 %v3320_v63, %v3319_v11  ;;  %v3584_v48 = vadd.f32 %v3552_v27, %v8176_v36 }
 0x3bc   : > { %v3329_v5 = vsel %vm3048_vm9, %v3024_v56, 0.0  ;;  %v3357_v46 = vsel %vm3048_vm9, %v3028_v62, 0.0  ;;  %v2860_v33 = vadd.f32 %v7939_v3, %v2771_v19  ;;  %v3371_v31 = vsel %vm3048_vm9, %v3030_v21, 0.0 }
 0x3bd   : > { %v4876_v34 = vmul.f32 -1.442695, %v3580_v37  ;;  %v3330_v15 = vrot.slane %v3329_v5, 4  ;;  %v3358_v45 = vrot.slane %v3357_v46, 4  ;;  %v2861_v32 = vadd.f32 %v7943_v25, %v2778_v14  ;;  %v2691_v61 = vpop.permute.xlu1 %2690 }
 0x3be   : > { %v2700_v47 = vsel %vm2385_vm15, %v8116_v53, %v8151_v16  ;;  %v3372_v28 = vrot.slane %v3371_v31, 4  ;;  %v3554_v36 = vadd.f32 %v8159_v44, %v3321_v8  ;;  %v2876_v1 = vmax.f32 %v2860_v33, 0.0 }
 0x3bf   : > { %v3331_v23 = vadd.f32 %v3330_v15, %v3329_v5  ;;  %v8227_v60 = vadd.f32 %v3358_v45, %v3357_v46  ;;  %v2877_v11 = vmax.f32 %v2861_v32, 0.0  ;;  %5110 = vpow2.f32 %v4876_v34 }
 0x3c0   : > { %v2704_v22 = vsel %vm1119_vm7, %v2700_v47, %v2691_v61  ;;  %v8230_v4 = vadd.f32 %v3372_v28, %v3371_v31  ;;  %v4880_v50 = vmul.f32 -1.442695, %v3584_v48  ;;  %v8234_v49 = vrot.slane %v8123_v30, 7 }
 0x3c1   : > { %v3332_v53 = vrot.slane %v3331_v23, 2  ;;  %v2964_v16 = vrot.slane %v2877_v11, 7  ;;  %v2732_v54 = vmul.f32 %v7910_v13, %v2704_v22  ;;  %v2733_v57 = vmul.f32 %v7897_v40, %v2704_v22  ;;  %v2693_v63 = vpop.permute.xlu1 %2692 }
 0x3c2   : > { %v3586_v27 = vadd.f32 %v3554_v36, %v8186_v20  ;;  %v2705_v19 = vsel %vm1119_vm7, %v8127_v24, %v2693_v63  ;;  %5112 = vpow2.f32 %v4880_v50 }
 0x3c3   : > { %v3333_v56 = vadd.f32 %v3332_v53, %v3331_v23  ;;  %v8241_v62 = vsel %vm931_vm0, %v2964_v16, %v2876_v1  ;;  %v2821_v21 = vsel %vm2736_vm8, %v2732_v54, 0.0  ;;  %v2828_v20 = vsel %vm2736_vm8, %v2733_v57, 0.0 }
 0x3c4   : > { %v3000_v37 = vmul.f32 %v8241_v62, %v7974_v42  ;;  %v3004_v14 = vmul.f32 %v8241_v62, %v8006_v43  ;;  %v2822_v8 = vrot.slane %v2821_v21, 4  ;;  %v2734_v5 = vmul.f32 %v7910_v13, %v2705_v19 }
 0x3c5   : > { %v3334_v48 = vrot.slane %v3333_v56, 1  ;;  %v2735_v46 = vmul.f32 %v7897_v40, %v2705_v19  ;;  %v2829_v34 = vrot.slane %v2828_v20, 4  ;;  %v8258_v11 = vpop.permute.xlu1 %2900  ;;  %v8260_v22 = vmul.f32 -1.442695, %v3586_v27 }
 0x3c6   : > { %v3161_v33 = vsel %vm3048_vm9, %v3000_v37, 0.0  ;;  %v3189_v31 = vsel %vm3048_vm9, %v3004_v14, 0.0  ;;  %v2823_v24 = vadd.f32 %v2822_v8, %v2821_v21  ;;  %v2835_v47 = vsel %vm2736_vm8, %v2734_v5, 0.0 }
 0x3c7   : > { %v3335_v15 = vadd.f32 %v3334_v48, %v3333_v56  ;;  %v3162_v45 = vrot.slane %v3161_v33, 4  ;;  %v3190_v32 = vrot.slane %v3189_v31, 4  ;;  %v2830_v28 = vadd.f32 %v2829_v34, %v2828_v20 }
 0x3c8   : > { %v2824_v61 = vrot.slane %v2823_v24, 2  ;;  %v2836_v36 = vrot.slane %v2835_v47, 4  ;;  %v2842_v23 = vsel %vm2736_vm8, %v2735_v46, 0.0  ;;  %v8269_v56 = vmul.f32 %v8241_v62, %v8040_v10 }
 0x3c9   : > { %v3556_v13 = vadd.f32 %v8123_v30, %v3335_v15  ;;  %v3163_v1 = vadd.f32 %v3162_v45, %v3161_v33  ;;  %v2843_v40 = vrot.slane %v2842_v23, 4  ;;  %v8262_v50 = vpop.eup %5110  ;;  %v8264_v53 = vadd.f32 %v3190_v32, %v3189_v31 }
 0x3ca   : > { %v2825_v16 = vadd.f32 %v2824_v61, %v2823_v24  ;;  %v2831_v54 = vrot.slane %v2830_v28, 2  ;;  %v2837_v57 = vadd.f32 %v2836_v36, %v2835_v47  ;;  %v2985_v27 = vmul.f32 %v7996_v18, %v8258_v11 }
 0x3cb   : > { %v3588_v63 = vadd.f32 %v3556_v13, %v8136_v51  ;;  %v3164_v21 = vrot.slane %v3163_v1, 2  ;;  %v2844_v19 = vadd.f32 %v2843_v40, %v2842_v23  ;;  %v2993_v46 = vmul.f32 %v7999_v2, %v8258_v11 }
 0x3cc   : > { %v2826_v37 = vrot.slane %v2825_v16, 1  ;;  %v2832_v14 = vadd.f32 %v2831_v54, %v2830_v28  ;;  %v2838_v8 = vrot.slane %v2837_v57, 2  ;;  %v8275_v33 = vpop.eup %5112  ;;  %v3001_v32 = vmul.f32 %v8241_v62, %v8258_v11 }
 0x3cd   : > { %v4884_v48 = vmul.f32 -1.442695, %v3588_v63  ;;  %v3165_v20 = vadd.f32 %v3164_v21, %v3163_v1  ;;  %v2845_v5 = vrot.slane %v2844_v19, 2  ;;  %v3009_v47 = vmul.f32 %v8053_v39, %v8258_v11 }
 0x3ce   : > { %v2827_v31 = vadd.f32 %v2826_v37, %v2825_v16  ;;  %v2833_v24 = vrot.slane %v2832_v14, 1  ;;  %v2839_v34 = vadd.f32 %v2838_v8, %v2837_v57  ;;  %v3017_v36 = vmul.f32 %v8162_v35, %v8258_v11 }
 0x3cf   : > { %v3166_v15 = vrot.slane %v3165_v20, 1  ;;  %v2846_v45 = vadd.f32 %v2845_v5, %v2844_v19  ;;  %5114 = vpow2.f32 %v4884_v48  ;;  %v3056_v1 = vsel %vm3048_vm9, %v2985_v27, 0.0 }
 0x3d0   : > { %v2834_v61 = vadd.f32 %v2833_v24, %v2832_v14  ;;  %v2840_v28 = vrot.slane %v2839_v34, 1  ;;  %v2868_v23 = vadd.f32 %v7939_v3, %v2827_v31  ;;  %v3112_v40 = vsel %vm3048_vm9, %v2993_v46, 0.0 }
 0x3d1   : > { %v2847_v13 = vrot.slane %v2846_v45, 1  ;;  %v3025_v57 = vmul.f32 %v8203_v7, %v8258_v11  ;;  %v3057_v63 = vrot.slane %v3056_v1, 4  ;;  %v3167_v21 = vadd.f32 %v3166_v15, %v3165_v20 }
 0x3d2   : > { %v2869_v16 = vadd.f32 %v7943_v25, %v2834_v61  ;;  %v2841_v54 = vadd.f32 %v2840_v28, %v2839_v34  ;;  %v3113_v37 = vrot.slane %v3112_v40, 4  ;;  %v3168_v14 = vsel %vm3048_vm9, %v3001_v32, 0.0 }
 0x3d3   : > { %v2848_v19 = vadd.f32 %v2847_v13, %v2846_v45  ;;  %v3058_v5 = vadd.f32 %v3057_v63, %v3056_v1  ;;  %v3169_v31 = vrot.slane %v3168_v14, 4  ;;  %v3224_v24 = vsel %vm3048_vm9, %v3009_v47, 0.0 }
 0x3d4   : > { %v2885_v8 = vmax.f32 %v2869_v16, 0.0  ;;  %v2870_v48 = vadd.f32 %v7939_v3, %v2841_v54  ;;  %v3114_v46 = vadd.f32 %v3113_v37, %v3112_v40  ;;  %v3280_v34 = vsel %vm3048_vm9, %v3017_v36, 0.0 }
 0x3d5   : > { %v2871_v27 = vadd.f32 %v7943_v25, %v2848_v19  ;;  %v2884_v61 = vmax.f32 %v2868_v23, 0.0  ;;  %v3059_v51 = vrot.slane %v3058_v5, 2  ;;  %v3170_v20 = vadd.f32 %v3169_v31, %v3168_v14 }
 0x3d6   : > { %v2972_v28 = vrot.slane %v2885_v8, 7  ;;  %v8296_v15 = vadd.f32 %v8123_v30, %v3167_v21  ;;  %v3115_v32 = vrot.slane %v3114_v46, 2  ;;  %v3225_v13 = vrot.slane %v3224_v24, 4 }
 0x3d7   : > { %v2887_v45 = vmax.f32 %v2871_v27, 0.0  ;;  %v2886_v1 = vmax.f32 %v2870_v48, 0.0  ;;  %v3060_v25 = vadd.f32 %v3059_v51, %v3058_v5  ;;  %v3281_v40 = vrot.slane %v3280_v34, 4 }
 0x3d8   : > { %v8299_v3 = vsel %vm931_vm0, %v2972_v28, %v2884_v61  ;;  %v3171_v16 = vrot.slane %v3170_v20, 2  ;;  %v3116_v19 = vadd.f32 %v3115_v32, %v3114_v46  ;;  %v3336_v37 = vsel %vm3048_vm9, %v3025_v57, 0.0 }
 0x3d9   : > { %v3032_v47 = vmul.f32 %v8299_v3, %v7974_v42  ;;  %v3036_v36 = vmul.f32 %v8299_v3, %v8006_v43  ;;  %v2974_v23 = vrot.slane %v2887_v45, 7  ;;  %v8305_v54 = vpop.eup %5114  ;;  %v8309_v63 = vmul.f32 %v8299_v3, %v8040_v10 }
 0x3da   : > { %v3061_v21 = vrot.slane %v3060_v25, 1  ;;  %v3226_v48 = vadd.f32 %v3225_v13, %v3224_v24  ;;  %v3033_v57 = vmul.f32 %v8299_v3, %v8258_v11  ;;  %v3117_v28 = vrot.slane %v3116_v19, 1 }
 0x3db   : > { %v3385_v51 = vsel %vm3048_vm9, %v3032_v47, 0.0  ;;  %v3413_v14 = vsel %vm3048_vm9, %v3036_v36, 0.0  ;;  %v8315_v8 = vsel %vm931_vm0, %v2974_v23, %v2886_v1  ;;  %v3172_v45 = vadd.f32 %v3171_v16, %v3170_v20 }
 0x3dc   : > { %v3386_v5 = vrot.slane %v3385_v51, 4  ;;  %v3414_v31 = vrot.slane %v3413_v14, 4  ;;  %v3040_v27 = vmul.f32 %v8315_v8, %v7974_v42  ;;  %v3044_v61 = vmul.f32 %v8315_v8, %v8006_v43 }
 0x3dd   : > { %v8323_v46 = vmul.f32 %v8315_v8, %v8040_v10  ;;  %v3041_v43 = vmul.f32 %v8315_v8, %v8258_v11  ;;  %v3062_v36 = vadd.f32 %v3061_v21, %v3060_v25  ;;  %v3118_v23 = vadd.f32 %v3117_v28, %v3116_v19 }
 0x3de   : > { %v3387_v32 = vadd.f32 %v3386_v5, %v3385_v51  ;;  %v8327_v1 = vadd.f32 %v3414_v31, %v3413_v14  ;;  %v3441_v24 = vsel %vm3048_vm9, %v3040_v27, 0.0  ;;  %v3469_v13 = vsel %vm3048_vm9, %v3044_v61, 0.0 }
 0x3df   : > { %9872 = vst [vmem:[#allocation54_spill] sm:$0xff] %v8323_v46  ;;  %v3442_v42 = vrot.slane %v3441_v24, 4  ;;  %v3470_v47 = vrot.slane %v3469_v13, 4  ;;  %v3227_v38 = vrot.slane %v3226_v48, 2  ;;  %v3282_v52 = vadd.f32 %v3281_v40, %v3280_v34 }
 0x3e0   : > { %v3388_v10 = vrot.slane %v3387_v32, 2  ;;  %v3173_v16 = vrot.slane %v3172_v45, 1  ;;  %v3337_v51 = vrot.slane %v3336_v37, 4  ;;  %v3392_v27 = vsel %vm3048_vm9, %v3033_v57, 0.0 }
 0x3e1   : > { %v3443_v20 = vadd.f32 %v3442_v42, %v3441_v24  ;;  %v3228_v5 = vadd.f32 %v3227_v38, %v3226_v48  ;;  %v3283_v31 = vrot.slane %v3282_v52, 2  ;;  %v8335_v26 = vadd.f32 %v3470_v47, %v3469_v13 }
 0x3e2   : > { %v3389_v14 = vadd.f32 %v3388_v10, %v3387_v32  ;;  %v3338_v9 = vadd.f32 %v3337_v51, %v3336_v37  ;;  %v3393_v11 = vrot.slane %v3392_v27, 4  ;;  %v3448_v34 = vsel %vm3048_vm9, %v3041_v43, 0.0 }
 0x3e3   : > { %v3444_v61 = vrot.slane %v3443_v20, 2  ;;  %9873 = vst [vmem:[#allocation60_spill] sm:$0xff] %v8335_v26  ;;  %v3229_v21 = vrot.slane %v3228_v5, 1  ;;  %v3284_v19 = vadd.f32 %v3283_v31, %v3282_v52  ;;  %v3449_v42 = vrot.slane %v3448_v34, 4 }
 0x3e4   : > { %v3390_v25 = vrot.slane %v3389_v14, 1  ;;  %v3339_v28 = vrot.slane %v3338_v9, 2  ;;  %v3394_v24 = vadd.f32 %v3393_v11, %v3392_v27  ;;  %v3174_v32 = vadd.f32 %v3173_v16, %v3172_v45 }
 0x3e5   : > { %v3445_v40 = vadd.f32 %v3444_v61, %v3443_v20  ;;  %v3230_v38 = vadd.f32 %v3229_v21, %v3228_v5  ;;  %v3285_v48 = vrot.slane %v3284_v19, 1  ;;  %v3450_v13 = vadd.f32 %v3449_v42, %v3448_v34  ;;  %v2908_v61 = vpop.permute.xlu1 %2907 }
 0x3e6   : > { %v3391_v12 = vadd.f32 %v3390_v25, %v3389_v14  ;;  %v3340_v57 = vadd.f32 %v3339_v28, %v3338_v9  ;;  %v3395_v46 = vrot.slane %v3394_v24, 2  ;;  %v3517_v51 = vadd.f32 %v8144_v58, %v3062_v36 }
 0x3e7   : > { %v3446_v10 = vrot.slane %v3445_v40, 1  ;;  %v3286_v47 = vadd.f32 %v3285_v48, %v3284_v19  ;;  %v3525_v52 = vadd.f32 %v8144_v58, %v3118_v23  ;;  %v3451_v27 = vrot.slane %v3450_v13, 2 }
 0x3e8   : > { %v3564_v37 = vadd.f32 %v8123_v30, %v3391_v12  ;;  %v3341_v20 = vrot.slane %v3340_v57, 1  ;;  %v3396_v31 = vadd.f32 %v3395_v46, %v3394_v24  ;;  %v3533_v16 = vadd.f32 %v8144_v58, %v3174_v32 }
 0x3e9   : > { %v3447_v43 = vadd.f32 %v3446_v10, %v3445_v40  ;;  %v3541_v9 = vadd.f32 %v8144_v58, %v3230_v38  ;;  %v3549_v14 = vadd.f32 %v8144_v58, %v3286_v47  ;;  %v3452_v36 = vadd.f32 %v3451_v27, %v3450_v13 }
 0x3ea   : > { %v3596_v45 = vadd.f32 %v3564_v37, %v8296_v15  ;;  %v3342_v5 = vadd.f32 %v3341_v20, %v3340_v57  ;;  %v3397_v11 = vrot.slane %v3396_v31, 1  ;;  %v2986_v21 = vmul.f32 %v7996_v18, %v2908_v61 }
 0x3eb   : > { %v3572_v12 = vadd.f32 %v8123_v30, %v3447_v43  ;;  %v3581_v23 = vadd.f32 %v3549_v14, %v3517_v51  ;;  %v2994_v46 = vmul.f32 %v7999_v2, %v2908_v61  ;;  %v3453_v34 = vrot.slane %v3452_v36, 1 }
 0x3ec   : > { %v4892_v25 = vmul.f32 -1.442695, %v3596_v45  ;;  %v3398_v15 = vadd.f32 %v3397_v11, %v3396_v31  ;;  %v3557_v40 = vadd.f32 %v8144_v58, %v3342_v5  ;;  %v3002_v24 = vmul.f32 %v8241_v62, %v2908_v61 }
 0x3ed   : > { %v3604_v19 = vadd.f32 %v3572_v12, %v8189_v6  ;;  %v4877_v28 = vmul.f32 -1.442695, %v3581_v23  ;;  %v3010_v30 = vmul.f32 %v8053_v39, %v2908_v61  ;;  %v3454_v32 = vadd.f32 %v3453_v34, %v3452_v36 }
 0x3ee   : > { %5116 = vpow2.f32 %v4892_v25  ;;  %v3565_v38 = vadd.f32 %v8144_v58, %v3398_v15  ;;  %v3589_v48 = vadd.f32 %v3557_v40, %v3525_v52  ;;  %v3018_v10 = vmul.f32 %v8162_v35, %v2908_v61 }
 0x3ef   : > { %v4900_v42 = vmul.f32 -1.442695, %v3604_v19  ;;  %5118 = vpow2.f32 %v4877_v28  ;;  %v3026_v6 = vmul.f32 %v8203_v7, %v2908_v61  ;;  %v3034_v57 = vmul.f32 %v8299_v3, %v2908_v61 }
 0x3f0   : > { %v3573_v13 = vadd.f32 %v8144_v58, %v3454_v32  ;;  %v3597_v37 = vadd.f32 %v3565_v38, %v3533_v16  ;;  %v4885_v47 = vmul.f32 -1.442695, %v3589_v48  ;;  %v3063_v51 = vsel %vm3048_vm9, %v2986_v21, 0.0 }
 0x3f1   : > { %5120 = vpow2.f32 %v4900_v42  ;;  %v3119_v43 = vsel %vm3048_vm9, %v2994_v46, 0.0  ;;  %v3175_v20 = vsel %vm3048_vm9, %v3002_v24, 0.0  ;;  %v3231_v52 = vsel %vm3048_vm9, %v3010_v30, 0.0 }
 0x3f2   : > { %v3605_v31 = vadd.f32 %v3573_v13, %v3541_v9  ;;  %5122 = vpow2.f32 %v4885_v47  ;;  %v4893_v27 = vmul.f32 -1.442695, %v3597_v37  ;;  %v3064_v45 = vrot.slane %v3063_v51, 4 }
 0x3f3   : > { %v3120_v14 = vrot.slane %v3119_v43, 4  ;;  %v3176_v12 = vrot.slane %v3175_v20, 4  ;;  %v3232_v5 = vrot.slane %v3231_v52, 4  ;;  %v3287_v11 = vsel %vm3048_vm9, %v3018_v10, 0.0 }
 0x3f4   : > { %5124 = vpow2.f32 %v4893_v27  ;;  %v3042_v58 = vmul.f32 %v8315_v8, %v2908_v61  ;;  %v3065_v16 = vadd.f32 %v3064_v45, %v3063_v51  ;;  %v3288_v36 = vrot.slane %v3287_v11, 4 }
 0x3f5   : > { %v3121_v25 = vadd.f32 %v3120_v14, %v3119_v43  ;;  %v3177_v23 = vadd.f32 %v3176_v12, %v3175_v20  ;;  %v3233_v21 = vadd.f32 %v3232_v5, %v3231_v52  ;;  %v3343_v46 = vsel %vm3048_vm9, %v3026_v6, 0.0 }
 0x3f6   : > { %v4901_v19 = vmul.f32 -1.442695, %v3605_v31  ;;  %v3066_v9 = vrot.slane %v3065_v16, 2  ;;  %v3289_v15 = vadd.f32 %v3288_v36, %v3287_v11  ;;  %v3344_v34 = vrot.slane %v3343_v46, 4 }
 0x3f7   : > { %v3122_v28 = vrot.slane %v3121_v25, 2  ;;  %v3178_v24 = vrot.slane %v3177_v23, 2  ;;  %v3234_v30 = vrot.slane %v3233_v21, 2  ;;  %v3399_v42 = vsel %vm3048_vm9, %v3034_v57, 0.0 }
 0x3f8   : > { %v8364_v40 = vpop.eup %5116  ;;  %v3067_v32 = vadd.f32 %v3066_v9, %v3065_v16  ;;  %v3290_v61 = vrot.slane %v3289_v15, 2  ;;  %v3345_v38 = vadd.f32 %v3344_v34, %v3343_v46  ;;  %v3400_v48 = vrot.slane %v3399_v42, 4  ;;  %v2915_v46 = vpop.permute.xlu1 %2914 }
 0x3f9   : > { %v8367_v10 = vpop.eup %5118  ;;  %v3123_v13 = vadd.f32 %v3122_v28, %v3121_v25  ;;  %v3179_v37 = vadd.f32 %v3178_v24, %v3177_v23  ;;  %v3235_v6 = vadd.f32 %v3234_v30, %v3233_v21  ;;  %v3455_v47 = vsel %vm3048_vm9, %v3042_v58, 0.0 }
 0x3fa   : > { %v3068_v43 = vrot.slane %v3067_v32, 1  ;;  %v3291_v20 = vadd.f32 %v3290_v61, %v3289_v15  ;;  %v3346_v52 = vrot.slane %v3345_v38, 2  ;;  %v3401_v31 = vadd.f32 %v3400_v48, %v3399_v42 }
 0x3fb   : > { %v8370_v51 = vpop.eup %5120  ;;  %v3124_v27 = vrot.slane %v3123_v13, 1  ;;  %v3180_v45 = vrot.slane %v3179_v37, 1  ;;  %v3236_v57 = vrot.slane %v3235_v6, 1  ;;  %v3456_v14 = vrot.slane %v3455_v47, 4 }
 0x3fc   : > { %9874 = vst [vmem:[#allocation72_spill] sm:$0xff] %v8370_v51  ;;  %v8372_v12 = vpop.eup %5122  ;;  %v3069_v5 = vadd.f32 %v3068_v43, %v3067_v32  ;;  %v3292_v11 = vrot.slane %v3291_v20, 1  ;;  %v3347_v16 = vadd.f32 %v3346_v52, %v3345_v38  ;;  %v3402_v36 = vrot.slane %v3401_v31, 2 }
 0x3fd   : > { %v3125_v25 = vadd.f32 %v3124_v27, %v3123_v13  ;;  %v3181_v23 = vadd.f32 %v3180_v45, %v3179_v37  ;;  %v3237_v21 = vadd.f32 %v3236_v57, %v3235_v6  ;;  %v3457_v58 = vadd.f32 %v3456_v14, %v3455_v47 }
 0x3fe   : > { %v8374_v9 = vpop.eup %5124  ;;  %v3293_v15 = vadd.f32 %v3292_v11, %v3291_v20  ;;  %v3348_v34 = vrot.slane %v3347_v16, 1  ;;  %v3403_v28 = vadd.f32 %v3402_v36, %v3401_v31  ;;  %v3518_v24 = vadd.f32 %v8147_v41, %v3069_v5 }
 0x3ff   : > { %9875 = vst [vmem:[#allocation10_spill] sm:$0xff] %v8374_v9  ;;  %5126 = vpow2.f32 %v4901_v19  ;;  %v3458_v42 = vrot.slane %v3457_v58, 2  ;;  %v3526_v32 = vadd.f32 %v8147_v41, %v3125_v25  ;;  %v2987_v13 = vmul.f32 %v7996_v18, %v2915_v46 }
 0x400   : > { %v3349_v61 = vadd.f32 %v3348_v34, %v3347_v16  ;;  %v3404_v38 = vrot.slane %v3403_v28, 1  ;;  %v3550_v48 = vadd.f32 %v8147_v41, %v3293_v15  ;;  %v3534_v6 = vadd.f32 %v8147_v41, %v3181_v23 }
 0x401   : > { %v3459_v37 = vadd.f32 %v3458_v42, %v3457_v58  ;;  %v2995_v47 = vmul.f32 %v7999_v2, %v2915_v46  ;;  %v3003_v43 = vmul.f32 %v8241_v62, %v2915_v46  ;;  %v3542_v52 = vadd.f32 %v8147_v41, %v3237_v21 }
 0x402   : > { %v3405_v20 = vadd.f32 %v3404_v38, %v3403_v28  ;;  %v3558_v19 = vadd.f32 %v8147_v41, %v3349_v61  ;;  %v3582_v31 = vadd.f32 %v3550_v48, %v3518_v24  ;;  %v3011_v45 = vmul.f32 %v8053_v39, %v2915_v46 }
 0x403   : > { %v3460_v27 = vrot.slane %v3459_v37, 1  ;;  %v3019_v57 = vmul.f32 %v8162_v35, %v2915_v46  ;;  %v3027_v14 = vmul.f32 %v8203_v7, %v2915_v46  ;;  %v3070_v36 = vsel %vm3048_vm9, %v2987_v13, 0.0 }
 0x404   : > { %v3566_v5 = vadd.f32 %v8147_v41, %v3405_v20  ;;  %v3590_v11 = vadd.f32 %v3558_v19, %v3526_v32  ;;  %v4878_v16 = vmul.f32 -1.442695, %v3582_v31  ;;  %v3071_v23 = vrot.slane %v3070_v36, 4 }
 0x405   : > { %v3461_v25 = vadd.f32 %v3460_v27, %v3459_v37  ;;  %v3126_v21 = vsel %vm3048_vm9, %v2995_v47, 0.0  ;;  %v3182_v58 = vsel %vm3048_vm9, %v3003_v43, 0.0  ;;  %v3035_v28 = vmul.f32 %v8299_v3, %v2915_v46 }
 0x406   : > { %v3598_v15 = vadd.f32 %v3566_v5, %v3534_v6  ;;  %v4886_v34 = vmul.f32 -1.442695, %v3590_v11  ;;  %v3127_v24 = vrot.slane %v3126_v21, 4  ;;  %v3072_v61 = vadd.f32 %v3071_v23, %v3070_v36 }
 0x407   : > { %v3574_v42 = vadd.f32 %v8147_v41, %v3461_v25  ;;  %v3183_v38 = vrot.slane %v3182_v58, 4  ;;  %v3238_v32 = vsel %vm3048_vm9, %v3011_v45, 0.0  ;;  %5128 = vpow2.f32 %v4878_v16 }
 0x408   : > { %v3043_v48 = vmul.f32 %v8315_v8, %v2915_v46  ;;  %v3128_v13 = vadd.f32 %v3127_v24, %v3126_v21  ;;  %v3239_v37 = vrot.slane %v3238_v32, 4  ;;  %v3073_v43 = vrot.slane %v3072_v61, 2 }
 0x409   : > { %v8397_v20 = vpop.eup %5126  ;;  %v3606_v47 = vadd.f32 %v3574_v42, %v3542_v52  ;;  %v3184_v6 = vadd.f32 %v3183_v38, %v3182_v58  ;;  %v3294_v19 = vsel %vm3048_vm9, %v3019_v57, 0.0  ;;  %5130 = vpow2.f32 %v4886_v34 }
 0x40a   : > { %9876 = vst [vmem:[#allocation13_spill] sm:$0xff] %v8397_v20  ;;  %v3129_v31 = vrot.slane %v3128_v13, 2  ;;  %v3240_v27 = vadd.f32 %v3239_v37, %v3238_v32  ;;  %v3295_v41 = vrot.slane %v3294_v19, 4  ;;  %v4894_v5 = vmul.f32 -1.442695, %v3598_v15 }
 0x40b   : > { %v3074_v11 = vadd.f32 %v3073_v43, %v3072_v61  ;;  %v3185_v36 = vrot.slane %v3184_v6, 2  ;;  %v3350_v45 = vsel %vm3048_vm9, %v3027_v14, 0.0  ;;  %v4902_v21 = vmul.f32 -1.442695, %v3606_v47 }
 0x40c   : > { %v3130_v16 = vadd.f32 %v3129_v31, %v3128_v13  ;;  %v3241_v46 = vrot.slane %v3240_v27, 2  ;;  %v3296_v25 = vadd.f32 %v3295_v41, %v3294_v19  ;;  %v3351_v23 = vrot.slane %v3350_v45, 4 }
 0x40d   : > { %v3075_v24 = vrot.slane %v3074_v11, 1  ;;  %v3186_v52 = vadd.f32 %v3185_v36, %v3184_v6  ;;  %v3406_v58 = vsel %vm3048_vm9, %v3035_v28, 0.0  ;;  %v3462_v61 = vsel %vm3048_vm9, %v3043_v48, 0.0  ;;  %v2929_v6 = vpop.permute.xlu1 %2928 }
 0x40e   : > { %v3131_v42 = vrot.slane %v3130_v16, 1  ;;  %v3242_v57 = vadd.f32 %v3241_v46, %v3240_v27  ;;  %v3297_v34 = vrot.slane %v3296_v25, 2  ;;  %v3352_v38 = vadd.f32 %v3351_v23, %v3350_v45 }
 0x40f   : > { %v3076_v32 = vadd.f32 %v3075_v24, %v3074_v11  ;;  %v3187_v37 = vrot.slane %v3186_v52, 1  ;;  %v3407_v15 = vrot.slane %v3406_v58, 4  ;;  %5132 = vpow2.f32 %v4894_v5 }
 0x410   : > { %v3132_v43 = vadd.f32 %v3131_v42, %v3130_v16  ;;  %v3243_v14 = vrot.slane %v3242_v57, 1  ;;  %v3298_v13 = vadd.f32 %v3297_v34, %v3296_v25  ;;  %v3353_v31 = vrot.slane %v3352_v38, 2 }
 0x411   : > { %v3188_v19 = vadd.f32 %v3187_v37, %v3186_v52  ;;  %v3408_v47 = vadd.f32 %v3407_v15, %v3406_v58  ;;  %v3463_v41 = vrot.slane %v3462_v61, 4  ;;  %v8403_v36 = vpop.eup %5128  ;;  %5134 = vpow2.f32 %v4902_v21 }
 0x412   : > { %v3244_v28 = vadd.f32 %v3243_v14, %v3242_v57  ;;  %v3299_v27 = vrot.slane %v3298_v13, 1  ;;  %v3354_v45 = vadd.f32 %v3353_v31, %v3352_v38  ;;  %v3519_v23 = vadd.f32 %v8154_v17, %v3076_v32 }
 0x413   : > { %v3409_v11 = vrot.slane %v3408_v47, 2  ;;  %v3464_v46 = vadd.f32 %v3463_v41, %v3462_v61  ;;  %v3527_v48 = vadd.f32 %v8154_v17, %v3132_v43  ;;  %v8407_v16 = vpop.eup %5130  ;;  %v2989_v24 = vmul.f32 %v7996_v18, %v2929_v6 }
 0x414   : > { %v3300_v25 = vadd.f32 %v3299_v27, %v3298_v13  ;;  %v3355_v5 = vrot.slane %v3354_v45, 1  ;;  %v2997_v52 = vmul.f32 %v7999_v2, %v2929_v6  ;;  %v3535_v21 = vadd.f32 %v8154_v17, %v3188_v19 }
 0x415   : > { %v3410_v58 = vadd.f32 %v3409_v11, %v3408_v47  ;;  %v3465_v42 = vrot.slane %v3464_v46, 2  ;;  %v3543_v57 = vadd.f32 %v8154_v17, %v3244_v28  ;;  %v3005_v32 = vmul.f32 %v8241_v62, %v2929_v6 }
 0x416   : > { %v3356_v34 = vadd.f32 %v3355_v5, %v3354_v45  ;;  %v3551_v38 = vadd.f32 %v8154_v17, %v3300_v25  ;;  %v3013_v37 = vmul.f32 %v8053_v39, %v2929_v6  ;;  %v3021_v43 = vmul.f32 %v8162_v35, %v2929_v6 }
 0x417   : > { %v3411_v15 = vrot.slane %v3410_v58, 1  ;;  %v3466_v61 = vadd.f32 %v3465_v42, %v3464_v46  ;;  %v3029_v14 = vmul.f32 %v8203_v7, %v2929_v6  ;;  %v3084_v19 = vsel %vm3048_vm9, %v2989_v24, 0.0 }
 0x418   : > { %v3559_v13 = vadd.f32 %v8154_v17, %v3356_v34  ;;  %v3583_v31 = vadd.f32 %v3551_v38, %v3519_v23  ;;  %v3140_v47 = vsel %vm3048_vm9, %v2997_v52, 0.0  ;;  %v3085_v27 = vrot.slane %v3084_v19, 4 }
 0x419   : > { %v3412_v41 = vadd.f32 %v3411_v15, %v3410_v58  ;;  %v3467_v28 = vrot.slane %v3466_v61, 1  ;;  %v3141_v45 = vrot.slane %v3140_v47, 4  ;;  %v3037_v25 = vmul.f32 %v8299_v3, %v2929_v6  ;;  %v8424_v42 = vpop.eup %5132 }
 0x41a   : > { %v3591_v11 = vadd.f32 %v3559_v13, %v3527_v48  ;;  %v3196_v46 = vsel %vm3048_vm9, %v3005_v32, 0.0  ;;  %v3252_v5 = vsel %vm3048_vm9, %v3013_v37, 0.0  ;;  %9877 = vst [vmem:[#allocation126_spill] sm:$0xff] %v8424_v42  ;;  %v3086_v34 = vadd.f32 %v3085_v27, %v3084_v19 }
 0x41b   : > { %v3468_v30 = vadd.f32 %v3467_v28, %v3466_v61  ;;  %v3567_v23 = vadd.f32 %v8154_v17, %v3412_v41  ;;  %v3142_v24 = vadd.f32 %v3141_v45, %v3140_v47  ;;  %v8427_v38 = vpop.eup %5134  ;;  %v3045_v52 = vmul.f32 %v8315_v8, %v2929_v6 }
 0x41c   : > { %9878 = vst [vmem:[#allocation129_spill] sm:$0xff] %v8427_v38  ;;  %v3197_v58 = vrot.slane %v3196_v46, 4  ;;  %v3253_v15 = vrot.slane %v3252_v5, 4  ;;  %v3308_v48 = vsel %vm3048_vm9, %v3021_v43, 0.0  ;;  %v8432_v32 = vmul.f32 -1.442695, %v3583_v31 }
 0x41d   : > { %v3575_v13 = vadd.f32 %v8154_v17, %v3468_v30  ;;  %v3087_v37 = vrot.slane %v3086_v34, 2  ;;  %v3143_v20 = vrot.slane %v3142_v24, 2  ;;  %v3309_v28 = vrot.slane %v3308_v48, 4 }
 0x41e   : > { %v3198_v51 = vadd.f32 %v3197_v58, %v3196_v46  ;;  %v3254_v61 = vadd.f32 %v3253_v15, %v3252_v5  ;;  %v3364_v19 = vsel %vm3048_vm9, %v3029_v14, 0.0  ;;  %v3599_v47 = vadd.f32 %v3567_v23, %v3535_v21 }
 0x41f   : > { %v8435_v41 = vmul.f32 -1.442695, %v3591_v11  ;;  %v3088_v27 = vadd.f32 %v3087_v37, %v3086_v34  ;;  %v3144_v6 = vadd.f32 %v3143_v20, %v3142_v24  ;;  %v3310_v42 = vadd.f32 %v3309_v28, %v3308_v48 }
 0x420   : > { %v3199_v45 = vrot.slane %v3198_v51, 2  ;;  %v3255_v38 = vrot.slane %v3254_v61, 2  ;;  %v3365_v43 = vrot.slane %v3364_v19, 4  ;;  %v3607_v9 = vadd.f32 %v3575_v13, %v3543_v57 }
 0x421   : > { %v3089_v17 = vrot.slane %v3088_v27, 1  ;;  %v3145_v30 = vrot.slane %v3144_v6, 1  ;;  %v3420_v31 = vsel %vm3048_vm9, %v3037_v25, 0.0  ;;  %v3311_v5 = vrot.slane %v3310_v42, 2  ;;  %v2943_v25 = vpop.permute.xlu1 %2942 }
 0x422   : > { %v3200_v26 = vadd.f32 %v3199_v45, %v3198_v51  ;;  %v3256_v46 = vadd.f32 %v3255_v38, %v3254_v61  ;;  %v3366_v58 = vadd.f32 %v3365_v43, %v3364_v19  ;;  %v3421_v21 = vrot.slane %v3420_v31, 4 }
 0x423   : > { %v3090_v15 = vadd.f32 %v3089_v17, %v3088_v27  ;;  %v3146_v14 = vadd.f32 %v3145_v30, %v3144_v6  ;;  %v3476_v11 = vsel %vm3048_vm9, %v3045_v52, 0.0  ;;  %v3312_v34 = vadd.f32 %v3311_v5, %v3310_v42 }
 0x424   : > { %v3201_v23 = vrot.slane %v3200_v26, 1  ;;  %v3257_v20 = vrot.slane %v3256_v46, 1  ;;  %v3367_v24 = vrot.slane %v3366_v58, 2  ;;  %v8439_v48 = vmul.f32 -1.442695, %v3599_v47 }
 0x425   : > { %v8441_v57 = vmul.f32 -1.442695, %v3607_v9  ;;  %v3422_v13 = vadd.f32 %v3421_v21, %v3420_v31  ;;  %v3477_v37 = vrot.slane %v3476_v11, 4  ;;  %v3313_v61 = vrot.slane %v3312_v34, 1 }
 0x426   : > { %v3202_v51 = vadd.f32 %v3201_v23, %v3200_v26  ;;  %v3258_v38 = vadd.f32 %v3257_v20, %v3256_v46  ;;  %v3368_v28 = vadd.f32 %v3367_v24, %v3366_v58  ;;  %v8444_v6 = vadd.f32 %v8194_v29, %v3090_v15 }
 0x427   : > { %9879 = vst [vmem:[#allocation132_spill] sm:$0xff] %v8441_v57  ;;  %v3423_v19 = vrot.slane %v3422_v13, 2  ;;  %v3478_v27 = vadd.f32 %v3477_v37, %v3476_v11  ;;  %v8447_v52 = vadd.f32 %v8194_v29, %v3146_v14  ;;  %v3314_v42 = vadd.f32 %v3313_v61, %v3312_v34 }
 0x428   : > { %v3369_v47 = vrot.slane %v3368_v28, 1  ;;  %v2991_v9 = vmul.f32 %v7996_v18, %v2943_v25  ;;  %v2999_v45 = vmul.f32 %v7999_v2, %v2943_v25  ;;  %v8452_v26 = vadd.f32 %v8194_v29, %v3202_v51 }
 0x429   : > { %v3424_v43 = vadd.f32 %v3423_v19, %v3422_v13  ;;  %v3479_v17 = vrot.slane %v3478_v27, 2  ;;  %v3007_v30 = vmul.f32 %v8241_v62, %v2943_v25  ;;  %v8456_v31 = vadd.f32 %v8194_v29, %v3258_v38 }
 0x42a   : > { %v3015_v46 = vmul.f32 %v8053_v39, %v2943_v25  ;;  %v3023_v5 = vmul.f32 %v8162_v35, %v2943_v25  ;;  %v3031_v58 = vmul.f32 %v8203_v7, %v2943_v25  ;;  %v3370_v15 = vadd.f32 %v3369_v47, %v3368_v28 }
 0x42b   : > { %9880 = vst [vmem:[#allocation136_spill] sm:$0xff] %v8456_v31  ;;  %v3425_v18 = vrot.slane %v3424_v43, 1  ;;  %v3480_v14 = vadd.f32 %v3479_v17, %v3478_v27  ;;  %v8462_v2 = vadd.f32 %v8194_v29, %v3314_v42  ;;  %v3039_v21 = vmul.f32 %v8299_v3, %v2943_v25 }
 0x42c   : > { %v3098_v11 = vsel %vm3048_vm9, %v2991_v9, 0.0  ;;  %v3154_v62 = vsel %vm3048_vm9, %v2999_v45, 0.0  ;;  %v3210_v23 = vsel %vm3048_vm9, %v3007_v30, 0.0  ;;  %v3047_v39 = vmul.f32 %v8315_v8, %v2943_v25 }
 0x42d   : > { %v3481_v20 = vrot.slane %v3480_v14, 1  ;;  %v3099_v35 = vrot.slane %v3098_v11, 4  ;;  %v3155_v34 = vrot.slane %v3154_v62, 4  ;;  %v3211_v7 = vrot.slane %v3210_v23, 4 }
 0x42e   : > { %v3266_v24 = vsel %vm3048_vm9, %v3015_v46, 0.0  ;;  %v3322_v13 = vsel %vm3048_vm9, %v3023_v5, 0.0  ;;  %v3378_v37 = vsel %vm3048_vm9, %v3031_v58, 0.0  ;;  %v3426_v51 = vadd.f32 %v3425_v18, %v3424_v43 }
 0x42f   : > { %v3561_v3 = vadd.f32 %v8194_v29, %v3370_v15  ;;  %v3100_v38 = vadd.f32 %v3099_v35, %v3098_v11  ;;  %v3156_v61 = vadd.f32 %v3155_v34, %v3154_v62  ;;  %v3212_v28 = vadd.f32 %v3211_v7, %v3210_v23 }
 0x430   : > { %v3267_v19 = vrot.slane %v3266_v24, 4  ;;  %v3323_v27 = vrot.slane %v3322_v13, 4  ;;  %v3379_v42 = vrot.slane %v3378_v37, 4  ;;  %v3482_v47 = vadd.f32 %v3481_v20, %v3480_v14 }
 0x431   : > { %v3101_v8 = vrot.slane %v3100_v38, 2  ;;  %v3157_v25 = vrot.slane %v3156_v61, 2  ;;  %v3434_v9 = vsel %vm3048_vm9, %v3039_v21, 0.0  ;;  %v3213_v45 = vrot.slane %v3212_v28, 2 }
 0x432   : > { %v3268_v17 = vadd.f32 %v3267_v19, %v3266_v24  ;;  %v3324_v30 = vadd.f32 %v3323_v27, %v3322_v13  ;;  %v3380_v46 = vadd.f32 %v3379_v42, %v3378_v37  ;;  %v3435_v43 = vrot.slane %v3434_v9, 4 }
 0x433   : > { %v3102_v5 = vadd.f32 %v3101_v8, %v3100_v38  ;;  %v3158_v58 = vadd.f32 %v3157_v25, %v3156_v61  ;;  %v3490_v15 = vsel %vm3048_vm9, %v3047_v39, 0.0  ;;  %v3214_v18 = vadd.f32 %v3213_v45, %v3212_v28 }
 0x434   : > { %v3269_v11 = vrot.slane %v3268_v17, 2  ;;  %v3325_v62 = vrot.slane %v3324_v30, 2  ;;  %v3381_v23 = vrot.slane %v3380_v46, 2  ;;  %v3436_v14 = vadd.f32 %v3435_v43, %v3434_v9 }
 0x435   : > { %v3103_v35 = vrot.slane %v3102_v5, 1  ;;  %v3159_v34 = vrot.slane %v3158_v58, 1  ;;  %v3491_v20 = vrot.slane %v3490_v15, 4  ;;  %v3215_v7 = vrot.slane %v3214_v18, 1 }
 0x436   : > { %v3270_v57 = vadd.f32 %v3269_v11, %v3268_v17  ;;  %v3326_v21 = vadd.f32 %v3325_v62, %v3324_v30  ;;  %v3382_v31 = vadd.f32 %v3381_v23, %v3380_v46  ;;  %v8476_v24 = vadd.f32 %v8194_v29, %v3426_v51 }
 0x437   : > { %v3160_v13 = vadd.f32 %v3159_v34, %v3158_v58  ;;  %v3437_v37 = vrot.slane %v3436_v14, 2  ;;  %v3492_v38 = vadd.f32 %v3491_v20, %v3490_v15  ;;  %v8479_v39 = vadd.f32 %v8194_v29, %v3482_v47 }
 0x438   : > { %v3271_v61 = vrot.slane %v3270_v57, 1  ;;  %v3327_v28 = vrot.slane %v3326_v21, 1  ;;  %v3383_v19 = vrot.slane %v3382_v31, 1  ;;  %v9881_v8 = vrot.slane %v8227_v60, 2 }
 0x439   : > { %v3438_v27 = vadd.f32 %v3437_v37, %v3436_v14  ;;  %v3493_v42 = vrot.slane %v3492_v38, 2  ;;  %v9882_v9 = vrot.slane %v8230_v4, 2  ;;  %v3104_v45 = vadd.f32 %v3103_v35, %v3102_v5 }
 0x43a   : > { %v3361_v25 = vadd.f32 %v9881_v8, %v8227_v60  ;;  %v3216_v17 = vadd.f32 %v3215_v7, %v3214_v18  ;;  %v3384_v30 = vadd.f32 %v3383_v19, %v3382_v31  ;;  %v3531_v46 = vadd.f32 %v8234_v49, %v3160_v13 }
 0x43b   : > { %v3375_v51 = vadd.f32 %v9882_v9, %v8230_v4  ;;  %v3328_v29 = vadd.f32 %v3327_v28, %v3326_v21  ;;  %v3439_v47 = vrot.slane %v3438_v27, 1  ;;  %v3593_v11 = vadd.f32 %v3561_v3, %v8447_v52 }
 0x43c   : > { %v3362_v58 = vrot.slane %v3361_v25, 1  ;;  %v3563_v15 = vadd.f32 %v8234_v49, %v3384_v30  ;;  %5136 = vpow2.f32 %v8435_v41  ;;  %v3716_v60 = vadd.f32 1.0, %v8305_v54 }
 0x43d   : > { %v3376_v43 = vrot.slane %v3375_v51, 1  ;;  %v8492_v62 = vadd.f32 %v3271_v61, %v3270_v57  ;;  %v8494_v4 = vadd.f32 %v3493_v42, %v3492_v38  ;;  %v3440_v18 = vadd.f32 %v3439_v47, %v3438_v27 }
 0x43e   : > { %v3363_v5 = vadd.f32 %v3362_v58, %v3361_v25  ;;  %v3595_v23 = vadd.f32 %v3563_v15, %v3531_v46  ;;  %v4889_v35 = vmul.f32 -1.442695, %v3593_v11  ;;  %v3717_v34 = vadd.f32 1.0, %v8372_v12 }
 0x43f   : > { %v3377_v31 = vadd.f32 %v3376_v43, %v3375_v51  ;;  %v3718_v52 = vadd.f32 1.0, %v8407_v16  ;;  %5138 = vrcp.f32 %v3716_v60  ;;  %v3523_v41 = vadd.f32 %v8234_v49, %v3104_v45 }
 0x440   : > { %v3560_v14 = vadd.f32 %v8130_v55, %v3363_v5  ;;  %5140 = vpow2.f32 %v4889_v35  ;;  %v4891_v54 = vmul.f32 -1.442695, %v3595_v23  ;;  %v3555_v57 = vadd.f32 %v8234_v49, %v3328_v29 }
 0x441   : > { %v3562_v20 = vadd.f32 %v8159_v44, %v3377_v31  ;;  %5142 = vrcp.f32 %v3717_v34  ;;  %v3585_v12 = vadd.f32 %v8462_v2, %v8444_v6  ;;  %v3495_v21 = vrot.slane %v8494_v4, 1 }
 0x442   : > { %v3592_v3 = vadd.f32 %v3560_v14, %v8165_v59  ;;  %5144 = vpow2.f32 %v4891_v54  ;;  %v3587_v13 = vadd.f32 %v3555_v57, %v3523_v41  ;;  %v3708_v16 = vadd.f32 1.0, %v8262_v50 }
 0x443   : > { %v3594_v7 = vadd.f32 %v3562_v20, %v8197_v0  ;;  %5146 = vrcp.f32 %v3718_v52  ;;  %v4881_v61 = vmul.f32 -1.442695, %v3585_v12  ;;  %v3709_v59 = vadd.f32 1.0, %v8367_v10  ;;  %v352_v20 = vld [vmem:[%s9099_s6] sm:$0xff] }
 0x444   : > { %v4888_v37 = vmul.f32 -1.442695, %v3592_v3  ;;  %5148 = vpow2.f32 %v8432_v32  ;;  %v4883_v28 = vmul.f32 -1.442695, %v3587_v13  ;;  %v3710_v0 = vadd.f32 1.0, %v8403_v36  ;;  %4995 = vmatprep.subr.mxu1 %v352_v20 }
 0x445   : > { %v4890_v38 = vmul.f32 -1.442695, %v3594_v7  ;;  %v9883_v6 = vrot.slane %v8264_v53, 2  ;;  %v3203_v19 = vsel %vm3048_vm9, %v8269_v56, 0.0  ;;  %v9884_v50 = vrot.slane %v8327_v1, 2  ;;  %4996 = vmatpush3.msra.mxu1 %v352_v20 }
 0x446   : > { %5150 = vpow2.f32 %v4888_v37  ;;  %v5137_v42 = vpop.eup %5136  ;;  %v3712_v32 = vadd.f32 1.0, %v8275_v33  ;;  %v3204_v8 = vrot.slane %v3203_v19, 4  ;;  %v3427_v10 = vsel %vm3048_vm9, %v8309_v63, 0.0 }
 0x447   : > { %v3193_v2 = vadd.f32 %v9883_v6, %v8264_v53  ;;  %v3417_v27 = vadd.f32 %v9884_v50, %v8327_v1  ;;  %5152 = vpow2.f32 %v4890_v38  ;;  %v3719_v36 = vadd.f32 1.0, %v5137_v42 }
 0x448   : > { %5154 = vpow2.f32 %v4881_v61  ;;  %v3205_v53 = vadd.f32 %v3204_v8, %v3203_v19  ;;  %v3428_v56 = vrot.slane %v3427_v10, 4  ;;  %v3539_v51 = vadd.f32 %v8234_v49, %v3216_v17 }
 0x449   : > { %v3194_v25 = vrot.slane %v3193_v2, 1  ;;  %v3418_v9 = vrot.slane %v3417_v27, 1  ;;  %5156 = vpow2.f32 %v8260_v22  ;;  %v8524_v45 = vpop.eup %5138  ;;  %v3571_v33 = vadd.f32 %v8234_v49, %v3440_v18 }
 0x44a   : > { %5158 = vrcp.f32 %v3719_v36  ;;  %v5141_v46 = vpop.eup %5140  ;;  %v3206_v63 = vrot.slane %v3205_v53, 2  ;;  %v3429_v29 = vadd.f32 %v3428_v56, %v3427_v10  ;;  %v3601_v47 = vadd.f32 %v8476_v24, %v8452_v26 }
 0x44b   : > { %v3195_v1 = vadd.f32 %v3194_v25, %v3193_v2  ;;  %v3419_v30 = vadd.f32 %v3418_v9, %v3417_v27  ;;  %5160 = vpow2.f32 %v4883_v28  ;;  %v8529_v58 = vpop.eup %5142  ;;  %v3721_v22 = vadd.f32 1.0, %v5141_v46 }
 0x44c   : > { %5162 = vrcp.f32 %v3708_v16  ;;  %v5145_v15 = vpop.eup %5144  ;;  %v3850_v11 = vrot.slane %v8529_v58, 7  ;;  %v3207_v60 = vadd.f32 %v3206_v63, %v3205_v53  ;;  %v3430_v5 = vrot.slane %v3429_v29, 2  ;;  %v9887_v53 = vld [vmem:[#allocation54_spill] sm:$0xff] }
 0x44d   : > { %v3536_v17 = vadd.f32 %v8130_v55, %v3195_v1  ;;  %v3568_v43 = vadd.f32 %v8130_v55, %v3419_v30  ;;  %5164 = vrcp.f32 %v3709_v59  ;;  %v8534_v31 = vpop.eup %5146  ;;  %v8537_v18 = vadd.f32 %v3495_v21, %v8494_v4  ;;  %v9888_v1 = vld [vmem:[#allocation10_spill] sm:$0xff] }
 0x44e   : > { %v3723_v26 = vadd.f32 1.0, %v5145_v15  ;;  %5166 = vrcp.f32 %v3721_v22  ;;  %v5149_v23 = vpop.eup %5148  ;;  %v3852_v35 = vrot.slane %v8534_v31, 6  ;;  %v3208_v34 = vrot.slane %v3207_v60, 1 }
 0x44f   : > { %v3600_v24 = vadd.f32 %v3568_v43, %v3536_v17  ;;  %5168 = vrcp.f32 %v3710_v0  ;;  %v3603_v14 = vadd.f32 %v3571_v33, %v3539_v51  ;;  %v3711_v54 = vadd.f32 1.0, %v5149_v23 }
 0x450   : > { %v5151_v52 = vpop.eup %5150  ;;  %5170 = vrcp.f32 %v3723_v26  ;;  %v3431_v41 = vadd.f32 %v3430_v5, %v3429_v29  ;;  %v4897_v57 = vmul.f32 -1.442695, %v3601_v47  ;;  %v3851_v7 = vsel %vm931_vm0, %v3850_v11, %v8524_v45  ;;  %v9889_v47 = vld [vmem:[#allocation126_spill] sm:$0xff] }
 0x451   : > { %v5153_v4 = vpop.eup %5152  ;;  %v3720_v3 = vadd.f32 1.0, %v5151_v52  ;;  %5172 = vrcp.f32 %v3712_v32  ;;  %v3209_v12 = vadd.f32 %v3208_v34, %v3207_v60  ;;  %v4896_v37 = vmul.f32 -1.442695, %v3600_v24  ;;  %v9885_v32 = vld [vmem:[#allocation60_spill] sm:$0xff] }
 0x452   : > { %v5155_v21 = vpop.eup %5154  ;;  %v3722_v13 = vadd.f32 1.0, %v5153_v4  ;;  %5174 = vrcp.f32 %v3711_v54  ;;  %v3432_v16 = vrot.slane %v3431_v41, 1  ;;  %v3853_v61 = vsel %vm933_vm1, %v3852_v35, %v3851_v7  ;;  %v9890_v4 = vld [vmem:[#allocation61_spill] sm:$0xff] }
 0x453   : > { %v5157_v38 = vpop.eup %5156  ;;  %5176 = vrcp.f32 %v3720_v3  ;;  %v3713_v28 = vadd.f32 1.0, %v5155_v21  ;;  %v4899_v59 = vmul.f32 -1.442695, %v3603_v14  ;;  %v3538_v19 = vadd.f32 %v8159_v44, %v3209_v12 }
 0x454   : > { %v8546_v0 = vpop.eup %5158  ;;  %5178 = vrcp.f32 %v3722_v13  ;;  %v3714_v6 = vadd.f32 1.0, %v5157_v38  ;;  %v3433_v2 = vadd.f32 %v3432_v16, %v3431_v41  ;;  %v3724_v42 = vadd.f32 1.0, %v8364_v40  ;;  %v9891_v38 = vld [vmem:[#allocation136_spill] sm:$0xff] }
 0x455   : > { %v5161_v50 = vpop.eup %5160  ;;  %v3854_v27 = vrot.slane %v8546_v0, 5  ;;  %5180 = vrcp.f32 %v3713_v28  ;;  %v9886_v8 = vrot.slane %v9885_v32, 2  ;;  %v3483_v56 = vsel %vm3048_vm9, %v9887_v53, 0.0 }
 0x456   : > { %v8554_v36 = vpop.eup %5162  ;;  %v3715_v25 = vadd.f32 1.0, %v5161_v50  ;;  %5182 = vrcp.f32 %v3714_v6  ;;  %v3570_v9 = vadd.f32 %v8159_v44, %v3433_v2  ;;  %v3725_v30 = vadd.f32 1.0, %v9888_v1  ;;  %v9893_v1 = vld [vmem:[#allocation55_spill] sm:$0xff] }
 0x457   : > { %v3473_v10 = vadd.f32 %v9886_v8, %v9885_v32  ;;  %v8559_v51 = vpop.eup %5164  ;;  %5184 = vpow2.f32 %v8439_v48  ;;  %v3484_v33 = vrot.slane %v3483_v56, 4  ;;  %v3726_v22 = vadd.f32 1.0, %v9889_v47 }
 0x458   : > { %v8563_v46 = vpop.eup %5166  ;;  %5186 = vrcp.f32 %v3715_v25  ;;  %v3836_v63 = vrot.slane %v8559_v51, 7  ;;  %v3602_v29 = vadd.f32 %v3570_v9, %v3538_v19  ;;  %v3855_v43 = vsel %vm935_vm2, %v3854_v27, %v3853_v61  ;;  %v9892_v19 = vld [vmem:[#allocation132_spill] sm:$0xff] }
 0x459   : > { %v3474_v40 = vrot.slane %v3473_v10, 1  ;;  %v8567_v17 = vpop.eup %5168  ;;  %5188 = vpow2.f32 %v4896_v37  ;;  %v3485_v11 = vadd.f32 %v3484_v33, %v3483_v56  ;;  %v3547_v26 = vadd.f32 %v8234_v49, %v8492_v62 }
 0x45a   : > { %v8570_v48 = vpop.eup %5170  ;;  %v3838_v60 = vrot.slane %v8567_v17, 6  ;;  %5190 = vpow2.f32 %v4897_v57  ;;  %v4898_v5 = vmul.f32 -1.442695, %v3602_v29  ;;  %v3837_v23 = vsel %vm931_vm0, %v3836_v63, %v8554_v36 }
 0x45b   : > { %v3475_v15 = vadd.f32 %v3474_v40, %v3473_v10  ;;  %v8575_v24 = vpop.eup %5172  ;;  %5192 = vpow2.f32 %v4899_v59  ;;  %v3486_v35 = vrot.slane %v3485_v11, 2  ;;  %v3858_v20 = vrot.slane %v8563_v46, 3 }
 0x45c   : > { %v8580_v14 = vpop.eup %5174  ;;  %v3862_v52 = vrot.slane %v8570_v48, 1  ;;  %v3839_v54 = vsel %vm933_vm1, %v3838_v60, %v3837_v23  ;;  %5194 = vpow2.f32 %v4898_v5  ;;  %v3842_v12 = vrot.slane %v8575_v24, 4 }
 0x45d   : > { %v3576_v34 = vadd.f32 %v8130_v55, %v3475_v15  ;;  %v8585_v41 = vpop.eup %5176  ;;  %v3840_v62 = vrot.slane %v8580_v14, 5  ;;  %5196 = vrcp.f32 %v3724_v42  ;;  %v3487_v57 = vadd.f32 %v3486_v35, %v3485_v11 }
 0x45e   : > { %v8589_v7 = vpop.eup %5178  ;;  %v3856_v55 = vrot.slane %v8585_v41, 4  ;;  %5198 = vrcp.f32 %v3725_v30  ;;  %v3579_v21 = vadd.f32 %v8234_v49, %v8537_v18  ;;  %v3609_v61 = vadd.f32 %v8479_v39, %v9891_v38 }
 0x45f   : > { %v3608_v3 = vadd.f32 %v3576_v34, %v9890_v4  ;;  %v8595_v13 = vpop.eup %5180  ;;  %v3841_v16 = vsel %vm935_vm2, %v3840_v62, %v3839_v54  ;;  %5200 = vrcp.f32 %v3726_v22  ;;  %v3488_v37 = vrot.slane %v3487_v57, 1  ;;  %v9894_v62 = vld [vmem:[#allocation72_spill] sm:$0xff] }
 0x460   : > { %v8600_v28 = vpop.eup %5182  ;;  %v3857_v59 = vsel %vm937_vm3, %v3856_v55, %v3855_v43  ;;  %v3860_v6 = vrot.slane %v8589_v7, 2  ;;  %v3844_v2 = vrot.slane %v8595_v13, 3  ;;  %5202 = vpow2.f32 %v9892_v19  ;;  %v9895_v55 = vld [vmem:[#allocation13_spill] sm:$0xff] }
 0x461   : > { %v5185_v49 = vpop.eup %5184  ;;  %v3859_v18 = vsel %vm939_vm4, %v3858_v20, %v3857_v59  ;;  %v3843_v50 = vsel %vm937_vm3, %v3842_v12, %v3841_v16  ;;  %v3489_v27 = vadd.f32 %v3488_v37, %v3487_v57  ;;  %v4904_v42 = vmul.f32 -1.442695, %v3608_v3  ;;  %v9896_v16 = vld [vmem:[#allocation129_spill] sm:$0xff]  ;;  %v354_v59 = vld [vmem:[%s9099_s6 + $0x10] sm:$0xff] }
 0x462   : > { %v8608_v32 = vpop.eup %5186  ;;  %v3861_v39 = vsel %vm941_vm5, %v3860_v6, %v3859_v18  ;;  %v3845_v8 = vsel %vm939_vm4, %v3844_v2, %v3843_v50  ;;  %v3846_v10 = vrot.slane %v8600_v28, 2  ;;  %v3727_v25 = vadd.f32 1.0, %v5185_v49 }
 0x463   : > { %v5189_v9 = vpop.eup %5188  ;;  %v8614_v53 = vsel %vm943_vm6, %v3862_v52, %v3861_v39  ;;  %v3848_v56 = vrot.slane %v8608_v32, 1  ;;  %v3546_v30 = vadd.f32 %v8159_v44, %v9893_v1  ;;  %v3578_v40 = vadd.f32 %v8159_v44, %v3489_v27 }
 0x464   : > { %v5191_v33 = vpop.eup %5190  ;;  %3894 = vrot.lane.b32.xlu0 %v8614_v53, %s5410_s9  ;;  %v3847_v63 = vsel %vm941_vm5, %v3846_v10, %v3845_v8  ;;  %v3728_v29 = vadd.f32 1.0, %v5189_v9  ;;  %5204 = vrcp.f32 %v3727_v25  ;;  %v3611_v47 = vadd.f32 %v3579_v21, %v3547_v26 }
 0x465   : > { %v5193_v22 = vpop.eup %5192  ;;  %v8624_v43 = vsel %vm943_vm6, %v3848_v56, %v3847_v63  ;;  %v3729_v15 = vadd.f32 1.0, %v5191_v33  ;;  %v3610_v11 = vadd.f32 %v3578_v40, %v3546_v30  ;;  %5206 = vpow2.f32 %v4904_v42 }
 0x466   : > { %v5195_v60 = vpop.eup %5194  ;;  %3892 = vrot.lane.b32.xlu1 %v8624_v43, %s5410_s9  ;;  %v3731_v44 = vadd.f32 1.0, %v5193_v22  ;;  %5208 = vrcp.f32 %v3728_v29  ;;  %v4905_v5 = vmul.f32 -1.442695, %v3609_v61  ;;  %v4907_v20 = vmul.f32 -1.442695, %v3611_v47  ;;  %v353_v61 = vld [vmem:[%s9099_s6 + $0x8] sm:$0xff] }
 0x467   : > { %v8628_v23 = vpop.eup %5196  ;;  %v3730_v35 = vadd.f32 1.0, %v5195_v60  ;;  %5210 = vrcp.f32 %v3729_v15  ;;  %v4906_v34 = vmul.f32 -1.442695, %v3610_v11  ;;  %v3732_v57 = vadd.f32 1.0, %v9894_v62 }
 0x468   : > { %v8630_v26 = vpop.eup %5198  ;;  %5212 = vrcp.f32 %v3731_v44  ;;  %v3733_v12 = vadd.f32 1.0, %v9895_v55  ;;  %v3734_v37 = vadd.f32 1.0, %v9896_v16  ;;  %v8653_v27 = vpack.c.bf16 %v354_v59, %v353_v61  ;;  %v9897_v61 = vld [vmem:[#allocation118_spill] sm:$0xff] }
 0x469   : > { %v8632_v52 = vpop.eup %5200  ;;  %5214 = vrcp.f32 %v3730_v35  ;;  %v3864_v54 = vrot.slane %v8630_v26, 7  ;;  %v4493_v59 = vrot.slane %v8554_v36, %v9897_v61  ;;  %v4521_v36 = vrot.slane %v8575_v24, %v9897_v61 }
 0x46a   : > { %v5203_v4 = vpop.eup %5202  ;;  %v3866_v3 = vrot.slane %v8632_v52, 6  ;;  %5216 = vpow2.f32 %v4905_v5  ;;  %5046 = vmatprep.subr.bf16.mxu1 %v8653_v27  ;;  %v4514_v24 = vrot.slane %v8580_v14, %v9897_v61  ;;  %v4605_v14 = vrot.slane %v8628_v23, %v9897_v61 }
 0x46b   : > { %v3865_v21 = vsel %vm931_vm0, %v3864_v54, %v8628_v23  ;;  %5218 = vpow2.f32 %v4906_v34  ;;  %v3735_v38 = vadd.f32 1.0, %v5203_v4 }
 0x46c   : > { %5220 = vpow2.f32 %v4907_v20  ;;  %v3867_v2 = vsel %vm933_vm1, %v3866_v3, %v3865_v21 }
 0x46d   : > { %5222 = vrcp.f32 %v3732_v57 }
 0x46e   : > { %v8647_v6 = vpop.eup %5204  ;;  %5224 = vrcp.f32 %v3733_v12 }
 0x46f   : > { %v5207_v19 = vpop.eup %5206  ;;  %v3868_v49 = vrot.slane %v8647_v6, 5  ;;  %5226 = vrcp.f32 %v3734_v37 }
 0x470   : > { %v8651_v18 = vpop.eup %5208  ;;  %v3736_v50 = vadd.f32 1.0, %v5207_v19  ;;  %5228 = vrcp.f32 %v3735_v38 }
 0x471   : > { %v8655_v42 = vpop.eup %5210  ;;  %v3869_v39 = vsel %vm935_vm2, %v3868_v49, %v3867_v2  ;;  %v3870_v8 = vrot.slane %v8651_v18, 4 }
 0x472   : > { %v8659_v10 = vpop.eup %5212  ;;  %v3872_v25 = vrot.slane %v8655_v42, 3  ;;  %5230 = vrcp.f32 %v3736_v50 }
 0x473   : > { %v8663_v9 = vpop.eup %5214  ;;  %v3871_v56 = vsel %vm937_vm3, %v3870_v8, %v3869_v39  ;;  %v3876_v63 = vrot.slane %v8659_v10, 1  ;;  %v4507_v8 = vrot.slane %v8567_v17, %v9897_v61  ;;  %v4549_v17 = vrot.slane %v8524_v45, %v9897_v61 }
 0x474   : > { %v5217_v1 = vpop.eup %5216  ;;  %v3873_v30 = vsel %vm939_vm4, %v3872_v25, %v3871_v56  ;;  %v3874_v40 = vrot.slane %v8663_v9, 2  ;;  %v4535_v25 = vrot.slane %v8600_v28, %v9897_v61  ;;  %v4500_v56 = vrot.slane %v8559_v51, %v9897_v61 }
 0x475   : > { %v5219_v33 = vpop.eup %5218  ;;  %v3737_v29 = vadd.f32 1.0, %v5217_v1  ;;  %v4528_v28 = vrot.slane %v8595_v13, %v9897_v61  ;;  %v4577_v1 = vrot.slane %v8585_v41, %v9897_v61  ;;  %v4542_v45 = vrot.slane %v8608_v32, %v9897_v61 }
 0x476   : > { %v5221_v47 = vpop.eup %5220  ;;  %v3875_v22 = vsel %vm941_vm5, %v3874_v40, %v3873_v30  ;;  %v3738_v15 = vadd.f32 1.0, %v5219_v33  ;;  %v4591_v51 = vrot.slane %v8589_v7, %v9897_v61  ;;  %v4570_v41 = vrot.slane %v8546_v0, %v9897_v61 }
 0x477   : > { %v8670_v11 = vpop.eup %5222  ;;  %v3877_v60 = vsel %vm943_vm6, %v3876_v63, %v3875_v22  ;;  %v3739_v44 = vadd.f32 1.0, %v5221_v47  ;;  %5232 = vrcp.f32 %v3737_v29  ;;  %v4619_v13 = vrot.slane %v8632_v52, %v9897_v61 }
 0x478   : > { %v8673_v5 = vpop.eup %5224  ;;  %3896 = vrot.lane.b32.xlu1 %v3877_v60, %s5410_s9  ;;  %5234 = vrcp.f32 %v3738_v15  ;;  %v4584_v7 = vrot.slane %v8563_v46, %v9897_v61  ;;  %v4633_v32 = vrot.slane %v8651_v18, %v9897_v61  ;;  %v4647_v23 = vrot.slane %v8663_v9, %v9897_v61 }
 0x479   : > { %v8676_v35 = vpop.eup %5226  ;;  %5236 = vrcp.f32 %v3739_v44  ;;  %v3878_v34 = vrot.slane %v8673_v5, 7  ;;  %v4612_v0 = vrot.slane %v8630_v26, %v9897_v61  ;;  %v4661_v52 = vrot.slane %v8670_v11, %v9897_v61 }
 0x47a   : > { %v8679_v20 = vpop.eup %5228  ;;  %v3880_v54 = vrot.slane %v8676_v35, 6  ;;  %v4626_v46 = vrot.slane %v8647_v6, %v9897_v61  ;;  %v4675_v18 = vrot.slane %v8676_v35, %v9897_v61  ;;  %v4654_v26 = vrot.slane %v8659_v10, %v9897_v61 }
 0x47b   : > { %v3879_v62 = vsel %vm931_vm0, %v3878_v34, %v8670_v11  ;;  %v3882_v3 = vrot.slane %v8679_v20, 5  ;;  %v4668_v6 = vrot.slane %v8673_v5, %v9897_v61 }
 0x47c   : > { %v8684_v57 = vpop.eup %5230  ;;  %v3881_v4 = vsel %vm933_vm1, %v3880_v54, %v3879_v62  ;;  %3993 = vrot.lane.b32.xlu1 %v8624_v43, %s5401_s12 }
 0x47d   : > { %v3883_v55 = vsel %vm935_vm2, %v3882_v3, %v3881_v4  ;;  %v3884_v12 = vrot.slane %v8684_v57, 4  ;;  %v4689_v9 = vrot.slane %v8684_v57, %v9897_v61 }
 0x47f   : > { %v3885_v16 = vsel %vm937_vm3, %v3884_v12, %v3883_v55 }
 0x480   : > { %3997 = vrot.lane.b32.xlu1 %v3877_v60, %s5401_s12 }
 0x481   : > { %v8693_v21 = vpop.eup %5232 }
 0x482   : > { %v8696_v37 = vpop.eup %5234  ;;  %v3886_v38 = vrot.slane %v8693_v21, 3  ;;  %v4696_v40 = vrot.slane %v8693_v21, %v9897_v61 }
 0x483   : > { %v8701_v2 = vpop.eup %5236  ;;  %v3888_v43 = vrot.slane %v8696_v37, 2  ;;  %v4703_v30 = vrot.slane %v8696_v37, %v9897_v61 }
 0x484   : > { %v3887_v19 = vsel %vm939_vm4, %v3886_v38, %v3885_v16  ;;  %v3890_v49 = vrot.slane %v8701_v2, 1  ;;  %4495 = vbcast.lane.b32.xlu1 %v4493_v59, 256  ;;  %v4710_v10 = vrot.slane %v8701_v2, %v9897_v61  ;;  %v5411_v2 = vmov 1966171168  }
 0x485   : > { %v3889_v50 = vsel %vm941_vm5, %v3888_v43, %v3887_v19  ;;  %v4104_v43 = vunpack.c.l.s4 %v5411_v2 }
 0x486   : > { %v3891_v39 = vsel %vm943_vm6, %v3890_v49, %v3889_v50 }
 0x487   : > { %3898 = vrot.lane.b32.xlu0 %v3891_v39, %s5410_s9  ;;  %v4105_v50 = vunpack.c.0.s8 %v4104_v43  ;;  %s5412_s9 = smov [#allocation5]  }
 0x488   : > { %4509 = vbcast.lane.b32.xlu1 %v4507_v8, 256  ;;  %s5334_s11 = sshll.u32 %s5412_s9, 4  ;;  %s5335_s11 = int_to_ptr.vmem [resolvable:$false] %s5334_s11 }
 0x489   : > { %s5336_s18 = scalar_lea.vmem %s5335_s11, 8192 }
 0x48b   : > { %3995 = vrot.lane.b32.xlu0 %v8614_v53, %s5401_s12  ;;  %v4563_v53 = vrot.slane %v8534_v31, %v9897_v61  ;;  %v4556_v31 = vrot.slane %v8529_v58, %v9897_v61  ;;  %v4598_v58 = vrot.slane %v8570_v48, %v9897_v61  ;;  %v4640_v48 = vrot.slane %v8655_v42, %v9897_v61 }
 0x48c   : > { %4523 = vbcast.lane.b32.xlu1 %v4521_v36, 256  ;;  %v4682_v42 = vrot.slane %v8679_v20, %v9897_v61 }
 0x48f   : > { %3999 = vrot.lane.b32.xlu0 %v3891_v39, %s5401_s12  ;;  %s8879_s12 = scalar_lea.vmem [#allocation5], %s4874_s17  ;;  %s4925_s17 = sshll.u32 %s5475_s28, 12 }
 0x490   : > { %4537 = vbcast.lane.b32.xlu1 %v4535_v25, 256  ;;  %v9898_v25 = vld [vmem:[#allocation122_spill] sm:$0xff]  ;;  %s4793_s19 = sshll.u32 %s8879_s12, 4  ;;  %s9034_s8 = scalar_lea.hbm %s9100_s7, %s4925_s17  ;;  %s9040_s19 = int_to_ptr.vmem [resolvable:$true] %s4793_s19 }
 0x491   : > { %s5330_s22 = scalar_lea.vmem %s9040_s19, 4096  ;;  %p5337_p8 = scmp.lt.s32.totalorder %s9040_s19, %s5335_s11 }
 0x492   : > { %p5331_p6 = scmp.ne.s32.totalorder %s9040_s19, %s5330_s22  ;;  %p5338_p10 = scmp.lt.s32.totalorder %s5336_s18, %s5330_s22 }
 0x493   : > { %4502 = vbcast.lane.b32.xlu0 %v4500_v56, 256  ;;  %v8822_v56 = vsub.s32 %v4105_v50, %v9898_v25 }
 0x494   : > { %4551 = vbcast.lane.b32.xlu1 %v4549_v17, 256  ;;  %p5332_p12 = pnand %p5331_p6, %p9899_p11  ;;  %p5339_p0 = por %p5338_p10, %p5337_p8 }
 0x496   : > { %p5333_p13 = pneg %p5332_p12 }
 0x497   : > { %4516 = vbcast.lane.b32.xlu0 %v4514_v24, 256 }
 0x498   : > { %4565 = vbcast.lane.b32.xlu1 %v4563_v53, 256  ;;  %p5340_p2 = pnand %p5339_p0, %p5333_p13 }
 0x49b   : > { %4530 = vbcast.lane.b32.xlu0 %v4528_v28, 256 }
 0x49c   : > { %4579 = vbcast.lane.b32.xlu1 %v4577_v1, 256 }
 0x49f   : > { %4544 = vbcast.lane.b32.xlu0 %v4542_v45, 256 }
 0x4a0   : > { %4593 = vbcast.lane.b32.xlu1 %v4591_v51, 256 }
 0x4a3   : > { %4558 = vbcast.lane.b32.xlu0 %v4556_v31, 256 }
 0x4a4   : > { %4607 = vbcast.lane.b32.xlu1 %v4605_v14, 256 }
 0x4a7   : > { %4572 = vbcast.lane.b32.xlu0 %v4570_v41, 256 }
 0x4a8   : > { %4621 = vbcast.lane.b32.xlu1 %v4619_v13, 256 }
 0x4ab   : > { %4586 = vbcast.lane.b32.xlu0 %v4584_v7, 256 }
 0x4ac   : > { %4635 = vbcast.lane.b32.xlu1 %v4633_v32, 256 }
 0x4af   : > { %4600 = vbcast.lane.b32.xlu0 %v4598_v58, 256 }
 0x4b0   : > { %4649 = vbcast.lane.b32.xlu1 %v4647_v23, 256 }
 0x4b3   : > { %4614 = vbcast.lane.b32.xlu0 %v4612_v0, 256 }
 0x4b4   : > { %4663 = vbcast.lane.b32.xlu1 %v4661_v52, 256 }
 0x4b7   : > { %4628 = vbcast.lane.b32.xlu0 %v4626_v46, 256 }
 0x4b8   : > { %4677 = vbcast.lane.b32.xlu1 %v4675_v18, 256 }
 0x4bb   : > { %4642 = vbcast.lane.b32.xlu0 %v4640_v48, 256 }
 0x4bc   : > { %4691 = vbcast.lane.b32.xlu1 %v4689_v9, 256 }
 0x4bf   : > { %4656 = vbcast.lane.b32.xlu0 %v4654_v26, 256 }
 0x4c0   : > { %4705 = vbcast.lane.b32.xlu1 %v4703_v30, 256 }
 0x4c3   : > { %4670 = vbcast.lane.b32.xlu0 %v4668_v6, 256 }
 0x4c7   : > { %4684 = vbcast.lane.b32.xlu0 %v4682_v42, 256 }
 0x4cb   : > { %4698 = vbcast.lane.b32.xlu0 %v4696_v40, 256 }
 0x4cf   : > { %4712 = vbcast.lane.b32.xlu0 %v4710_v10, 256 }
 0x4d6   : > { %v3895_v33 = vpop.permute.xlu0 %3894 }
 0x4d8   : > { %v3893_v63 = vpop.permute.xlu1 %3892 }
 0x4d9   : > { %4997 = vmatprep.mubr.msk.f32.mxu1 %vm2385_vm15, %v3893_v63 }
 0x4da   : > { %4998 = vmatmul.mubr.msk.f32.vlgmr.msra.gmra.mrb[0].mxu1 %vm2385_vm15, %v3895_v33 }
 0x4db   : > { %5048 = vmatpush3.bf16.msra.mxu1 %v8653_v27 }
 0x4ea   : > { %v3897_v29 = vpop.permute.xlu1 %3896 }
 0x4eb   : > { %5000 = vmatprep.mubr.msk.f32.mxu1 %vm2385_vm15, %v3897_v29 }
 0x4ee   : > { %v3994_v47 = vpop.permute.xlu1 %3993 }
 0x4f2   : > { %v3998_v15 = vpop.permute.xlu1 %3997 }
 0x4f6   : > { %v8783_v44 = vpop.permute.xlu1 %4495 }
 0x4f9   : > { %v3899_v22 = vpop.permute.xlu0 %3898 }
 0x4fa   : > { %5001 = vmatmul.mubr.msk.f32.gmra.mrb[2].mxu1 %vm2385_vm15, %v3899_v22  ;;  %v8787_v5 = vpop.permute.xlu1 %4509 }
 0x4fb   : > { %5007 = vmatprep.mubr.msk.f32.mxu1 %vm1119_vm7, %v3994_v47 }
 0x4fd   : > { %v3996_v11 = vpop.permute.xlu0 %3995 }
 0x4fe   : > { %5008 = vmatmul.mubr.msk.f32.vlgmr.msra.gmra.mrb[4].mxu1 %vm1119_vm7, %v3996_v11  ;;  %v8791_v34 = vpop.permute.xlu1 %4523 }
 0x4ff   : > { %5010 = vmatprep.mubr.msk.f32.mxu1 %vm1119_vm7, %v3998_v15 }
 0x501   : > { %v4000_v60 = vpop.permute.xlu0 %3999 }
 0x502   : > { %5011 = vmatmul.mubr.msk.f32.gmra.mrb[6].mxu1 %vm1119_vm7, %v4000_v60  ;;  %v8795_v54 = vpop.permute.xlu1 %4537 }
 0x505   : > { %v8785_v27 = vpop.permute.xlu0 %4502 }
 0x506   : > { %v8799_v3 = vpop.permute.xlu1 %4551 }
 0x509   : > { %v8789_v35 = vpop.permute.xlu0 %4516 }
 0x50a   : > { %v8803_v12 = vpop.permute.xlu1 %4565 }
 0x50d   : > { %v8793_v20 = vpop.permute.xlu0 %4530 }
 0x50e   : > { %v8807_v16 = vpop.permute.xlu1 %4579 }
 0x511   : > { %v8797_v62 = vpop.permute.xlu0 %4544 }
 0x512   : > { %v8811_v38 = vpop.permute.xlu1 %4593 }
 0x515   : > { %v8801_v55 = vpop.permute.xlu0 %4558 }
 0x516   : > { %v8815_v19 = vpop.permute.xlu1 %4607 }
 0x519   : > { %v8805_v21 = vpop.permute.xlu0 %4572 }
 0x51a   : > { %v8819_v36 = vpop.permute.xlu1 %4621 }
 0x51d   : > { %v8809_v37 = vpop.permute.xlu0 %4586 }
 0x51e   : > { %v8827_v31 = vpop.permute.xlu1 %4635 }
 0x521   : > { %v8813_v59 = vpop.permute.xlu0 %4600 }
 0x522   : > { %v8853_v11 = vpop.permute.xlu1 %4649 }
 0x525   : > { %v8817_v49 = vpop.permute.xlu0 %4614 }
 0x529   : > { %v8824_v17 = vpop.permute.xlu0 %4628 }
 0x52d   : > { %v8834_v52 = vpop.permute.xlu0 %4642 }
 0x5ad   : > { %v4999_v57 = vpop.f32.mrb[0].mxu1 }
 0x5ae   : > { %v3974_v4 = vpop.f32.mrb[1].mxu1 }
 0x5cd   : > { %v5002_v39 = vpop.f32.mrb[2].mxu1 }
 0x5ce   : > { %v3984_v8 = vpop.f32.mrb[3].mxu1 }
 0x5d1   : > { %v5009_v24 = vpop.f32.mrb[4].mxu1 }
 0x5d2   : > { %v4095_v53 = vmul.f32 %v5009_v24, %v4999_v57  ;;  %v4075_v28 = vpop.f32.mrb[5].mxu1  ;;  %v8864_v24 = vpop.permute.xlu0 %4656 }
 0x5d3   : > { %v4094_v1 = vmul.f32 %v4075_v28, %v3974_v4  ;;  %v5268_v4 = vld [vmem:[%s5564_s15 + $0x40] sm:$0xff] }
 0x5d4   : > { %v4151_v45 = vcombine.high %v4095_v53, %v4095_v53  ;;  %v4158_v51 = vrot.slane %v4095_v53, %v8822_v56  ;;  %v5269_v53 = vld [vmem:[%s5564_s15 + $0x48] sm:$0xff] }
 0x5d5   : > { %v4102_v14 = vcombine.high %v4094_v1, %v4094_v1  ;;  %v4109_v41 = vrot.slane %v4094_v1, %v8822_v56  ;;  %v5012_v13 = vpop.f32.mrb[6].mxu1  ;;  %v5270_v1 = vld [vmem:[%s5564_s15 + $0x50] sm:$0xff] }
 0x5d6   : > { %v4165_v7 = vrot.slane %v4151_v45, %v8822_v56  ;;  %v4166_v32 = vcombine.high %v4158_v51, %v4158_v51  ;;  %v4174_v58 = vrot.slane %v4158_v51, %v8822_v56  ;;  %v8832_v23 = vmul.f32 %v5012_v13, %v5002_v39  ;;  %v4085_v0 = vpop.f32.mrb[7].mxu1  ;;  %v5271_v51 = vld [vmem:[%s5564_s15 + $0x60] sm:$0xff] }
 0x5d7   : > { %v4116_v46 = vrot.slane %v4102_v14, %v8822_v56  ;;  %v4117_v18 = vcombine.high %v4109_v41, %v4109_v41  ;;  %v8838_v48 = vrot.slane %v4109_v41, %v8822_v56  ;;  %v8840_v9 = vmul.f32 %v4085_v0, %v3984_v8 }
 0x5d8   : > { %v4167_v26 = vcombine.high %v4165_v7, %v4165_v7  ;;  %v4181_v30 = vrot.slane %v4165_v7, %v8822_v56  ;;  %v4188_v6 = vrot.slane %v4166_v32, %v8822_v56  ;;  %v4196_v42 = vcombine.high %v4174_v58, %v4174_v58  ;;  %v5272_v7 = vld [vmem:[%s5564_s15 + $0x58] sm:$0xff] }
 0x5d9   : > { %v4333_v40 = vrot.slane %v4174_v58, %v9897_v61  ;;  %v4118_v10 = vcombine.high %v4116_v46, %v4116_v46  ;;  %v8846_v33 = vrot.slane %v4116_v46, %v8822_v56  ;;  %v8849_v63 = vrot.slane %v4117_v18, %v8822_v56  ;;  %v5273_v58 = vld [vmem:[%s5564_s15 + $0x68] sm:$0xff]  ;;  %v5274_v46 = vld [vmem:[%s5564_s15 + $0x70] sm:$0xff] }
 0x5da   : > { %v4195_v29 = vrot.slane %v4167_v26, %v8822_v56  ;;  %v4197_v47 = vcombine.high %v4181_v30, %v4181_v30  ;;  %v4198_v22 = vcombine.high %v4188_v6, %v4188_v6  ;;  %v4337_v15 = vrot.slane %v4188_v6, %v9897_v61 }
 0x5db   : > { %v4341_v60 = vrot.slane %v4196_v42, %v9897_v61  ;;  %v4349_v57 = vrot.slane %v4181_v30, %v9897_v61  ;;  %v4466_v2 = vmul.f32 %v5268_v4, %v4333_v40  ;;  %v8859_v43 = vrot.slane %v4118_v10, %v8822_v56  ;;  %v5275_v42 = vld [vmem:[%s5564_s15 + $0x78] sm:$0xff]  ;;  %v8888_v10 = vpop.permute.xlu1 %4663 }
 0x5dc   : > { %v4199_v50 = vcombine.high %v4195_v29, %v4195_v29  ;;  %v4345_v39 = vrot.slane %v4198_v22, %v9897_v61  ;;  %v4353_v8 = vrot.slane %v4195_v29, %v9897_v61  ;;  %v4357_v25 = vrot.slane %v4197_v47, %v9897_v61 }
 0x5dd   : > { %v4467_v28 = vmul.f32 %v5269_v53, %v4337_v15  ;;  %v4468_v45 = vmul.f32 %v5270_v1, %v4341_v60  ;;  %v4470_v14 = vmul.f32 %v5271_v51, %v4349_v57  ;;  %v4722_v41 = vmul.f32 %v8799_v3, %v4466_v2  ;;  %v8910_v57 = vpop.permute.xlu0 %4670  ;;  %v5279_v53 = vld [vmem:[%s5564_s15 + $0x20] sm:$0xff]  ;;  %v5280_v1 = vld [vmem:[%s5564_s15 + $0x18] sm:$0xff]  ;;  %v5281_v51 = vld [vmem:[%s5564_s15 + $0x28] sm:$0xff] }
 0x5de   : > { %v4361_v13 = vrot.slane %v4199_v50, %v9897_v61  ;;  %v4469_v32 = vmul.f32 %v5272_v7, %v4345_v39  ;;  %v4471_v0 = vmul.f32 %v5273_v58, %v4353_v8  ;;  %v4472_v18 = vmul.f32 %v5274_v46, %v4357_v25  ;;  %v5277_v39 = vld [vmem:[%s5564_s15 + $0x8] sm:$0xff] }
 0x5df   : > { %v4723_v26 = vmul.f32 %v8801_v55, %v4467_v28  ;;  %v4724_v30 = vmul.f32 %v8803_v12, %v4468_v45  ;;  %v4726_v6 = vmul.f32 %v8807_v16, %v4470_v14  ;;  %4754 = vst [vmem:[%s8879_s12 + $0x40] sm:$0xff] %v4722_v41  ;;  %v4147_v3 = vcombine.high %v8838_v48, %v8838_v48  ;;  %v5282_v14 = vld [vmem:[%s5564_s15 + $0x30] sm:$0xff] }
 0x5e0   : > { %v4473_v55 = vmul.f32 %v5275_v42, %v4361_v13  ;;  %v4725_v12 = vmul.f32 %v8805_v21, %v4469_v32  ;;  %v4727_v16 = vmul.f32 %v8809_v37, %v4471_v0  ;;  %v4728_v40 = vmul.f32 %v8811_v38, %v4472_v18  ;;  %v5283_v13 = vld [vmem:[%s5564_s15 + $0x38] sm:$0xff]  ;;  %v8930_v18 = vpop.permute.xlu1 %4677 }
 0x5e1   : > { %4755 = vst [vmem:[%s8879_s12 + $0x48] sm:$0xff] %v4723_v26  ;;  %4756 = vst [vmem:[%s8879_s12 + $0x50] sm:$0xff] %v4724_v30  ;;  %v4148_v29 = vcombine.high %v8846_v33, %v8846_v33  ;;  %v4149_v47 = vcombine.high %v8849_v63, %v8849_v63  ;;  %v4150_v21 = vcombine.high %v8859_v43, %v8859_v43 }
 0x5e2   : > { %4758 = vst [vmem:[%s8879_s12 + $0x60] sm:$0xff] %v4726_v6  ;;  %v4301_v37 = vrot.slane %v8838_v48, %v9897_v61  ;;  %v4729_v38 = vmul.f32 %v8813_v59, %v4473_v55  ;;  %4757 = vst [vmem:[%s8879_s12 + $0x58] sm:$0xff] %v4725_v12  ;;  %v4305_v22 = vrot.slane %v8849_v63, %v9897_v61  ;;  %v5276_v63 = vld [vmem:[%s5564_s15] sm:$0xff] }
 0x5e3   : > { %4759 = vst [vmem:[%s8879_s12 + $0x68] sm:$0xff] %v4727_v16  ;;  %4760 = vst [vmem:[%s8879_s12 + $0x70] sm:$0xff] %v4728_v40  ;;  %v4309_v15 = vrot.slane %v4147_v3, %v9897_v61  ;;  %v4317_v60 = vrot.slane %v8846_v33, %v9897_v61  ;;  %v4313_v48 = vrot.slane %v4149_v47, %v9897_v61  ;;  %v5278_v33 = vld [vmem:[%s5564_s15 + $0x10] sm:$0xff] }
 0x5e4   : > { %v4321_v59 = vrot.slane %v8859_v43, %v9897_v61  ;;  %v4325_v4 = vrot.slane %v4148_v29, %v9897_v61  ;;  %v4329_v2 = vrot.slane %v4150_v21, %v9897_v61  ;;  %4761 = vst [vmem:[%s8879_s12 + $0x78] sm:$0xff] %v4729_v38  ;;  %v4458_v50 = vmul.f32 %v5276_v63, %v4301_v37  ;;  %v4692_v29 = vpop.permute.xlu1 %4691  ;;  %v5284_v63 = vld [vmem:[%s5564_s15 + $0xc0] sm:$0xff] }
 0x5e5   : > { %v4459_v8 = vmul.f32 %v5277_v39, %v4305_v22  ;;  %v4460_v25 = vmul.f32 %v5278_v33, %v4309_v15  ;;  %v4462_v28 = vmul.f32 %v5279_v53, %v4317_v60  ;;  %v4461_v45 = vmul.f32 %v5280_v1, %v4313_v48 }
 0x5e6   : > { %v4463_v43 = vmul.f32 %v5281_v51, %v4321_v59  ;;  %v4464_v41 = vmul.f32 %v5282_v14, %v4325_v4  ;;  %v4465_v7 = vmul.f32 %v5283_v13, %v4329_v2  ;;  %v4714_v32 = vmul.f32 %v8783_v44, %v4458_v50  ;;  %v5288_v13 = vld [vmem:[%s5564_s15 + $0xd8] sm:$0xff] }
 0x5e7   : > { %v4715_v58 = vmul.f32 %v8785_v27, %v4459_v8  ;;  %v4716_v0 = vmul.f32 %v8787_v5, %v4460_v25  ;;  %v4718_v46 = vmul.f32 %v8791_v34, %v4462_v28  ;;  %v4717_v26 = vmul.f32 %v8789_v35, %v4461_v45  ;;  %v5285_v28 = vld [vmem:[%s5564_s15 + $0xc8] sm:$0xff]  ;;  %v5286_v45 = vld [vmem:[%s5564_s15 + $0xd0] sm:$0xff] }
 0x5e8   : > { %v4719_v30 = vmul.f32 %v8793_v20, %v4463_v43  ;;  %v4720_v6 = vmul.f32 %v8795_v54, %v4464_v41  ;;  %v4721_v44 = vmul.f32 %v8797_v62, %v4465_v7  ;;  %4746 = vst [vmem:[%s8879_s12] sm:$0xff] %v4714_v32  ;;  %v4249_v27 = vcombine.high %v8832_v23, %v8832_v23  ;;  %v4685_v20 = vpop.permute.xlu0 %4684  ;;  %v5287_v43 = vld [vmem:[%s5564_s15 + $0xe0] sm:$0xff]  ;;  %v5289_v32 = vld [vmem:[%s5564_s15 + $0xe8] sm:$0xff] }
 0x5e9   : > { %4747 = vst [vmem:[%s8879_s12 + $0x8] sm:$0xff] %v4715_v58  ;;  %4748 = vst [vmem:[%s8879_s12 + $0x10] sm:$0xff] %v4716_v0  ;;  %v4256_v5 = vrot.slane %v8832_v23, %v8822_v56  ;;  %v4200_v35 = vcombine.high %v8840_v9, %v8840_v9  ;;  %v4207_v34 = vrot.slane %v8840_v9, %v8822_v56  ;;  %v5290_v0 = vld [vmem:[%s5564_s15 + $0xf0] sm:$0xff] }
 0x5ea   : > { %4750 = vst [vmem:[%s8879_s12 + $0x20] sm:$0xff] %v4718_v46  ;;  %4749 = vst [vmem:[%s8879_s12 + $0x18] sm:$0xff] %v4717_v26  ;;  %v4263_v54 = vrot.slane %v4249_v27, %v8822_v56  ;;  %v4706_v26 = vpop.permute.xlu1 %4705  ;;  %v5291_v27 = vld [vmem:[%s5564_s15 + $0xf8] sm:$0xff] }
 0x5eb   : > { %4751 = vst [vmem:[%s8879_s12 + $0x28] sm:$0xff] %v4719_v30  ;;  %4752 = vst [vmem:[%s8879_s12 + $0x30] sm:$0xff] %v4720_v6  ;;  %v4264_v62 = vcombine.high %v4256_v5, %v4256_v5  ;;  %v4272_v3 = vrot.slane %v4256_v5, %v8822_v56  ;;  %v4214_v42 = vrot.slane %v4200_v35, %v8822_v56 }
 0x5ec   : > { %4753 = vst [vmem:[%s8879_s12 + $0x38] sm:$0xff] %v4721_v44  ;;  %v4215_v55 = vcombine.high %v4207_v34, %v4207_v34  ;;  %v8956_v23 = vrot.slane %v4207_v34, %v8822_v56  ;;  %v4265_v12 = vcombine.high %v4263_v54, %v4263_v54  ;;  %v4279_v9 = vrot.slane %v4263_v54, %v8822_v56  ;;  %v4699_v59 = vpop.permute.xlu0 %4698 }
 0x5ed   : > { %v4286_v16 = vrot.slane %v4264_v62, %v8822_v56  ;;  %v4294_v40 = vcombine.high %v4272_v3, %v4272_v3  ;;  %v4397_v47 = vrot.slane %v4272_v3, %v9897_v61  ;;  %v4216_v21 = vcombine.high %v4214_v42, %v4214_v42 }
 0x5ee   : > { %v8962_v37 = vrot.slane %v4214_v42, %v8822_v56  ;;  %v8965_v38 = vrot.slane %v4215_v55, %v8822_v56  ;;  %v4293_v22 = vrot.slane %v4265_v12, %v8822_v56  ;;  %v4295_v15 = vcombine.high %v4279_v9, %v4279_v9 }
 0x5ef   : > { %v4296_v60 = vcombine.high %v4286_v16, %v4286_v16  ;;  %v4401_v48 = vrot.slane %v4286_v16, %v9897_v61  ;;  %v4405_v4 = vrot.slane %v4294_v40, %v9897_v61  ;;  %v4413_v2 = vrot.slane %v4279_v9, %v9897_v61 }
 0x5f0   : > { %v4482_v50 = vmul.f32 %v5284_v63, %v4397_v47  ;;  %v8973_v39 = vrot.slane %v4216_v21, %v8822_v56  ;;  %v4297_v8 = vcombine.high %v4293_v22, %v4293_v22  ;;  %v4417_v25 = vrot.slane %v4293_v22, %v9897_v61  ;;  %v4713_v62 = vpop.permute.xlu0 %4712  ;;  %v5292_v47 = vld [vmem:[%s5564_s15 + $0x80] sm:$0xff] }
 0x5f1   : > { %v4409_v33 = vrot.slane %v4296_v60, %v9897_v61  ;;  %v4421_v53 = vrot.slane %v4295_v15, %v9897_v61  ;;  %v4483_v1 = vmul.f32 %v5285_v28, %v4401_v48  ;;  %v4484_v51 = vmul.f32 %v5286_v45, %v4405_v4  ;;  %v5295_v60 = vld [vmem:[%s5564_s15 + $0xa0] sm:$0xff] }
 0x5f2   : > { %v4486_v14 = vmul.f32 %v5287_v43, %v4413_v2  ;;  %v4738_v41 = vmul.f32 %v8888_v10, %v4482_v50  ;;  %v4425_v56 = vrot.slane %v4297_v8, %v9897_v61  ;;  %v4487_v58 = vmul.f32 %v5289_v32, %v4417_v25  ;;  %v5297_v2 = vld [vmem:[%s5564_s15 + $0xa8] sm:$0xff] }
 0x5f3   : > { %v4485_v7 = vmul.f32 %v5288_v13, %v4409_v33  ;;  %v4488_v46 = vmul.f32 %v5290_v0, %v4421_v53  ;;  %v4739_v30 = vmul.f32 %v8910_v57, %v4483_v1  ;;  %v4740_v6 = vmul.f32 %v8930_v18, %v4484_v51 }
 0x5f4   : > { %v4742_v44 = vmul.f32 %v4692_v29, %v4486_v14  ;;  %4770 = vst [vmem:[%s8879_s12 + $0xc0] sm:$0xff] %v4738_v41  ;;  %v4245_v10 = vcombine.high %v8956_v23, %v8956_v23  ;;  %v4489_v5 = vmul.f32 %v5291_v27, %v4425_v56  ;;  %v4743_v34 = vmul.f32 %v4699_v59, %v4487_v58  ;;  %v5296_v59 = vld [vmem:[%s5564_s15 + $0x98] sm:$0xff] }
 0x5f5   : > { %v4741_v35 = vmul.f32 %v4685_v20, %v4485_v7  ;;  %v4744_v54 = vmul.f32 %v4706_v26, %v4488_v46  ;;  %4771 = vst [vmem:[%s8879_s12 + $0xc8] sm:$0xff] %v4739_v30  ;;  %4772 = vst [vmem:[%s8879_s12 + $0xd0] sm:$0xff] %v4740_v6  ;;  %v4246_v57 = vcombine.high %v8962_v37, %v8962_v37 }
 0x5f6   : > { %4774 = vst [vmem:[%s8879_s12 + $0xe0] sm:$0xff] %v4742_v44  ;;  %v4247_v18 = vcombine.high %v8965_v38, %v8965_v38  ;;  %v4248_v3 = vcombine.high %v8973_v39, %v8973_v39  ;;  %v4365_v20 = vrot.slane %v8956_v23, %v9897_v61  ;;  %v4745_v42 = vmul.f32 %v4713_v62, %v4489_v5 }
 0x5f7   : > { %4773 = vst [vmem:[%s8879_s12 + $0xd8] sm:$0xff] %v4741_v35  ;;  %4775 = vst [vmem:[%s8879_s12 + $0xe8] sm:$0xff] %v4743_v34  ;;  %v4369_v55 = vrot.slane %v8965_v38, %v9897_v61  ;;  %v4373_v12 = vrot.slane %v4245_v10, %v9897_v61  ;;  %v4381_v9 = vrot.slane %v8962_v37, %v9897_v61  ;;  %v5293_v38 = vld [vmem:[%s5564_s15 + $0x88] sm:$0xff]  ;;  %v5294_v37 = vld [vmem:[%s5564_s15 + $0x90] sm:$0xff] }
 0x5f8   : > { %4776 = vst [vmem:[%s8879_s12 + $0xf0] sm:$0xff] %v4744_v54  ;;  %v4377_v16 = vrot.slane %v4247_v18, %v9897_v61  ;;  %v4385_v23 = vrot.slane %v8973_v39, %v9897_v61  ;;  %v4389_v40 = vrot.slane %v4246_v57, %v9897_v61  ;;  %v4393_v29 = vrot.slane %v4248_v3, %v9897_v61  ;;  %v5298_v61 = vld [vmem:[%s5564_s15 + $0xb0] sm:$0xff]  ;;  %v5299_v39 = vld [vmem:[%s5564_s15 + $0xb8] sm:$0xff]  ;;  %s4779_s15 = scalar_lea.sflag [#allocation4], %s5558_s16 }
 0x5f9   : > { %4777 = vst [vmem:[%s8879_s12 + $0xf8] sm:$0xff] %v4745_v42  ;;  %v4474_v21 = vmul.f32 %v5292_v47, %v4365_v20  ;;  %v4475_v22 = vmul.f32 %v5293_v38, %v4369_v55  ;;  %v4476_v15 = vmul.f32 %v5294_v37, %v4373_v12  ;;  %v4478_v48 = vmul.f32 %v5295_v60, %v4381_v9 }
 0x5fa   : > { %v4477_v4 = vmul.f32 %v5296_v59, %v4377_v16  ;;  %v4479_v63 = vmul.f32 %v5297_v2, %v4385_v23  ;;  %v4480_v50 = vmul.f32 %v5298_v61, %v4389_v40  ;;  %v4481_v8 = vmul.f32 %v5299_v39, %v4393_v29 }
 0x5fb   : > { %v4730_v33 = vmul.f32 %v8815_v19, %v4474_v21  ;;  %v4731_v25 = vmul.f32 %v8817_v49, %v4475_v22  ;;  %v4732_v53 = vmul.f32 %v8819_v36, %v4476_v15  ;;  %v4734_v28 = vmul.f32 %v8827_v31, %v4478_v48 }
 0x5fc   : > { %v4733_v1 = vmul.f32 %v8824_v17, %v4477_v4  ;;  %v4735_v45 = vmul.f32 %v8834_v52, %v4479_v63  ;;  %v4736_v19 = vmul.f32 %v8853_v11, %v4480_v50  ;;  %v4737_v49 = vmul.f32 %v8864_v24, %v4481_v8 }
 0x5fd   : > { %4762 = vst [vmem:[%s8879_s12 + $0x80] sm:$0xff] %v4730_v33  ;;  %4763 = vst [vmem:[%s8879_s12 + $0x88] sm:$0xff] %v4731_v25 }
 0x5fe   : > { %4764 = vst [vmem:[%s8879_s12 + $0x90] sm:$0xff] %v4732_v53  ;;  %4766 = vst [vmem:[%s8879_s12 + $0xa0] sm:$0xff] %v4734_v28 }
 0x5ff   : > { %4765 = vst [vmem:[%s8879_s12 + $0x98] sm:$0xff] %v4733_v1  ;;  %4767 = vst [vmem:[%s8879_s12 + $0xa8] sm:$0xff] %v4735_v45 }
 0x600   : > { %4768 = vst [vmem:[%s8879_s12 + $0xb0] sm:$0xff] %v4736_v19  ;;  %4769 = vst [vmem:[%s8879_s12 + $0xb8] sm:$0xff] %v4737_v49 }
 0x601   : > { %5343 = shalt.err (!%p5340_p2)
}
 0x602   : > { %s5344_s23 = scalar_lea.hbm %s9034_s8, 4096  ;;  %s5348_s17 = scalar_lea.hbm %s9100_s7, 8192 }
 0x603   : > { %p5345_p4 = scmp.ne.s32.totalorder %s9034_s8, %s5344_s23  ;;  %p5349_p9 = scmp.lt.u32.totalorder %s9034_s8, %s9100_s7 }
 0x604   : > { %p5350_p1 = scmp.lt.u32.totalorder %s5348_s17, %s5344_s23  ;;  %p5352_p6 = scmp.lt.u32.totalorder %s5344_s23, %s9034_s8 }
 0x605   : > { %p5346_p5 = pnand %p5345_p4, %p9899_p11 }
 0x606   : > { %p5351_p3 = por %p5350_p1, %p5349_p9 }
 0x607   : > { %p5347_p7 = pneg %p5346_p5 }
 0x608   : > { %p5353_p12 = por %p5352_p6, %p5351_p3 }
 0x60a   : > { %p5354_p13 = pnand %p5353_p12, %p5347_p7 }
 0x60c   : > { %5357 = shalt.err (!%p5354_p13)
}
 0x60d   : > { %s5413_s22 = smov 128  }
 0x60e   : > { %5051 = dma.vmem_to_hbm [thread:$0]  (%p9899_p11), %s9040_s19, 4096, %s9034_s8, %s4779_s15, %s5413_s22, %s5413_s22, %s5409_s20  }
 0x60f PF: > { %s4808_s9 = sand.u32 1, %s5384_s24   ;;  %p9900_p8 = scmp.ne.s32.totalorder %s9210_s14, 0 }
 0x610   : > { %p9901_p10 = scmp.ge.s32.totalorder %s5396_s27, 2  ;;  %s4809_s11 = scalar_lea.sflag [#allocation4], %s4808_s9 }
 0x612   : > { %p5058_p0 = pnand %p9901_p10, %p9900_p8 }
 0x614   : > { %5379 = dma.done.wait (!%p5058_p0), %s4809_s11, 4096  }
 0x615   : > { %5381 = vsyncadd (!%p5058_p0), %s4809_s11, 4294963200  ;;  %p20_p2 = scmp.ge.s32.totalorder %s5479_s30, 4   ;;  %s9902_s24 = smov %s5388_s25 }
 0x616   : > { %s9903_s25 = smov %s5392_s26  ;;  %s9904_s26 = smov %s5491_s10 }
 0x617   : > { %s9905_s27 = smov %s5479_s30  ;;  %22 = sbr.rel (!%p20_p2) target bundleno = 5 (0x5), region = 93 }
 0x61e   :  { %4814 = vsyncpa [#allocation3], 1 }
 0x61f   :  { %4816 = vsyncpa [#allocation3 + $0x1], 1 }
 0x620   :  { %4817 = vsyncpa [#allocation4], 1 }
 0x621   :  { %4819 = vsyncpa [#allocation4 + $0x1], 1 }

</bundles_post_ra>
